<compile_context>
chip_gen: v5e
topology: v5e:2x2
jax: 0.10.0
libtpu: 0.0.40
codegen_flags: <defaults>
</compile_context>

<pallas_src>
import jax
import jax.numpy as jnp
from jax.experimental import pallas as pl
from jax.experimental.pallas import tpu as pltpu


def _vmem_limit_bytes() -> int:
    """Scoped-VMEM budget with headroom (v5e/v6e: 128 MiB phys, v7x: 64 MiB)."""
    cap = 64 << 20  # conservative default = v7x per-core VMEM
    try:
        cap = int(pltpu.get_tpu_info().vmem_capacity_bytes)
    except Exception:
        pass
    return max(16 << 20, min(cap // 2, 64 << 20))


_VMEM_LIMIT = _vmem_limit_bytes()


# ---------------------------------------------------------------------------
# Kernel 1: 3x3x3 conv (one output depth plane per grid step) + BN partial stats
# ---------------------------------------------------------------------------
def _conv3d_stats_kernel(xp0_ref, xp1_ref, xp2_ref, w_ref, o_ref, st_ref,
                         acc_ref):
    """One padded depth window -> one raw conv output plane.

    xp{0,1,2}_ref: (H+2, W+2, Cin)     f32 padded input planes d, d+1, d+2
    w_ref:         (3, 3, 3*Cin, Cout) bf16, laid out (kh, kw, kd*Cin+cin, cout)
    o_ref:         (H, W, Cout)        f32 raw (pre-BN, bias-free) conv output
    st_ref:        (2, Cout)           f32 per-tile [sum; sum of squares]
    acc_ref:       (H*W, Cout)         f32 VMEM scratch accumulator
    """
    H, W, Cout = o_ref.shape
    K = w_ref.shape[2]  # 3 * Cin

    # Fold the 3 kd taps into the matmul contraction dim: concatenate the three
    # depth planes once on the channel (lane) axis, then only 9 (kh, kw) taps
    # remain, each a (H*W, 3*Cin) @ (3*Cin, Cout) MXU matmul in bf16 / f32 acc.
    x = jnp.concatenate(
        [xp0_ref[...], xp1_ref[...], xp2_ref[...]], axis=-1
    ).astype(jnp.bfloat16)

    acc_ref[...] = jnp.zeros_like(acc_ref)
    for kh in range(3):
        for kw in range(3):
            patch = x[kh:kh + H, kw:kw + W, :].reshape(H * W, K)
            acc_ref[...] += jnp.dot(patch, w_ref[kh, kw],
                                    preferred_element_type=jnp.float32)

    acc = acc_ref[...]
    o_ref[...] = acc.reshape(H, W, Cout)
    # Single-pass BN statistics (reduced over all grid tiles in the wrapper).
    st_ref[0:1, :] = jnp.sum(acc, axis=0, keepdims=True)
    st_ref[1:2, :] = jnp.sum(acc * acc, axis=0, keepdims=True)


def _conv3d_with_stats(xp, w_folded):
    """xp: (N, D+2, H+2, W+2, Cin) padded activation; w_folded: (3,3,3*Cin,Cout) bf16.

    Returns (raw conv output (N, D, H, W, Cout) f32,
             per-tile stats   (N, D, 2, Cout)   f32).
    """
    N, dp2, hp2, wp2, cin = xp.shape
    D, H, W = dp2 - 2, hp2 - 2, wp2 - 2
    K, Cout = w_folded.shape[2], w_folded.shape[3]

    def plane_spec(kd):
        return pl.BlockSpec((None, None, hp2, wp2, cin),
                            lambda n, d, kd=kd: (n, d + kd, 0, 0, 0))

    return pl.pallas_call(
        _conv3d_stats_kernel,
        grid=(N, D),
        in_specs=[
            plane_spec(0), plane_spec(1), plane_spec(2),
            pl.BlockSpec((3, 3, K, Cout), lambda n, d: (0, 0, 0, 0)),
        ],
        out_specs=[
            pl.BlockSpec((None, None, H, W, Cout), lambda n, d: (n, d, 0, 0, 0)),
            pl.BlockSpec((None, None, 2, Cout), lambda n, d: (n, d, 0, 0)),
        ],
        out_shape=[
            jax.ShapeDtypeStruct((N, D, H, W, Cout), jnp.float32),
            jax.ShapeDtypeStruct((N, D, 2, Cout), jnp.float32),
        ],
        scratch_shapes=[pltpu.VMEM((H * W, Cout), jnp.float32)],
        compiler_params=pltpu.CompilerParams(
            dimension_semantics=("parallel", "parallel"),
            vmem_limit_bytes=_VMEM_LIMIT),
    )(xp, xp, xp, w_folded)


# ---------------------------------------------------------------------------
# Kernel 2: per-channel scale/shift (BN folded) + ReLU
# ---------------------------------------------------------------------------
def _affine_relu_kernel(x_ref, scale_ref, shift_ref, o_ref):
    o_ref[...] = jnp.maximum(x_ref[...] * scale_ref[...] + shift_ref[...], 0.0)


def _affine_relu_pad_kernel(x_ref, scale_ref, shift_ref, o_ref):
    # Writes one zero-padded plane of the *next* conv's input: the halo must be
    # zero in normalized space, so padding is produced here instead of a
    # wrapper-side jnp.pad of the intermediate activation.
    H, W, _ = x_ref.shape
    d = pl.program_id(1)
    o_ref[...] = jnp.zeros_like(o_ref)

    @pl.when(jnp.logical_and(d > 0, d < pl.num_programs(1) - 1))
    def _():
        y = jnp.maximum(x_ref[...] * scale_ref[...] + shift_ref[...], 0.0)
        o_ref[1:H + 1, 1:W + 1, :] = y


def _affine_relu(raw, scale, shift, *, pad_output):
    N, D, H, W, C = raw.shape
    svec = pl.BlockSpec((1, C), lambda n, d: (0, 0))
    if pad_output:
        kernel = _affine_relu_pad_kernel
        grid = (N, D + 2)
        in_x = pl.BlockSpec(
            (None, None, H, W, C),
            lambda n, d: (n, jnp.minimum(jnp.maximum(d - 1, 0), D - 1), 0, 0, 0))
        out_spec = pl.BlockSpec((None, None, H + 2, W + 2, C),
                                lambda n, d: (n, d, 0, 0, 0))
        out_shape = jax.ShapeDtypeStruct((N, D + 2, H + 2, W + 2, C), jnp.float32)
    else:
        kernel = _affine_relu_kernel
        grid = (N, D)
        in_x = pl.BlockSpec((None, None, H, W, C), lambda n, d: (n, d, 0, 0, 0))
        out_spec = pl.BlockSpec((None, None, H, W, C), lambda n, d: (n, d, 0, 0, 0))
        out_shape = jax.ShapeDtypeStruct((N, D, H, W, C), jnp.float32)

    return pl.pallas_call(
        kernel,
        grid=grid,
        in_specs=[in_x, svec, svec],
        out_specs=out_spec,
        out_shape=out_shape,
        compiler_params=pltpu.CompilerParams(
            dimension_semantics=("parallel", "parallel"),
            vmem_limit_bytes=_VMEM_LIMIT),
    )(raw, scale, shift)


# ---------------------------------------------------------------------------
# Wrapper-side glue (tiny per-channel math, weight re-layout, forward pass)
# ---------------------------------------------------------------------------
def _bn_scale_shift(stats, gamma, beta, count, eps=1e-5):
    """Fold training-mode BN (biased var) + gamma/beta into scale & shift."""
    s = jnp.sum(stats, axis=(0, 1))                          # (2, C)
    mean = s[0] / count
    var = jnp.maximum(s[1] / count - mean * mean, 0.0)
    scale = gamma * jax.lax.rsqrt(var + eps)
    shift = beta - mean * scale
    return scale.reshape(1, -1), shift.reshape(1, -1)


def _fold_weight(w):
    """(kd, kh, kw, cin, cout) -> (kh, kw, kd*cin, cout), bf16 for the MXU."""
    kd, kh, kw, cin, cout = w.shape
    w2 = jnp.transpose(w, (1, 2, 0, 3, 4)).reshape(kh, kw, kd * cin, cout)
    return w2.astype(jnp.bfloat16)


@jax.jit
def conv_block_forward(x_ncdhw, params):
    """ConvBlock.forward: (N, C_in, D, H, W) -> (N, C_out, D, H, W)."""
    x = jnp.transpose(x_ncdhw, (0, 2, 3, 4, 1))              # NCDHW -> NDHWC
    N, D, H, W, _ = x.shape
    count = N * D * H * W

    # pad=1 halo for the first conv (layer 2's halo is produced directly by the
    # padded-output affine pass, so there is no second jnp.pad round trip).
    xp = jnp.pad(x, ((0, 0), (1, 1), (1, 1), (1, 1), (0, 0)))

    raw1, st1 = _conv3d_with_stats(xp, _fold_weight(params["w1"]))
    sc1, sh1 = _bn_scale_shift(st1, params["g1"], params["be1"], count)
    a1_padded = _affine_relu(raw1, sc1, sh1, pad_output=True)

    raw2, st2 = _conv3d_with_stats(a1_padded, _fold_weight(params["w2"]))
    sc2, sh2 = _bn_scale_shift(st2, params["g2"], params["be2"], count)
    y = _affine_relu(raw2, sc2, sh2, pad_output=False)

    return jnp.transpose(y, (0, 4, 1, 2, 3))                 # NDHWC -> NCDHW


# ---------------------------------------------------------------------------
# Plain-JAX reference (mirrors PyTorch math; conv bias kept, bf16 matmuls)
# ---------------------------------------------------------------------------
def _reference_conv_bn_relu(x, w, b, gamma, beta):
    N, D, H, W, _ = x.shape
    Cout = w.shape[-1]
    xp = jnp.pad(x, ((0, 0), (1, 1), (1, 1), (1, 1), (0, 0)))
    acc = jnp.zeros((N, D, H, W, Cout), jnp.float32)
    for kd in range(3):
        for kh in range(3):
            for kw in range(3):
                patch = xp[:, kd:kd + D, kh:kh + H, kw:kw + W, :]
                acc = acc + jnp.einsum(
                    "ndhwc,co->ndhwo",
                    patch.astype(jnp.bfloat16),
                    w[kd, kh, kw].astype(jnp.bfloat16),
                    preferred_element_type=jnp.float32)
    acc = acc + b   # kernel drops this: exactly cancelled by training-mode BN
    mean = jnp.mean(acc, axis=(0, 1, 2, 3), keepdims=True)
    var = jnp.mean((acc - mean) ** 2, axis=(0, 1, 2, 3), keepdims=True)
    y = (acc - mean) * jax.lax.rsqrt(var + 1e-5) * gamma + beta
    return jnp.maximum(y, 0.0)


def _reference_forward(x_ncdhw, params):
    x = jnp.transpose(x_ncdhw, (0, 2, 3, 4, 1))
    y = _reference_conv_bn_relu(x, params["w1"], params["b1"],
                                params["g1"], params["be1"])
    y = _reference_conv_bn_relu(y, params["w2"], params["b2"],
                                params["g2"], params["be2"])
    return jnp.transpose(y, (0, 4, 1, 2, 3))


def init_params(key, in_ch, out_ch):
    ks = jax.random.split(key, 8)
    # PyTorch Conv3d weight is (out_ch, in_ch, 3, 3, 3); stored here as
    # (kd, kh, kw, in_ch, out_ch) for the channels-last kernels.
    w1 = 0.1 * jax.random.normal(ks[0], (3, 3, 3, in_ch, out_ch), jnp.float32)
    b1 = 0.1 * jax.random.normal(ks[1], (out_ch,), jnp.float32)
    g1 = 1.0 + 0.1 * jax.random.normal(ks[2], (out_ch,), jnp.float32)
    be1 = 0.1 * jax.random.normal(ks[3], (out_ch,), jnp.float32)
    w2 = 0.1 * jax.random.normal(ks[4], (3, 3, 3, out_ch, out_ch), jnp.float32)
    b2 = 0.1 * jax.random.normal(ks[5], (out_ch,), jnp.float32)
    g2 = 1.0 + 0.1 * jax.random.normal(ks[6], (out_ch,), jnp.float32)
    be2 = 0.1 * jax.random.normal(ks[7], (out_ch,), jnp.float32)
    return dict(w1=w1, b1=b1, g1=g1, be1=be1, w2=w2, b2=b2, g2=g2, be2=be2)


if __name__ == "__main__":
    key = jax.random.PRNGKey(0)
    k_x, k_p = jax.random.split(key)

    N, in_ch, out_ch, D, H, W = 2, 4, 8, 8, 8, 8
    x = jax.random.normal(k_x, (N, in_ch, D, H, W), jnp.float32)  # NCDHW
    params = init_params(k_p, in_ch, out_ch)

    out = jax.block_until_ready(conv_block_forward(x, params))
    assert out.shape == (N, out_ch, D, H, W), out.shape

    ref = _reference_forward(x, params)
    max_err = float(jnp.max(jnp.abs(out - ref)))
    assert jnp.allclose(out, ref, atol=5e-3, rtol=5e-3), max_err

    print("KERNEL_OK")
</pallas_src>

<mosaic_0001>
module attributes {stable_mosaic.version = 11 : i64} {
  func.func @_affine_relu_pad_kernel(%arg0: i32, %arg1: i32, %arg2: memref<1x1x8x8x8xf32, #tpu.memory_space<vmem>>, %arg3: memref<1x8xf32, #tpu.memory_space<vmem>>, %arg4: memref<1x8xf32, #tpu.memory_space<vmem>>, %arg5: memref<1x1x10x10x8xf32, #tpu.memory_space<vmem>>) attributes {dimension_semantics = [#tpu.dimension_semantics<parallel>, #tpu.dimension_semantics<parallel>], iteration_bounds = array<i64: 2, 10>, scalar_prefetch = 0 : i64, scratch_operands = 0 : i64, tpu.core_type = #tpu.core_type<tc>, window_params = [{transform_indices = @transform_0, window_bounds = array<i64: 1, 1, 8, 8, 8>}, {pipeline_mode = #tpu.pipeline_mode<synchronous>, transform_indices = @transform_1, window_bounds = array<i64: 1, 8>}, {pipeline_mode = #tpu.pipeline_mode<synchronous>, transform_indices = @transform_2, window_bounds = array<i64: 1, 8>}, {transform_indices = @transform_3, window_bounds = array<i64: 1, 1, 10, 10, 8>}]} {
    %cst = arith.constant 0.000000e+00 : f32
    %0 = vector.broadcast %cst : f32 to vector<10x10x8xf32>
    %c0 = arith.constant 0 : index
    %c0_0 = arith.constant 0 : index
    %c0_1 = arith.constant 0 : index
    %c0_2 = arith.constant 0 : index
    %c0_3 = arith.constant 0 : index
    %1 = vector.load %arg5[%c0, %c0_0, %c0_1, %c0_2, %c0_3] : memref<1x1x10x10x8xf32, #tpu.memory_space<vmem>>, vector<1x1x10x10x8xf32>
    %2 = vector.shape_cast %1 : vector<1x1x10x10x8xf32> to vector<10x10x8xf32>
    %3 = vector.shape_cast %0 : vector<10x10x8xf32> to vector<1x1x10x10x8xf32>
    tpu.vector_store %arg5[%c0, %c0_0, %c0_1, %c0_2, %c0_3], %3 {strides = array<i32>} : memref<1x1x10x10x8xf32, #tpu.memory_space<vmem>>, vector<1x1x10x10x8xf32>,
    %c0_i32 = arith.constant 0 : i32
    %4 = arith.cmpi sgt, %arg1, %c0_i32 : i32
    %c9_i32 = arith.constant 9 : i32
    %5 = arith.cmpi slt, %arg1, %c9_i32 : i32
    %6 = arith.andi %4, %5 : i1
    %7 = arith.extui %6 : i1 to i32
    %c0_i32_4 = arith.constant 0 : i32
    %8 = arith.cmpi ne, %7, %c0_i32_4 : i32
    scf.if %8 {
      %c0_5 = arith.constant 0 : index
      %c0_6 = arith.constant 0 : index
      %c0_7 = arith.constant 0 : index
      %c0_8 = arith.constant 0 : index
      %c0_9 = arith.constant 0 : index
      %9 = vector.load %arg2[%c0_5, %c0_6, %c0_7, %c0_8, %c0_9] : memref<1x1x8x8x8xf32, #tpu.memory_space<vmem>>, vector<1x1x8x8x8xf32>
      %10 = vector.shape_cast %9 : vector<1x1x8x8x8xf32> to vector<8x8x8xf32>
      %c0_10 = arith.constant 0 : index
      %c0_11 = arith.constant 0 : index
      %11 = vector.load %arg3[%c0_10, %c0_11] : memref<1x8xf32, #tpu.memory_space<vmem>>, vector<1x8xf32>
      %12 = vector.shape_cast %11 : vector<1x8xf32> to vector<1x1x8xf32>
      %13 = vector.broadcast %12 : vector<1x1x8xf32> to vector<8x8x8xf32>
      %14 = arith.mulf %10, %13 : vector<8x8x8xf32>
      %c0_12 = arith.constant 0 : index
      %c0_13 = arith.constant 0 : index
      %15 = vector.load %arg4[%c0_12, %c0_13] : memref<1x8xf32, #tpu.memory_space<vmem>>, vector<1x8xf32>
      %16 = vector.shape_cast %15 : vector<1x8xf32> to vector<1x1x8xf32>
      %17 = vector.broadcast %16 : vector<1x1x8xf32> to vector<8x8x8xf32>
      %18 = arith.addf %14, %17 : vector<8x8x8xf32>
      %cst_14 = arith.constant 0.000000e+00 : f32
      %19 = vector.broadcast %cst_14 : f32 to vector<8x8x8xf32>
      %20 = arith.maximumf %18, %19 : vector<8x8x8xf32>
      %c0_15 = arith.constant 0 : index
      %c0_16 = arith.constant 0 : index
      %c1 = arith.constant 1 : index
      %c1_17 = arith.constant 1 : index
      %c0_18 = arith.constant 0 : index
      %21 = vector.load %arg5[%c0_15, %c0_16, %c1, %c1_17, %c0_18] : memref<1x1x10x10x8xf32, #tpu.memory_space<vmem>>, vector<1x1x8x8x8xf32>
      %22 = vector.shape_cast %21 : vector<1x1x8x8x8xf32> to vector<8x8x8xf32>
      %23 = vector.shape_cast %20 : vector<8x8x8xf32> to vector<1x1x8x8x8xf32>
      tpu.vector_store %arg5[%c0_15, %c0_16, %c1, %c1_17, %c0_18], %23 {strides = array<i32>} : memref<1x1x10x10x8xf32, #tpu.memory_space<vmem>>, vector<1x1x8x8x8xf32>,
    } else {
    }
    return
  }
  func.func @transform_0(%arg0: i32, %arg1: i32) -> (i32, i32, i32, i32, i32) {
    %c1_i32 = arith.constant 1 : i32
    %0 = arith.subi %arg1, %c1_i32 : i32
    %c0_i32 = arith.constant 0 : i32
    %1 = arith.maxsi %0, %c0_i32 : i32
    %c7_i32 = arith.constant 7 : i32
    %2 = arith.minsi %1, %c7_i32 : i32
    %c0_i32_0 = arith.constant 0 : i32
    %c0_i32_1 = arith.constant 0 : i32
    %c0_i32_2 = arith.constant 0 : i32
    %c0_i32_3 = arith.constant 0 : i32
    return %arg0, %2, %c0_i32_0, %c0_i32_1, %c0_i32_2 : i32, i32, i32, i32, i32
  }
  func.func @transform_1(%arg0: i32, %arg1: i32) -> (i32, i32) {
    %c0_i32 = arith.constant 0 : i32
    %c0_i32_0 = arith.constant 0 : i32
    %c0_i32_1 = arith.constant 0 : i32
    return %c0_i32, %c0_i32_0 : i32, i32
  }
  func.func @transform_2(%arg0: i32, %arg1: i32) -> (i32, i32) {
    %c0_i32 = arith.constant 0 : i32
    %c0_i32_0 = arith.constant 0 : i32
    %c0_i32_1 = arith.constant 0 : i32
    return %c0_i32, %c0_i32_0 : i32, i32
  }
  func.func @transform_3(%arg0: i32, %arg1: i32) -> (i32, i32, i32, i32, i32) {
    %c0_i32 = arith.constant 0 : i32
    %c0_i32_0 = arith.constant 0 : i32
    %c0_i32_1 = arith.constant 0 : i32
    %c0_i32_2 = arith.constant 0 : i32
    return %arg0, %arg1, %c0_i32, %c0_i32_0, %c0_i32_1 : i32, i32, i32, i32, i32
  }
}

module attributes {stable_mosaic.version = 11 : i64} {
  func.func @_conv3d_stats_kernel(%arg0: i32, %arg1: i32, %arg2: memref<1x1x10x10x4xf32, #tpu.memory_space<vmem>>, %arg3: memref<1x1x10x10x4xf32, #tpu.memory_space<vmem>>, %arg4: memref<1x1x10x10x4xf32, #tpu.memory_space<vmem>>, %arg5: memref<3x3x12x8xbf16, #tpu.memory_space<vmem>>, %arg6: memref<1x1x8x8x8xf32, #tpu.memory_space<vmem>>, %arg7: memref<1x1x2x8xf32, #tpu.memory_space<vmem>>, %arg8: memref<64x8xf32, #tpu.memory_space<vmem>>) attributes {dimension_semantics = [#tpu.dimension_semantics<parallel>, #tpu.dimension_semantics<parallel>], iteration_bounds = array<i64: 2, 8>, scalar_prefetch = 0 : i64, scratch_operands = 1 : i64, tpu.core_type = #tpu.core_type<tc>, window_params = [{transform_indices = @transform_0, window_bounds = array<i64: 1, 1, 10, 10, 4>}, {transform_indices = @transform_1, window_bounds = array<i64: 1, 1, 10, 10, 4>}, {transform_indices = @transform_2, window_bounds = array<i64: 1, 1, 10, 10, 4>}, {pipeline_mode = #tpu.pipeline_mode<synchronous>, transform_indices = @transform_3, window_bounds = array<i64: 3, 3, 12, 8>}, {transform_indices = @transform_4, window_bounds = array<i64: 1, 1, 8, 8, 8>}, {transform_indices = @transform_5, window_bounds = array<i64: 1, 1, 2, 8>}]} {
    %c0 = arith.constant 0 : index
    %c0_0 = arith.constant 0 : index
    %c0_1 = arith.constant 0 : index
    %c0_2 = arith.constant 0 : index
    %c0_3 = arith.constant 0 : index
    %0 = vector.load %arg2[%c0, %c0_0, %c0_1, %c0_2, %c0_3] : memref<1x1x10x10x4xf32, #tpu.memory_space<vmem>>, vector<1x1x10x10x4xf32>
    %1 = vector.shape_cast %0 : vector<1x1x10x10x4xf32> to vector<10x10x4xf32>
    %c0_4 = arith.constant 0 : index
    %c0_5 = arith.constant 0 : index
    %c0_6 = arith.constant 0 : index
    %c0_7 = arith.constant 0 : index
    %c0_8 = arith.constant 0 : index
    %2 = vector.load %arg3[%c0_4, %c0_5, %c0_6, %c0_7, %c0_8] : memref<1x1x10x10x4xf32, #tpu.memory_space<vmem>>, vector<1x1x10x10x4xf32>
    %3 = vector.shape_cast %2 : vector<1x1x10x10x4xf32> to vector<10x10x4xf32>
    %c0_9 = arith.constant 0 : index
    %c0_10 = arith.constant 0 : index
    %c0_11 = arith.constant 0 : index
    %c0_12 = arith.constant 0 : index
    %c0_13 = arith.constant 0 : index
    %4 = vector.load %arg4[%c0_9, %c0_10, %c0_11, %c0_12, %c0_13] : memref<1x1x10x10x4xf32, #tpu.memory_space<vmem>>, vector<1x1x10x10x4xf32>
    %5 = vector.shape_cast %4 : vector<1x1x10x10x4xf32> to vector<10x10x4xf32>
    %6 = tpu.concatenate %1, %3, %5 in 2 : vector<10x10x4xf32>, vector<10x10x4xf32>, vector<10x10x4xf32> -> vector<10x10x12xf32>
    %7 = arith.truncf %6 : vector<10x10x12xf32> to vector<10x10x12xbf16>
    %cst = arith.constant 0.000000e+00 : f32
    %8 = vector.broadcast %cst : f32 to vector<64x8xf32>
    %c0_14 = arith.constant 0 : index
    %c0_15 = arith.constant 0 : index
    %9 = vector.load %arg8[%c0_14, %c0_15] : memref<64x8xf32, #tpu.memory_space<vmem>>, vector<64x8xf32>
    tpu.vector_store %arg8[%c0_14, %c0_15], %8 {strides = array<i32>} : memref<64x8xf32, #tpu.memory_space<vmem>>, vector<64x8xf32>,
    %10 = vector.extract_strided_slice %7 {offsets = [0, 0, 0], sizes = [8, 8, 12], strides = [1, 1, 1]} : vector<10x10x12xbf16> to vector<8x8x12xbf16>
    %11 = vector.shape_cast %10 : vector<8x8x12xbf16> to vector<64x12xbf16>
    %c0_16 = arith.constant 0 : index
    %c0_17 = arith.constant 0 : index
    %12 = vector.load %arg8[%c0_16, %c0_17] : memref<64x8xf32, #tpu.memory_space<vmem>>, vector<64x8xf32>
    %c0_18 = arith.constant 0 : index
    %c0_19 = arith.constant 0 : index
    %c0_20 = arith.constant 0 : index
    %c0_21 = arith.constant 0 : index
    %13 = vector.load %arg5[%c0_18, %c0_19, %c0_20, %c0_21] : memref<3x3x12x8xbf16, #tpu.memory_space<vmem>>, vector<1x1x12x8xbf16>
    %14 = vector.shape_cast %13 : vector<1x1x12x8xbf16> to vector<12x8xbf16>
    %cst_22 = arith.constant dense<0.000000e+00> : vector<64x8xf32>
    %15 = tpu.matmul %11, %14, %cst_22 {dimension_numbers = #tpu.dot_dimension_numbers<[1], [0], [0], [1], [0, 0, 1, 1], [], []>} : vector<64x12xbf16>, vector<12x8xbf16>, vector<64x8xf32> -> vector<64x8xf32>
    %16 = arith.addf %12, %15 : vector<64x8xf32>
    %c0_23 = arith.constant 0 : index
    %c0_24 = arith.constant 0 : index
    %17 = vector.load %arg8[%c0_23, %c0_24] : memref<64x8xf32, #tpu.memory_space<vmem>>, vector<64x8xf32>
    tpu.vector_store %arg8[%c0_23, %c0_24], %16 {strides = array<i32>} : memref<64x8xf32, #tpu.memory_space<vmem>>, vector<64x8xf32>,
    %18 = vector.extract_strided_slice %7 {offsets = [0, 1, 0], sizes = [8, 8, 12], strides = [1, 1, 1]} : vector<10x10x12xbf16> to vector<8x8x12xbf16>
    %19 = vector.shape_cast %18 : vector<8x8x12xbf16> to vector<64x12xbf16>
    %c0_25 = arith.constant 0 : index
    %c0_26 = arith.constant 0 : index
    %20 = vector.load %arg8[%c0_25, %c0_26] : memref<64x8xf32, #tpu.memory_space<vmem>>, vector<64x8xf32>
    %c0_27 = arith.constant 0 : index
    %c1 = arith.constant 1 : index
    %c0_28 = arith.constant 0 : index
    %c0_29 = arith.constant 0 : index
    %21 = vector.load %arg5[%c0_27, %c1, %c0_28, %c0_29] : memref<3x3x12x8xbf16, #tpu.memory_space<vmem>>, vector<1x1x12x8xbf16>
    %22 = vector.shape_cast %21 : vector<1x1x12x8xbf16> to vector<12x8xbf16>
    %cst_30 = arith.constant dense<0.000000e+00> : vector<64x8xf32>
    %23 = tpu.matmul %19, %22, %cst_30 {dimension_numbers = #tpu.dot_dimension_numbers<[1], [0], [0], [1], [0, 0, 1, 1], [], []>} : vector<64x12xbf16>, vector<12x8xbf16>, vector<64x8xf32> -> vector<64x8xf32>
    %24 = arith.addf %20, %23 : vector<64x8xf32>
    %c0_31 = arith.constant 0 : index
    %c0_32 = arith.constant 0 : index
    %25 = vector.load %arg8[%c0_31, %c0_32] : memref<64x8xf32, #tpu.memory_space<vmem>>, vector<64x8xf32>
    tpu.vector_store %arg8[%c0_31, %c0_32], %24 {strides = array<i32>} : memref<64x8xf32, #tpu.memory_space<vmem>>, vector<64x8xf32>,
    %26 = vector.extract_strided_slice %7 {offsets = [0, 2, 0], sizes = [8, 8, 12], strides = [1, 1, 1]} : vector<10x10x12xbf16> to vector<8x8x12xbf16>
    %27 = vector.shape_cast %26 : vector<8x8x12xbf16> to vector<64x12xbf16>
    %c0_33 = arith.constant 0 : index
    %c0_34 = arith.constant 0 : index
    %28 = vector.load %arg8[%c0_33, %c0_34] : memref<64x8xf32, #tpu.memory_space<vmem>>, vector<64x8xf32>
    %c0_35 = arith.constant 0 : index
    %c2 = arith.constant 2 : index
    %c0_36 = arith.constant 0 : index
    %c0_37 = arith.constant 0 : index
    %29 = vector.load %arg5[%c0_35, %c2, %c0_36, %c0_37] : memref<3x3x12x8xbf16, #tpu.memory_space<vmem>>, vector<1x1x12x8xbf16>
    %30 = vector.shape_cast %29 : vector<1x1x12x8xbf16> to vector<12x8xbf16>
    %cst_38 = arith.constant dense<0.000000e+00> : vector<64x8xf32>
    %31 = tpu.matmul %27, %30, %cst_38 {dimension_numbers = #tpu.dot_dimension_numbers<[1], [0], [0], [1], [0, 0, 1, 1], [], []>} : vector<64x12xbf16>, vector<12x8xbf16>, vector<64x8xf32> -> vector<64x8xf32>
    %32 = arith.addf %28, %31 : vector<64x8xf32>
    %c0_39 = arith.constant 0 : index
    %c0_40 = arith.constant 0 : index
    %33 = vector.load %arg8[%c0_39, %c0_40] : memref<64x8xf32, #tpu.memory_space<vmem>>, vector<64x8xf32>
    tpu.vector_store %arg8[%c0_39, %c0_40], %32 {strides = array<i32>} : memref<64x8xf32, #tpu.memory_space<vmem>>, vector<64x8xf32>,
    %34 = vector.extract_strided_slice %7 {offsets = [1, 0, 0], sizes = [8, 8, 12], strides = [1, 1, 1]} : vector<10x10x12xbf16> to vector<8x8x12xbf16>
    %35 = vector.shape_cast %34 : vector<8x8x12xbf16> to vector<64x12xbf16>
    %c0_41 = arith.constant 0 : index
    %c0_42 = arith.constant 0 : index
    %36 = vector.load %arg8[%c0_41, %c0_42] : memref<64x8xf32, #tpu.memory_space<vmem>>, vector<64x8xf32>
    %c1_43 = arith.constant 1 : index
    %c0_44 = arith.constant 0 : index
    %c0_45 = arith.constant 0 : index
    %c0_46 = arith.constant 0 : index
    %37 = vector.load %arg5[%c1_43, %c0_44, %c0_45, %c0_46] : memref<3x3x12x8xbf16, #tpu.memory_space<vmem>>, vector<1x1x12x8xbf16>
    %38 = vector.shape_cast %37 : vector<1x1x12x8xbf16> to vector<12x8xbf16>
    %cst_47 = arith.constant dense<0.000000e+00> : vector<64x8xf32>
    %39 = tpu.matmul %35, %38, %cst_47 {dimension_numbers = #tpu.dot_dimension_numbers<[1], [0], [0], [1], [0, 0, 1, 1], [], []>} : vector<64x12xbf16>, vector<12x8xbf16>, vector<64x8xf32> -> vector<64x8xf32>
    %40 = arith.addf %36, %39 : vector<64x8xf32>
    %c0_48 = arith.constant 0 : index
    %c0_49 = arith.constant 0 : index
    %41 = vector.load %arg8[%c0_48, %c0_49] : memref<64x8xf32, #tpu.memory_space<vmem>>, vector<64x8xf32>
    tpu.vector_store %arg8[%c0_48, %c0_49], %40 {strides = array<i32>} : memref<64x8xf32, #tpu.memory_space<vmem>>, vector<64x8xf32>,
    %42 = vector.extract_strided_slice %7 {offsets = [1, 1, 0], sizes = [8, 8, 12], strides = [1, 1, 1]} : vector<10x10x12xbf16> to vector<8x8x12xbf16>
    %43 = vector.shape_cast %42 : vector<8x8x12xbf16> to vector<64x12xbf16>
    %c0_50 = arith.constant 0 : index
    %c0_51 = arith.constant 0 : index
    %44 = vector.load %arg8[%c0_50, %c0_51] : memref<64x8xf32, #tpu.memory_space<vmem>>, vector<64x8xf32>
    %c1_52 = arith.constant 1 : index
    %c1_53 = arith.constant 1 : index
    %c0_54 = arith.constant 0 : index
    %c0_55 = arith.constant 0 : index
    %45 = vector.load %arg5[%c1_52, %c1_53, %c0_54, %c0_55] : memref<3x3x12x8xbf16, #tpu.memory_space<vmem>>, vector<1x1x12x8xbf16>
    %46 = vector.shape_cast %45 : vector<1x1x12x8xbf16> to vector<12x8xbf16>
    %cst_56 = arith.constant dense<0.000000e+00> : vector<64x8xf32>
    %47 = tpu.matmul %43, %46, %cst_56 {dimension_numbers = #tpu.dot_dimension_numbers<[1], [0], [0], [1], [0, 0, 1, 1], [], []>} : vector<64x12xbf16>, vector<12x8xbf16>, vector<64x8xf32> -> vector<64x8xf32>
    %48 = arith.addf %44, %47 : vector<64x8xf32>
    %c0_57 = arith.constant 0 : index
    %c0_58 = arith.constant 0 : index
    %49 = vector.load %arg8[%c0_57, %c0_58] : memref<64x8xf32, #tpu.memory_space<vmem>>, vector<64x8xf32>
    tpu.vector_store %arg8[%c0_57, %c0_58], %48 {strides = array<i32>} : memref<64x8xf32, #tpu.memory_space<vmem>>, vector<64x8xf32>,
    %50 = vector.extract_strided_slice %7 {offsets = [1, 2, 0], sizes = [8, 8, 12], strides = [1, 1, 1]} : vector<10x10x12xbf16> to vector<8x8x12xbf16>
    %51 = vector.shape_cast %50 : vector<8x8x12xbf16> to vector<64x12xbf16>
    %c0_59 = arith.constant 0 : index
    %c0_60 = arith.constant 0 : index
    %52 = vector.load %arg8[%c0_59, %c0_60] : memref<64x8xf32, #tpu.memory_space<vmem>>, vector<64x8xf32>
    %c1_61 = arith.constant 1 : index
    %c2_62 = arith.constant 2 : index
    %c0_63 = arith.constant 0 : index
    %c0_64 = arith.constant 0 : index
    %53 = vector.load %arg5[%c1_61, %c2_62, %c0_63, %c0_64] : memref<3x3x12x8xbf16, #tpu.memory_space<vmem>>, vector<1x1x12x8xbf16>
    %54 = vector.shape_cast %53 : vector<1x1x12x8xbf16> to vector<12x8xbf16>
    %cst_65 = arith.constant dense<0.000000e+00> : vector<64x8xf32>
    %55 = tpu.matmul %51, %54, %cst_65 {dimension_numbers = #tpu.dot_dimension_numbers<[1], [0], [0], [1], [0, 0, 1, 1], [], []>} : vector<64x12xbf16>, vector<12x8xbf16>, vector<64x8xf32> -> vector<64x8xf32>
    %56 = arith.addf %52, %55 : vector<64x8xf32>
    %c0_66 = arith.constant 0 : index
    %c0_67 = arith.constant 0 : index
    %57 = vector.load %arg8[%c0_66, %c0_67] : memref<64x8xf32, #tpu.memory_space<vmem>>, vector<64x8xf32>
    tpu.vector_store %arg8[%c0_66, %c0_67], %56 {strides = array<i32>} : memref<64x8xf32, #tpu.memory_space<vmem>>, vector<64x8xf32>,
    %58 = vector.extract_strided_slice %7 {offsets = [2, 0, 0], sizes = [8, 8, 12], strides = [1, 1, 1]} : vector<10x10x12xbf16> to vector<8x8x12xbf16>
    %59 = vector.shape_cast %58 : vector<8x8x12xbf16> to vector<64x12xbf16>
    %c0_68 = arith.constant 0 : index
    %c0_69 = arith.constant 0 : index
    %60 = vector.load %arg8[%c0_68, %c0_69] : memref<64x8xf32, #tpu.memory_space<vmem>>, vector<64x8xf32>
    %c2_70 = arith.constant 2 : index
    %c0_71 = arith.constant 0 : index
    %c0_72 = arith.constant 0 : index
    %c0_73 = arith.constant 0 : index
    %61 = vector.load %arg5[%c2_70, %c0_71, %c0_72, %c0_73] : memref<3x3x12x8xbf16, #tpu.memory_space<vmem>>, vector<1x1x12x8xbf16>
    %62 = vector.shape_cast %61 : vector<1x1x12x8xbf16> to vector<12x8xbf16>
    %cst_74 = arith.constant dense<0.000000e+00> : vector<64x8xf32>
    %63 = tpu.matmul %59, %62, %cst_74 {dimension_numbers = #tpu.dot_dimension_numbers<[1], [0], [0], [1], [0, 0, 1, 1], [], []>} : vector<64x12xbf16>, vector<12x8xbf16>, vector<64x8xf32> -> vector<64x8xf32>
    %64 = arith.addf %60, %63 : vector<64x8xf32>
    %c0_75 = arith.constant 0 : index
    %c0_76 = arith.constant 0 : index
    %65 = vector.load %arg8[%c0_75, %c0_76] : memref<64x8xf32, #tpu.memory_space<vmem>>, vector<64x8xf32>
    tpu.vector_store %arg8[%c0_75, %c0_76], %64 {strides = array<i32>} : memref<64x8xf32, #tpu.memory_space<vmem>>, vector<64x8xf32>,
    %66 = vector.extract_strided_slice %7 {offsets = [2, 1, 0], sizes = [8, 8, 12], strides = [1, 1, 1]} : vector<10x10x12xbf16> to vector<8x8x12xbf16>
    %67 = vector.shape_cast %66 : vector<8x8x12xbf16> to vector<64x12xbf16>
    %c0_77 = arith.constant 0 : index
    %c0_78 = arith.constant 0 : index
    %68 = vector.load %arg8[%c0_77, %c0_78] : memref<64x8xf32, #tpu.memory_space<vmem>>, vector<64x8xf32>
    %c2_79 = arith.constant 2 : index
    %c1_80 = arith.constant 1 : index
    %c0_81 = arith.constant 0 : index
    %c0_82 = arith.constant 0 : index
    %69 = vector.load %arg5[%c2_79, %c1_80, %c0_81, %c0_82] : memref<3x3x12x8xbf16, #tpu.memory_space<vmem>>, vector<1x1x12x8xbf16>
    %70 = vector.shape_cast %69 : vector<1x1x12x8xbf16> to vector<12x8xbf16>
    %cst_83 = arith.constant dense<0.000000e+00> : vector<64x8xf32>
    %71 = tpu.matmul %67, %70, %cst_83 {dimension_numbers = #tpu.dot_dimension_numbers<[1], [0], [0], [1], [0, 0, 1, 1], [], []>} : vector<64x12xbf16>, vector<12x8xbf16>, vector<64x8xf32> -> vector<64x8xf32>
    %72 = arith.addf %68, %71 : vector<64x8xf32>
    %c0_84 = arith.constant 0 : index
    %c0_85 = arith.constant 0 : index
    %73 = vector.load %arg8[%c0_84, %c0_85] : memref<64x8xf32, #tpu.memory_space<vmem>>, vector<64x8xf32>
    tpu.vector_store %arg8[%c0_84, %c0_85], %72 {strides = array<i32>} : memref<64x8xf32, #tpu.memory_space<vmem>>, vector<64x8xf32>,
    %74 = vector.extract_strided_slice %7 {offsets = [2, 2, 0], sizes = [8, 8, 12], strides = [1, 1, 1]} : vector<10x10x12xbf16> to vector<8x8x12xbf16>
    %75 = vector.shape_cast %74 : vector<8x8x12xbf16> to vector<64x12xbf16>
    %c0_86 = arith.constant 0 : index
    %c0_87 = arith.constant 0 : index
    %76 = vector.load %arg8[%c0_86, %c0_87] : memref<64x8xf32, #tpu.memory_space<vmem>>, vector<64x8xf32>
    %c2_88 = arith.constant 2 : index
    %c2_89 = arith.constant 2 : index
    %c0_90 = arith.constant 0 : index
    %c0_91 = arith.constant 0 : index
    %77 = vector.load %arg5[%c2_88, %c2_89, %c0_90, %c0_91] : memref<3x3x12x8xbf16, #tpu.memory_space<vmem>>, vector<1x1x12x8xbf16>
    %78 = vector.shape_cast %77 : vector<1x1x12x8xbf16> to vector<12x8xbf16>
    %cst_92 = arith.constant dense<0.000000e+00> : vector<64x8xf32>
    %79 = tpu.matmul %75, %78, %cst_92 {dimension_numbers = #tpu.dot_dimension_numbers<[1], [0], [0], [1], [0, 0, 1, 1], [], []>} : vector<64x12xbf16>, vector<12x8xbf16>, vector<64x8xf32> -> vector<64x8xf32>
    %80 = arith.addf %76, %79 : vector<64x8xf32>
    %c0_93 = arith.constant 0 : index
    %c0_94 = arith.constant 0 : index
    %81 = vector.load %arg8[%c0_93, %c0_94] : memref<64x8xf32, #tpu.memory_space<vmem>>, vector<64x8xf32>
    tpu.vector_store %arg8[%c0_93, %c0_94], %80 {strides = array<i32>} : memref<64x8xf32, #tpu.memory_space<vmem>>, vector<64x8xf32>,
    %c0_95 = arith.constant 0 : index
    %c0_96 = arith.constant 0 : index
    %82 = vector.load %arg8[%c0_95, %c0_96] : memref<64x8xf32, #tpu.memory_space<vmem>>, vector<64x8xf32>
    %83 = vector.shape_cast %82 : vector<64x8xf32> to vector<8x8x8xf32>
    %c0_97 = arith.constant 0 : index
    %c0_98 = arith.constant 0 : index
    %c0_99 = arith.constant 0 : index
    %c0_100 = arith.constant 0 : index
    %c0_101 = arith.constant 0 : index
    %84 = vector.load %arg6[%c0_97, %c0_98, %c0_99, %c0_100, %c0_101] : memref<1x1x8x8x8xf32, #tpu.memory_space<vmem>>, vector<1x1x8x8x8xf32>
    %85 = vector.shape_cast %84 : vector<1x1x8x8x8xf32> to vector<8x8x8xf32>
    %86 = vector.shape_cast %83 : vector<8x8x8xf32> to vector<1x1x8x8x8xf32>
    tpu.vector_store %arg6[%c0_97, %c0_98, %c0_99, %c0_100, %c0_101], %86 {strides = array<i32>} : memref<1x1x8x8x8xf32, #tpu.memory_space<vmem>>, vector<1x1x8x8x8xf32>,
    %cst_102 = arith.constant dense<0.000000e+00> : vector<8xf32>
    %87 = vector.multi_reduction <add>, %82, %cst_102 [0] : vector<64x8xf32> to vector<8xf32>
    %88 = vector.shape_cast %87 : vector<8xf32> to vector<1x8xf32>
    %c0_103 = arith.constant 0 : index
    %c0_104 = arith.constant 0 : index
    %c0_105 = arith.constant 0 : index
    %c0_106 = arith.constant 0 : index
    %89 = vector.load %arg7[%c0_103, %c0_104, %c0_105, %c0_106] : memref<1x1x2x8xf32, #tpu.memory_space<vmem>>, vector<1x1x1x8xf32>
    %90 = vector.shape_cast %89 : vector<1x1x1x8xf32> to vector<1x8xf32>
    %91 = vector.shape_cast %88 : vector<1x8xf32> to vector<1x1x1x8xf32>
    tpu.vector_store %arg7[%c0_103, %c0_104, %c0_105, %c0_106], %91 {strides = array<i32>} : memref<1x1x2x8xf32, #tpu.memory_space<vmem>>, vector<1x1x1x8xf32>,
    %92 = arith.mulf %82, %82 : vector<64x8xf32>
    %cst_107 = arith.constant dense<0.000000e+00> : vector<8xf32>
    %93 = vector.multi_reduction <add>, %92, %cst_107 [0] : vector<64x8xf32> to vector<8xf32>
    %94 = vector.shape_cast %93 : vector<8xf32> to vector<1x8xf32>
    %c0_108 = arith.constant 0 : index
    %c0_109 = arith.constant 0 : index
    %c1_110 = arith.constant 1 : index
    %c0_111 = arith.constant 0 : index
    %95 = vector.load %arg7[%c0_108, %c0_109, %c1_110, %c0_111] : memref<1x1x2x8xf32, #tpu.memory_space<vmem>>, vector<1x1x1x8xf32>
    %96 = vector.shape_cast %95 : vector<1x1x1x8xf32> to vector<1x8xf32>
    %97 = vector.shape_cast %94 : vector<1x8xf32> to vector<1x1x1x8xf32>
    tpu.vector_store %arg7[%c0_108, %c0_109, %c1_110, %c0_111], %97 {strides = array<i32>} : memref<1x1x2x8xf32, #tpu.memory_space<vmem>>, vector<1x1x1x8xf32>,
    return
  }
  func.func @transform_0(%arg0: i32, %arg1: i32) -> (i32, i32, i32, i32, i32) {
    %c0_i32 = arith.constant 0 : i32
    %0 = arith.addi %arg1, %c0_i32 : i32
    %c0_i32_0 = arith.constant 0 : i32
    %c0_i32_1 = arith.constant 0 : i32
    %c0_i32_2 = arith.constant 0 : i32
    %c0_i32_3 = arith.constant 0 : i32
    return %arg0, %0, %c0_i32_0, %c0_i32_1, %c0_i32_2 : i32, i32, i32, i32, i32
  }
  func.func @transform_1(%arg0: i32, %arg1: i32) -> (i32, i32, i32, i32, i32) {
    %c1_i32 = arith.constant 1 : i32
    %0 = arith.addi %arg1, %c1_i32 : i32
    %c0_i32 = arith.constant 0 : i32
    %c0_i32_0 = arith.constant 0 : i32
    %c0_i32_1 = arith.constant 0 : i32
    %c0_i32_2 = arith.constant 0 : i32
    return %arg0, %0, %c0_i32, %c0_i32_0, %c0_i32_1 : i32, i32, i32, i32, i32
  }
  func.func @transform_2(%arg0: i32, %arg1: i32) -> (i32, i32, i32, i32, i32) {
    %c2_i32 = arith.constant 2 : i32
    %0 = arith.addi %arg1, %c2_i32 : i32
    %c0_i32 = arith.constant 0 : i32
    %c0_i32_0 = arith.constant 0 : i32
    %c0_i32_1 = arith.constant 0 : i32
    %c0_i32_2 = arith.constant 0 : i32
    return %arg0, %0, %c0_i32, %c0_i32_0, %c0_i32_1 : i32, i32, i32, i32, i32
  }
  func.func @transform_3(%arg0: i32, %arg1: i32) -> (i32, i32, i32, i32) {
    %c0_i32 = arith.constant 0 : i32
    %c0_i32_0 = arith.constant 0 : i32
    %c0_i32_1 = arith.constant 0 : i32
    %c0_i32_2 = arith.constant 0 : i32
    %c0_i32_3 = arith.constant 0 : i32
    return %c0_i32, %c0_i32_0, %c0_i32_1, %c0_i32_2 : i32, i32, i32, i32
  }
  func.func @transform_4(%arg0: i32, %arg1: i32) -> (i32, i32, i32, i32, i32) {
    %c0_i32 = arith.constant 0 : i32
    %c0_i32_0 = arith.constant 0 : i32
    %c0_i32_1 = arith.constant 0 : i32
    %c0_i32_2 = arith.constant 0 : i32
    return %arg0, %arg1, %c0_i32, %c0_i32_0, %c0_i32_1 : i32, i32, i32, i32, i32
  }
  func.func @transform_5(%arg0: i32, %arg1: i32) -> (i32, i32, i32, i32) {
    %c0_i32 = arith.constant 0 : i32
    %c0_i32_0 = arith.constant 0 : i32
    %c0_i32_1 = arith.constant 0 : i32
    return %arg0, %arg1, %c0_i32, %c0_i32_0 : i32, i32, i32, i32
  }
}

module attributes {stable_mosaic.version = 11 : i64} {
  func.func @_affine_relu_kernel(%arg0: i32, %arg1: i32, %arg2: memref<1x1x8x8x8xf32, #tpu.memory_space<vmem>>, %arg3: memref<1x8xf32, #tpu.memory_space<vmem>>, %arg4: memref<1x8xf32, #tpu.memory_space<vmem>>, %arg5: memref<1x1x8x8x8xf32, #tpu.memory_space<vmem>>) attributes {dimension_semantics = [#tpu.dimension_semantics<parallel>, #tpu.dimension_semantics<parallel>], iteration_bounds = array<i64: 2, 8>, scalar_prefetch = 0 : i64, scratch_operands = 0 : i64, tpu.core_type = #tpu.core_type<tc>, window_params = [{transform_indices = @transform_0, window_bounds = array<i64: 1, 1, 8, 8, 8>}, {pipeline_mode = #tpu.pipeline_mode<synchronous>, transform_indices = @transform_1, window_bounds = array<i64: 1, 8>}, {pipeline_mode = #tpu.pipeline_mode<synchronous>, transform_indices = @transform_2, window_bounds = array<i64: 1, 8>}, {transform_indices = @transform_3, window_bounds = array<i64: 1, 1, 8, 8, 8>}]} {
    %c0 = arith.constant 0 : index
    %c0_0 = arith.constant 0 : index
    %c0_1 = arith.constant 0 : index
    %c0_2 = arith.constant 0 : index
    %c0_3 = arith.constant 0 : index
    %0 = vector.load %arg2[%c0, %c0_0, %c0_1, %c0_2, %c0_3] : memref<1x1x8x8x8xf32, #tpu.memory_space<vmem>>, vector<1x1x8x8x8xf32>
    %1 = vector.shape_cast %0 : vector<1x1x8x8x8xf32> to vector<8x8x8xf32>
    %c0_4 = arith.constant 0 : index
    %c0_5 = arith.constant 0 : index
    %2 = vector.load %arg3[%c0_4, %c0_5] : memref<1x8xf32, #tpu.memory_space<vmem>>, vector<1x8xf32>
    %3 = vector.shape_cast %2 : vector<1x8xf32> to vector<1x1x8xf32>
    %4 = vector.broadcast %3 : vector<1x1x8xf32> to vector<8x8x8xf32>
    %5 = arith.mulf %1, %4 : vector<8x8x8xf32>
    %c0_6 = arith.constant 0 : index
    %c0_7 = arith.constant 0 : index
    %6 = vector.load %arg4[%c0_6, %c0_7] : memref<1x8xf32, #tpu.memory_space<vmem>>, vector<1x8xf32>
    %7 = vector.shape_cast %6 : vector<1x8xf32> to vector<1x1x8xf32>
    %8 = vector.broadcast %7 : vector<1x1x8xf32> to vector<8x8x8xf32>
    %9 = arith.addf %5, %8 : vector<8x8x8xf32>
    %cst = arith.constant 0.000000e+00 : f32
    %10 = vector.broadcast %cst : f32 to vector<8x8x8xf32>
    %11 = arith.maximumf %9, %10 : vector<8x8x8xf32>
    %c0_8 = arith.constant 0 : index
    %c0_9 = arith.constant 0 : index
    %c0_10 = arith.constant 0 : index
    %c0_11 = arith.constant 0 : index
    %c0_12 = arith.constant 0 : index
    %12 = vector.load %arg5[%c0_8, %c0_9, %c0_10, %c0_11, %c0_12] : memref<1x1x8x8x8xf32, #tpu.memory_space<vmem>>, vector<1x1x8x8x8xf32>
    %13 = vector.shape_cast %12 : vector<1x1x8x8x8xf32> to vector<8x8x8xf32>
    %14 = vector.shape_cast %11 : vector<8x8x8xf32> to vector<1x1x8x8x8xf32>
    tpu.vector_store %arg5[%c0_8, %c0_9, %c0_10, %c0_11, %c0_12], %14 {strides = array<i32>} : memref<1x1x8x8x8xf32, #tpu.memory_space<vmem>>, vector<1x1x8x8x8xf32>,
    return
  }
  func.func @transform_0(%arg0: i32, %arg1: i32) -> (i32, i32, i32, i32, i32) {
    %c0_i32 = arith.constant 0 : i32
    %c0_i32_0 = arith.constant 0 : i32
    %c0_i32_1 = arith.constant 0 : i32
    %c0_i32_2 = arith.constant 0 : i32
    return %arg0, %arg1, %c0_i32, %c0_i32_0, %c0_i32_1 : i32, i32, i32, i32, i32
  }
  func.func @transform_1(%arg0: i32, %arg1: i32) -> (i32, i32) {
    %c0_i32 = arith.constant 0 : i32
    %c0_i32_0 = arith.constant 0 : i32
    %c0_i32_1 = arith.constant 0 : i32
    return %c0_i32, %c0_i32_0 : i32, i32
  }
  func.func @transform_2(%arg0: i32, %arg1: i32) -> (i32, i32) {
    %c0_i32 = arith.constant 0 : i32
    %c0_i32_0 = arith.constant 0 : i32
    %c0_i32_1 = arith.constant 0 : i32
    return %c0_i32, %c0_i32_0 : i32, i32
  }
  func.func @transform_3(%arg0: i32, %arg1: i32) -> (i32, i32, i32, i32, i32) {
    %c0_i32 = arith.constant 0 : i32
    %c0_i32_0 = arith.constant 0 : i32
    %c0_i32_1 = arith.constant 0 : i32
    %c0_i32_2 = arith.constant 0 : i32
    return %arg0, %arg1, %c0_i32, %c0_i32_0, %c0_i32_1 : i32, i32, i32, i32, i32
  }
}

module attributes {stable_mosaic.version = 11 : i64} {
  func.func @_conv3d_stats_kernel(%arg0: i32, %arg1: i32, %arg2: memref<1x1x10x10x8xf32, #tpu.memory_space<vmem>>, %arg3: memref<1x1x10x10x8xf32, #tpu.memory_space<vmem>>, %arg4: memref<1x1x10x10x8xf32, #tpu.memory_space<vmem>>, %arg5: memref<3x3x24x8xbf16, #tpu.memory_space<vmem>>, %arg6: memref<1x1x8x8x8xf32, #tpu.memory_space<vmem>>, %arg7: memref<1x1x2x8xf32, #tpu.memory_space<vmem>>, %arg8: memref<64x8xf32, #tpu.memory_space<vmem>>) attributes {dimension_semantics = [#tpu.dimension_semantics<parallel>, #tpu.dimension_semantics<parallel>], iteration_bounds = array<i64: 2, 8>, scalar_prefetch = 0 : i64, scratch_operands = 1 : i64, tpu.core_type = #tpu.core_type<tc>, window_params = [{transform_indices = @transform_0, window_bounds = array<i64: 1, 1, 10, 10, 8>}, {transform_indices = @transform_1, window_bounds = array<i64: 1, 1, 10, 10, 8>}, {transform_indices = @transform_2, window_bounds = array<i64: 1, 1, 10, 10, 8>}, {pipeline_mode = #tpu.pipeline_mode<synchronous>, transform_indices = @transform_3, window_bounds = array<i64: 3, 3, 24, 8>}, {transform_indices = @transform_4, window_bounds = array<i64: 1, 1, 8, 8, 8>}, {transform_indices = @transform_5, window_bounds = array<i64: 1, 1, 2, 8>}]} {
    %c0 = arith.constant 0 : index
    %c0_0 = arith.constant 0 : index
    %c0_1 = arith.constant 0 : index
    %c0_2 = arith.constant 0 : index
    %c0_3 = arith.constant 0 : index
    %0 = vector.load %arg2[%c0, %c0_0, %c0_1, %c0_2, %c0_3] : memref<1x1x10x10x8xf32, #tpu.memory_space<vmem>>, vector<1x1x10x10x8xf32>
    %1 = vector.shape_cast %0 : vector<1x1x10x10x8xf32> to vector<10x10x8xf32>
    %c0_4 = arith.constant 0 : index
    %c0_5 = arith.constant 0 : index
    %c0_6 = arith.constant 0 : index
    %c0_7 = arith.constant 0 : index
    %c0_8 = arith.constant 0 : index
    %2 = vector.load %arg3[%c0_4, %c0_5, %c0_6, %c0_7, %c0_8] : memref<1x1x10x10x8xf32, #tpu.memory_space<vmem>>, vector<1x1x10x10x8xf32>
    %3 = vector.shape_cast %2 : vector<1x1x10x10x8xf32> to vector<10x10x8xf32>
    %c0_9 = arith.constant 0 : index
    %c0_10 = arith.constant 0 : index
    %c0_11 = arith.constant 0 : index
    %c0_12 = arith.constant 0 : index
    %c0_13 = arith.constant 0 : index
    %4 = vector.load %arg4[%c0_9, %c0_10, %c0_11, %c0_12, %c0_13] : memref<1x1x10x10x8xf32, #tpu.memory_space<vmem>>, vector<1x1x10x10x8xf32>
    %5 = vector.shape_cast %4 : vector<1x1x10x10x8xf32> to vector<10x10x8xf32>
    %6 = tpu.concatenate %1, %3, %5 in 2 : vector<10x10x8xf32>, vector<10x10x8xf32>, vector<10x10x8xf32> -> vector<10x10x24xf32>
    %7 = arith.truncf %6 : vector<10x10x24xf32> to vector<10x10x24xbf16>
    %cst = arith.constant 0.000000e+00 : f32
    %8 = vector.broadcast %cst : f32 to vector<64x8xf32>
    %c0_14 = arith.constant 0 : index
    %c0_15 = arith.constant 0 : index
    %9 = vector.load %arg8[%c0_14, %c0_15] : memref<64x8xf32, #tpu.memory_space<vmem>>, vector<64x8xf32>
    tpu.vector_store %arg8[%c0_14, %c0_15], %8 {strides = array<i32>} : memref<64x8xf32, #tpu.memory_space<vmem>>, vector<64x8xf32>,
    %10 = vector.extract_strided_slice %7 {offsets = [0, 0, 0], sizes = [8, 8, 24], strides = [1, 1, 1]} : vector<10x10x24xbf16> to vector<8x8x24xbf16>
    %11 = vector.shape_cast %10 : vector<8x8x24xbf16> to vector<64x24xbf16>
    %c0_16 = arith.constant 0 : index
    %c0_17 = arith.constant 0 : index
    %12 = vector.load %arg8[%c0_16, %c0_17] : memref<64x8xf32, #tpu.memory_space<vmem>>, vector<64x8xf32>
    %c0_18 = arith.constant 0 : index
    %c0_19 = arith.constant 0 : index
    %c0_20 = arith.constant 0 : index
    %c0_21 = arith.constant 0 : index
    %13 = vector.load %arg5[%c0_18, %c0_19, %c0_20, %c0_21] : memref<3x3x24x8xbf16, #tpu.memory_space<vmem>>, vector<1x1x24x8xbf16>
    %14 = vector.shape_cast %13 : vector<1x1x24x8xbf16> to vector<24x8xbf16>
    %cst_22 = arith.constant dense<0.000000e+00> : vector<64x8xf32>
    %15 = tpu.matmul %11, %14, %cst_22 {dimension_numbers = #tpu.dot_dimension_numbers<[1], [0], [0], [1], [0, 0, 1, 1], [], []>} : vector<64x24xbf16>, vector<24x8xbf16>, vector<64x8xf32> -> vector<64x8xf32>
    %16 = arith.addf %12, %15 : vector<64x8xf32>
    %c0_23 = arith.constant 0 : index
    %c0_24 = arith.constant 0 : index
    %17 = vector.load %arg8[%c0_23, %c0_24] : memref<64x8xf32, #tpu.memory_space<vmem>>, vector<64x8xf32>
    tpu.vector_store %arg8[%c0_23, %c0_24], %16 {strides = array<i32>} : memref<64x8xf32, #tpu.memory_space<vmem>>, vector<64x8xf32>,
    %18 = vector.extract_strided_slice %7 {offsets = [0, 1, 0], sizes = [8, 8, 24], strides = [1, 1, 1]} : vector<10x10x24xbf16> to vector<8x8x24xbf16>
    %19 = vector.shape_cast %18 : vector<8x8x24xbf16> to vector<64x24xbf16>
    %c0_25 = arith.constant 0 : index
    %c0_26 = arith.constant 0 : index
    %20 = vector.load %arg8[%c0_25, %c0_26] : memref<64x8xf32, #tpu.memory_space<vmem>>, vector<64x8xf32>
    %c0_27 = arith.constant 0 : index
    %c1 = arith.constant 1 : index
    %c0_28 = arith.constant 0 : index
    %c0_29 = arith.constant 0 : index
    %21 = vector.load %arg5[%c0_27, %c1, %c0_28, %c0_29] : memref<3x3x24x8xbf16, #tpu.memory_space<vmem>>, vector<1x1x24x8xbf16>
    %22 = vector.shape_cast %21 : vector<1x1x24x8xbf16> to vector<24x8xbf16>
    %cst_30 = arith.constant dense<0.000000e+00> : vector<64x8xf32>
    %23 = tpu.matmul %19, %22, %cst_30 {dimension_numbers = #tpu.dot_dimension_numbers<[1], [0], [0], [1], [0, 0, 1, 1], [], []>} : vector<64x24xbf16>, vector<24x8xbf16>, vector<64x8xf32> -> vector<64x8xf32>
    %24 = arith.addf %20, %23 : vector<64x8xf32>
    %c0_31 = arith.constant 0 : index
    %c0_32 = arith.constant 0 : index
    %25 = vector.load %arg8[%c0_31, %c0_32] : memref<64x8xf32, #tpu.memory_space<vmem>>, vector<64x8xf32>
    tpu.vector_store %arg8[%c0_31, %c0_32], %24 {strides = array<i32>} : memref<64x8xf32, #tpu.memory_space<vmem>>, vector<64x8xf32>,
    %26 = vector.extract_strided_slice %7 {offsets = [0, 2, 0], sizes = [8, 8, 24], strides = [1, 1, 1]} : vector<10x10x24xbf16> to vector<8x8x24xbf16>
    %27 = vector.shape_cast %26 : vector<8x8x24xbf16> to vector<64x24xbf16>
    %c0_33 = arith.constant 0 : index
    %c0_34 = arith.constant 0 : index
    %28 = vector.load %arg8[%c0_33, %c0_34] : memref<64x8xf32, #tpu.memory_space<vmem>>, vector<64x8xf32>
    %c0_35 = arith.constant 0 : index
    %c2 = arith.constant 2 : index
    %c0_36 = arith.constant 0 : index
    %c0_37 = arith.constant 0 : index
    %29 = vector.load %arg5[%c0_35, %c2, %c0_36, %c0_37] : memref<3x3x24x8xbf16, #tpu.memory_space<vmem>>, vector<1x1x24x8xbf16>
    %30 = vector.shape_cast %29 : vector<1x1x24x8xbf16> to vector<24x8xbf16>
    %cst_38 = arith.constant dense<0.000000e+00> : vector<64x8xf32>
    %31 = tpu.matmul %27, %30, %cst_38 {dimension_numbers = #tpu.dot_dimension_numbers<[1], [0], [0], [1], [0, 0, 1, 1], [], []>} : vector<64x24xbf16>, vector<24x8xbf16>, vector<64x8xf32> -> vector<64x8xf32>
    %32 = arith.addf %28, %31 : vector<64x8xf32>
    %c0_39 = arith.constant 0 : index
    %c0_40 = arith.constant 0 : index
    %33 = vector.load %arg8[%c0_39, %c0_40] : memref<64x8xf32, #tpu.memory_space<vmem>>, vector<64x8xf32>
    tpu.vector_store %arg8[%c0_39, %c0_40], %32 {strides = array<i32>} : memref<64x8xf32, #tpu.memory_space<vmem>>, vector<64x8xf32>,
    %34 = vector.extract_strided_slice %7 {offsets = [1, 0, 0], sizes = [8, 8, 24], strides = [1, 1, 1]} : vector<10x10x24xbf16> to vector<8x8x24xbf16>
    %35 = vector.shape_cast %34 : vector<8x8x24xbf16> to vector<64x24xbf16>
    %c0_41 = arith.constant 0 : index
    %c0_42 = arith.constant 0 : index
    %36 = vector.load %arg8[%c0_41, %c0_42] : memref<64x8xf32, #tpu.memory_space<vmem>>, vector<64x8xf32>
    %c1_43 = arith.constant 1 : index
    %c0_44 = arith.constant 0 : index
    %c0_45 = arith.constant 0 : index
    %c0_46 = arith.constant 0 : index
    %37 = vector.load %arg5[%c1_43, %c0_44, %c0_45, %c0_46] : memref<3x3x24x8xbf16, #tpu.memory_space<vmem>>, vector<1x1x24x8xbf16>
    %38 = vector.shape_cast %37 : vector<1x1x24x8xbf16> to vector<24x8xbf16>
    %cst_47 = arith.constant dense<0.000000e+00> : vector<64x8xf32>
    %39 = tpu.matmul %35, %38, %cst_47 {dimension_numbers = #tpu.dot_dimension_numbers<[1], [0], [0], [1], [0, 0, 1, 1], [], []>} : vector<64x24xbf16>, vector<24x8xbf16>, vector<64x8xf32> -> vector<64x8xf32>
    %40 = arith.addf %36, %39 : vector<64x8xf32>
    %c0_48 = arith.constant 0 : index
    %c0_49 = arith.constant 0 : index
    %41 = vector.load %arg8[%c0_48, %c0_49] : memref<64x8xf32, #tpu.memory_space<vmem>>, vector<64x8xf32>
    tpu.vector_store %arg8[%c0_48, %c0_49], %40 {strides = array<i32>} : memref<64x8xf32, #tpu.memory_space<vmem>>, vector<64x8xf32>,
    %42 = vector.extract_strided_slice %7 {offsets = [1, 1, 0], sizes = [8, 8, 24], strides = [1, 1, 1]} : vector<10x10x24xbf16> to vector<8x8x24xbf16>
    %43 = vector.shape_cast %42 : vector<8x8x24xbf16> to vector<64x24xbf16>
    %c0_50 = arith.constant 0 : index
    %c0_51 = arith.constant 0 : index
    %44 = vector.load %arg8[%c0_50, %c0_51] : memref<64x8xf32, #tpu.memory_space<vmem>>, vector<64x8xf32>
    %c1_52 = arith.constant 1 : index
    %c1_53 = arith.constant 1 : index
    %c0_54 = arith.constant 0 : index
    %c0_55 = arith.constant 0 : index
    %45 = vector.load %arg5[%c1_52, %c1_53, %c0_54, %c0_55] : memref<3x3x24x8xbf16, #tpu.memory_space<vmem>>, vector<1x1x24x8xbf16>
    %46 = vector.shape_cast %45 : vector<1x1x24x8xbf16> to vector<24x8xbf16>
    %cst_56 = arith.constant dense<0.000000e+00> : vector<64x8xf32>
    %47 = tpu.matmul %43, %46, %cst_56 {dimension_numbers = #tpu.dot_dimension_numbers<[1], [0], [0], [1], [0, 0, 1, 1], [], []>} : vector<64x24xbf16>, vector<24x8xbf16>, vector<64x8xf32> -> vector<64x8xf32>
    %48 = arith.addf %44, %47 : vector<64x8xf32>
    %c0_57 = arith.constant 0 : index
    %c0_58 = arith.constant 0 : index
    %49 = vector.load %arg8[%c0_57, %c0_58] : memref<64x8xf32, #tpu.memory_space<vmem>>, vector<64x8xf32>
    tpu.vector_store %arg8[%c0_57, %c0_58], %48 {strides = array<i32>} : memref<64x8xf32, #tpu.memory_space<vmem>>, vector<64x8xf32>,
    %50 = vector.extract_strided_slice %7 {offsets = [1, 2, 0], sizes = [8, 8, 24], strides = [1, 1, 1]} : vector<10x10x24xbf16> to vector<8x8x24xbf16>
    %51 = vector.shape_cast %50 : vector<8x8x24xbf16> to vector<64x24xbf16>
    %c0_59 = arith.constant 0 : index
    %c0_60 = arith.constant 0 : index
    %52 = vector.load %arg8[%c0_59, %c0_60] : memref<64x8xf32, #tpu.memory_space<vmem>>, vector<64x8xf32>
    %c1_61 = arith.constant 1 : index
    %c2_62 = arith.constant 2 : index
    %c0_63 = arith.constant 0 : index
    %c0_64 = arith.constant 0 : index
    %53 = vector.load %arg5[%c1_61, %c2_62, %c0_63, %c0_64] : memref<3x3x24x8xbf16, #tpu.memory_space<vmem>>, vector<1x1x24x8xbf16>
    %54 = vector.shape_cast %53 : vector<1x1x24x8xbf16> to vector<24x8xbf16>
    %cst_65 = arith.constant dense<0.000000e+00> : vector<64x8xf32>
    %55 = tpu.matmul %51, %54, %cst_65 {dimension_numbers = #tpu.dot_dimension_numbers<[1], [0], [0], [1], [0, 0, 1, 1], [], []>} : vector<64x24xbf16>, vector<24x8xbf16>, vector<64x8xf32> -> vector<64x8xf32>
    %56 = arith.addf %52, %55 : vector<64x8xf32>
    %c0_66 = arith.constant 0 : index
    %c0_67 = arith.constant 0 : index
    %57 = vector.load %arg8[%c0_66, %c0_67] : memref<64x8xf32, #tpu.memory_space<vmem>>, vector<64x8xf32>
    tpu.vector_store %arg8[%c0_66, %c0_67], %56 {strides = array<i32>} : memref<64x8xf32, #tpu.memory_space<vmem>>, vector<64x8xf32>,
    %58 = vector.extract_strided_slice %7 {offsets = [2, 0, 0], sizes = [8, 8, 24], strides = [1, 1, 1]} : vector<10x10x24xbf16> to vector<8x8x24xbf16>
    %59 = vector.shape_cast %58 : vector<8x8x24xbf16> to vector<64x24xbf16>
    %c0_68 = arith.constant 0 : index
    %c0_69 = arith.constant 0 : index
    %60 = vector.load %arg8[%c0_68, %c0_69] : memref<64x8xf32, #tpu.memory_space<vmem>>, vector<64x8xf32>
    %c2_70 = arith.constant 2 : index
    %c0_71 = arith.constant 0 : index
    %c0_72 = arith.constant 0 : index
    %c0_73 = arith.constant 0 : index
    %61 = vector.load %arg5[%c2_70, %c0_71, %c0_72, %c0_73] : memref<3x3x24x8xbf16, #tpu.memory_space<vmem>>, vector<1x1x24x8xbf16>
    %62 = vector.shape_cast %61 : vector<1x1x24x8xbf16> to vector<24x8xbf16>
    %cst_74 = arith.constant dense<0.000000e+00> : vector<64x8xf32>
    %63 = tpu.matmul %59, %62, %cst_74 {dimension_numbers = #tpu.dot_dimension_numbers<[1], [0], [0], [1], [0, 0, 1, 1], [], []>} : vector<64x24xbf16>, vector<24x8xbf16>, vector<64x8xf32> -> vector<64x8xf32>
    %64 = arith.addf %60, %63 : vector<64x8xf32>
    %c0_75 = arith.constant 0 : index
    %c0_76 = arith.constant 0 : index
    %65 = vector.load %arg8[%c0_75, %c0_76] : memref<64x8xf32, #tpu.memory_space<vmem>>, vector<64x8xf32>
    tpu.vector_store %arg8[%c0_75, %c0_76], %64 {strides = array<i32>} : memref<64x8xf32, #tpu.memory_space<vmem>>, vector<64x8xf32>,
    %66 = vector.extract_strided_slice %7 {offsets = [2, 1, 0], sizes = [8, 8, 24], strides = [1, 1, 1]} : vector<10x10x24xbf16> to vector<8x8x24xbf16>
    %67 = vector.shape_cast %66 : vector<8x8x24xbf16> to vector<64x24xbf16>
    %c0_77 = arith.constant 0 : index
    %c0_78 = arith.constant 0 : index
    %68 = vector.load %arg8[%c0_77, %c0_78] : memref<64x8xf32, #tpu.memory_space<vmem>>, vector<64x8xf32>
    %c2_79 = arith.constant 2 : index
    %c1_80 = arith.constant 1 : index
    %c0_81 = arith.constant 0 : index
    %c0_82 = arith.constant 0 : index
    %69 = vector.load %arg5[%c2_79, %c1_80, %c0_81, %c0_82] : memref<3x3x24x8xbf16, #tpu.memory_space<vmem>>, vector<1x1x24x8xbf16>
    %70 = vector.shape_cast %69 : vector<1x1x24x8xbf16> to vector<24x8xbf16>
    %cst_83 = arith.constant dense<0.000000e+00> : vector<64x8xf32>
    %71 = tpu.matmul %67, %70, %cst_83 {dimension_numbers = #tpu.dot_dimension_numbers<[1], [0], [0], [1], [0, 0, 1, 1], [], []>} : vector<64x24xbf16>, vector<24x8xbf16>, vector<64x8xf32> -> vector<64x8xf32>
    %72 = arith.addf %68, %71 : vector<64x8xf32>
    %c0_84 = arith.constant 0 : index
    %c0_85 = arith.constant 0 : index
    %73 = vector.load %arg8[%c0_84, %c0_85] : memref<64x8xf32, #tpu.memory_space<vmem>>, vector<64x8xf32>
    tpu.vector_store %arg8[%c0_84, %c0_85], %72 {strides = array<i32>} : memref<64x8xf32, #tpu.memory_space<vmem>>, vector<64x8xf32>,
    %74 = vector.extract_strided_slice %7 {offsets = [2, 2, 0], sizes = [8, 8, 24], strides = [1, 1, 1]} : vector<10x10x24xbf16> to vector<8x8x24xbf16>
    %75 = vector.shape_cast %74 : vector<8x8x24xbf16> to vector<64x24xbf16>
    %c0_86 = arith.constant 0 : index
    %c0_87 = arith.constant 0 : index
    %76 = vector.load %arg8[%c0_86, %c0_87] : memref<64x8xf32, #tpu.memory_space<vmem>>, vector<64x8xf32>
    %c2_88 = arith.constant 2 : index
    %c2_89 = arith.constant 2 : index
    %c0_90 = arith.constant 0 : index
    %c0_91 = arith.constant 0 : index
    %77 = vector.load %arg5[%c2_88, %c2_89, %c0_90, %c0_91] : memref<3x3x24x8xbf16, #tpu.memory_space<vmem>>, vector<1x1x24x8xbf16>
    %78 = vector.shape_cast %77 : vector<1x1x24x8xbf16> to vector<24x8xbf16>
    %cst_92 = arith.constant dense<0.000000e+00> : vector<64x8xf32>
    %79 = tpu.matmul %75, %78, %cst_92 {dimension_numbers = #tpu.dot_dimension_numbers<[1], [0], [0], [1], [0, 0, 1, 1], [], []>} : vector<64x24xbf16>, vector<24x8xbf16>, vector<64x8xf32> -> vector<64x8xf32>
    %80 = arith.addf %76, %79 : vector<64x8xf32>
    %c0_93 = arith.constant 0 : index
    %c0_94 = arith.constant 0 : index
    %81 = vector.load %arg8[%c0_93, %c0_94] : memref<64x8xf32, #tpu.memory_space<vmem>>, vector<64x8xf32>
    tpu.vector_store %arg8[%c0_93, %c0_94], %80 {strides = array<i32>} : memref<64x8xf32, #tpu.memory_space<vmem>>, vector<64x8xf32>,
    %c0_95 = arith.constant 0 : index
    %c0_96 = arith.constant 0 : index
    %82 = vector.load %arg8[%c0_95, %c0_96] : memref<64x8xf32, #tpu.memory_space<vmem>>, vector<64x8xf32>
    %83 = vector.shape_cast %82 : vector<64x8xf32> to vector<8x8x8xf32>
    %c0_97 = arith.constant 0 : index
    %c0_98 = arith.constant 0 : index
    %c0_99 = arith.constant 0 : index
    %c0_100 = arith.constant 0 : index
    %c0_101 = arith.constant 0 : index
    %84 = vector.load %arg6[%c0_97, %c0_98, %c0_99, %c0_100, %c0_101] : memref<1x1x8x8x8xf32, #tpu.memory_space<vmem>>, vector<1x1x8x8x8xf32>
    %85 = vector.shape_cast %84 : vector<1x1x8x8x8xf32> to vector<8x8x8xf32>
    %86 = vector.shape_cast %83 : vector<8x8x8xf32> to vector<1x1x8x8x8xf32>
    tpu.vector_store %arg6[%c0_97, %c0_98, %c0_99, %c0_100, %c0_101], %86 {strides = array<i32>} : memref<1x1x8x8x8xf32, #tpu.memory_space<vmem>>, vector<1x1x8x8x8xf32>,
    %cst_102 = arith.constant dense<0.000000e+00> : vector<8xf32>
    %87 = vector.multi_reduction <add>, %82, %cst_102 [0] : vector<64x8xf32> to vector<8xf32>
    %88 = vector.shape_cast %87 : vector<8xf32> to vector<1x8xf32>
    %c0_103 = arith.constant 0 : index
    %c0_104 = arith.constant 0 : index
    %c0_105 = arith.constant 0 : index
    %c0_106 = arith.constant 0 : index
    %89 = vector.load %arg7[%c0_103, %c0_104, %c0_105, %c0_106] : memref<1x1x2x8xf32, #tpu.memory_space<vmem>>, vector<1x1x1x8xf32>
    %90 = vector.shape_cast %89 : vector<1x1x1x8xf32> to vector<1x8xf32>
    %91 = vector.shape_cast %88 : vector<1x8xf32> to vector<1x1x1x8xf32>
    tpu.vector_store %arg7[%c0_103, %c0_104, %c0_105, %c0_106], %91 {strides = array<i32>} : memref<1x1x2x8xf32, #tpu.memory_space<vmem>>, vector<1x1x1x8xf32>,
    %92 = arith.mulf %82, %82 : vector<64x8xf32>
    %cst_107 = arith.constant dense<0.000000e+00> : vector<8xf32>
    %93 = vector.multi_reduction <add>, %92, %cst_107 [0] : vector<64x8xf32> to vector<8xf32>
    %94 = vector.shape_cast %93 : vector<8xf32> to vector<1x8xf32>
    %c0_108 = arith.constant 0 : index
    %c0_109 = arith.constant 0 : index
    %c1_110 = arith.constant 1 : index
    %c0_111 = arith.constant 0 : index
    %95 = vector.load %arg7[%c0_108, %c0_109, %c1_110, %c0_111] : memref<1x1x2x8xf32, #tpu.memory_space<vmem>>, vector<1x1x1x8xf32>
    %96 = vector.shape_cast %95 : vector<1x1x1x8xf32> to vector<1x8xf32>
    %97 = vector.shape_cast %94 : vector<1x8xf32> to vector<1x1x1x8xf32>
    tpu.vector_store %arg7[%c0_108, %c0_109, %c1_110, %c0_111], %97 {strides = array<i32>} : memref<1x1x2x8xf32, #tpu.memory_space<vmem>>, vector<1x1x1x8xf32>,
    return
  }
  func.func @transform_0(%arg0: i32, %arg1: i32) -> (i32, i32, i32, i32, i32) {
    %c0_i32 = arith.constant 0 : i32
    %0 = arith.addi %arg1, %c0_i32 : i32
    %c0_i32_0 = arith.constant 0 : i32
    %c0_i32_1 = arith.constant 0 : i32
    %c0_i32_2 = arith.constant 0 : i32
    %c0_i32_3 = arith.constant 0 : i32
    return %arg0, %0, %c0_i32_0, %c0_i32_1, %c0_i32_2 : i32, i32, i32, i32, i32
  }
  func.func @transform_1(%arg0: i32, %arg1: i32) -> (i32, i32, i32, i32, i32) {
    %c1_i32 = arith.constant 1 : i32
    %0 = arith.addi %arg1, %c1_i32 : i32
    %c0_i32 = arith.constant 0 : i32
    %c0_i32_0 = arith.constant 0 : i32
    %c0_i32_1 = arith.constant 0 : i32
    %c0_i32_2 = arith.constant 0 : i32
    return %arg0, %0, %c0_i32, %c0_i32_0, %c0_i32_1 : i32, i32, i32, i32, i32
  }
  func.func @transform_2(%arg0: i32, %arg1: i32) -> (i32, i32, i32, i32, i32) {
    %c2_i32 = arith.constant 2 : i32
    %0 = arith.addi %arg1, %c2_i32 : i32
    %c0_i32 = arith.constant 0 : i32
    %c0_i32_0 = arith.constant 0 : i32
    %c0_i32_1 = arith.constant 0 : i32
    %c0_i32_2 = arith.constant 0 : i32
    return %arg0, %0, %c0_i32, %c0_i32_0, %c0_i32_1 : i32, i32, i32, i32, i32
  }
  func.func @transform_3(%arg0: i32, %arg1: i32) -> (i32, i32, i32, i32) {
    %c0_i32 = arith.constant 0 : i32
    %c0_i32_0 = arith.constant 0 : i32
    %c0_i32_1 = arith.constant 0 : i32
    %c0_i32_2 = arith.constant 0 : i32
    %c0_i32_3 = arith.constant 0 : i32
    return %c0_i32, %c0_i32_0, %c0_i32_1, %c0_i32_2 : i32, i32, i32, i32
  }
  func.func @transform_4(%arg0: i32, %arg1: i32) -> (i32, i32, i32, i32, i32) {
    %c0_i32 = arith.constant 0 : i32
    %c0_i32_0 = arith.constant 0 : i32
    %c0_i32_1 = arith.constant 0 : i32
    %c0_i32_2 = arith.constant 0 : i32
    return %arg0, %arg1, %c0_i32, %c0_i32_0, %c0_i32_1 : i32, i32, i32, i32, i32
  }
  func.func @transform_5(%arg0: i32, %arg1: i32) -> (i32, i32, i32, i32) {
    %c0_i32 = arith.constant 0 : i32
    %c0_i32_0 = arith.constant 0 : i32
    %c0_i32_1 = arith.constant 0 : i32
    return %arg0, %arg1, %c0_i32, %c0_i32_0 : i32, i32, i32, i32
  }
}

</mosaic_0001>

<bundles_post_ra>
// kernel: conv_block_forward.5
= control target key start
LH: loop header
LB: loop body
LE: loop exit
PB: predicated region body
PF: predicated region fallthrough
CT: control target
= control target key end

     0   :  { %s563_s12 = smov 0   ;;  %s565_s13 = smov 0   ;;  %s690_s0 = inlined_call_operand.vmem [shape: f32[2,8,8,8,8], index: 0, kind: input, shape index: {}]   ;;  %s691_s1 = inlined_call_operand.vmem [shape: f32[1,8], index: 1, kind: input, shape index: {}]   ;;  %s692_s2 = inlined_call_operand.vmem [shape: f32[1,8], index: 2, kind: input, shape index: {}]   ;;  %s693_s3 = inlined_call_operand.vmem [shape: f32[2,10,10,10,8], index: 3, kind: output, shape index: {}]  }
   0x1   :  { %s567_s14 = smov 0   ;;  %s569_s15 = smov 0  }
   0x2   :  { %s571_s16 = smov 0  }
   0x3 LB: > { %s22_s17 = sadd.s32 1, %s532_s14  ;;  %s25_s18 = sadd.s32 1, %s536_s15  ;;  %s540_s16 = sphi %s571_s16, %s13_s16   ;;  %s536_s15 = sphi %s569_s15, %s698_s15   ;;  %s532_s14 = sphi %s567_s14, %s697_s14   ;;  %s528_s13 = sphi %s565_s13, %s696_s13   ;;  %s524_s12 = sphi %s563_s12, %s695_s12  }
   0x4   : > { %p23_p0 = scmp.ge.s32.totalorder %s22_s17, 10  ;;  %p430_p1 = scmp.ge.s32.totalorder %s540_s16, 1 }
   0x5   : > { %p177_p2 = scmp.lt.s32.totalorder %s540_s16, 21 }
   0x6   : > { %s700_s17 = smov (%p23_p0, %s22_s17), 0  ;;  %s702_s18 = smov (!%p23_p0, %s25_s18), %s536_s15 }
   0x7   : > { %p178_p3 = pnand %p430_p1, %p177_p2  ;;  %p27_p4 = scmp.ge.s32.totalorder %s702_s18, 2 }
   0x8   : > { %s431_s19 = sadd.s32 (!%p178_p3), 4294967295, %s524_s12  ;;  %p219_p5 = scmp.lt.s32.totalorder (!%p178_p3), %s528_s13, 1 }
   0x9   : > { %s704_s18 = smov (%p27_p4, %s702_s18), 0  ;;  %181 = sbr.rel (%p178_p3) target bundleno = 59 (0x3b), region = 32 }
   0xa   : > { %p215_p6 = scmp.gt.s32.totalorder (!%p178_p3), %s431_s19, 0  ;;  %p432_p7 = scmp.lt.s32.totalorder (!%p178_p3), %s431_s19, 7 }
   0xb   : > { %p235_p8 = scmp.lt.s32.totalorder (!%p178_p3), %s524_s12, 9  ;;  %p264_p10 = scmp.gt.s32.totalorder (!%p178_p3), %s524_s12, 0 }
   0xd   : > { %p599_p11 = pnand (!%p178_p3), %p264_p10, %p235_p8 }
   0xe   : > { %s706_s13 = smov (!%p219_p5, %s528_s13), 1  ;;  %s708_s19 = smov (!%p215_p6, %s431_s19), 0  ;;  %vm242_vm0 = vcmask 64512   ;;  %v542_v0 = vmov 0.0   ;;  %vm244_vm1 = vcmask 58368  }
   0xf   : > { %s438_s20 = sshll.u32 %s706_s13, 6  ;;  %s710_s19 = smov (!%p432_p7, %s708_s19), 7 }
  0x10   : > { %s236_s21 = scalar_select %p235_p8, %s524_s12, 9 }
  0x11   : > { %p221_p9 = scmp.lt.s32.totalorder %s710_s19, 7  ;;  %s458_s22 = smul.u32 200, %s706_s13 }
  0x12   : > { %s457_s23 = smul.u32 20, %s236_s21 }
  0x13   : > { %s712_s19 = smov (!%p221_p9, %s710_s19), 7 }
  0x14   : > { %s239_s24 = sadd.s32 %s458_s22, %s457_s23  ;;  %s437_s26 = sshll.u32 %s712_s19, 3 }
  0x15   : > { %s440_s27 = sshll.u32 %s239_s24, 3  ;;  %s225_s28 = sadd.s32 %s438_s20, %s437_s26 }
  0x16   : > { %s606_s4 = scalar_lea.vmem %s693_s3, %s440_s27  ;;  %s439_s5 = sshll.u32 %s225_s28, 3 }
  0x17   : > { %243 = vst.msk [vmem:[%s606_s4] sm:$0xff] %vm242_vm0, %v542_v0  ;;  %s613_s8 = scalar_lea.vmem %s690_s0, %s439_s5 }
  0x18   : > { %246 = vst.msk [vmem:[%s606_s4 + $0x10] sm:$0xff] %vm242_vm0, %v542_v0 }
  0x19   : > { %248 = vst.msk [vmem:[%s606_s4 + $0x20] sm:$0xff] %vm242_vm0, %v542_v0 }
  0x1a   : > { %250 = vst.msk [vmem:[%s606_s4 + $0x30] sm:$0xff] %vm242_vm0, %v542_v0 }
  0x1b   : > { %252 = vst.msk [vmem:[%s606_s4 + $0x40] sm:$0xff] %vm242_vm0, %v542_v0 }
  0x1c   : > { %254 = vst.msk [vmem:[%s606_s4 + $0x50] sm:$0xff] %vm242_vm0, %v542_v0 }
  0x1d   : > { %256 = vst.msk [vmem:[%s606_s4 + $0x60] sm:$0xff] %vm242_vm0, %v542_v0 }
  0x1e   : > { %258 = vst.msk [vmem:[%s606_s4 + $0x70] sm:$0xff] %vm242_vm0, %v542_v0 }
  0x1f   : > { %260 = vst.msk [vmem:[%s606_s4 + $0x80] sm:$0xff] %vm242_vm0, %v542_v0 }
  0x20   : > { %262 = vst.msk [vmem:[%s606_s4 + $0x90] sm:$0xff] %vm242_vm0, %v542_v0 }
  0x21   : > { %245 = vst.msk [vmem:[%s606_s4 + $0x8] sm:$0x3] %vm244_vm1, %v542_v0 }
  0x22   : > { %247 = vst.msk [vmem:[%s606_s4 + $0x18] sm:$0x3] %vm244_vm1, %v542_v0 }
  0x23   : > { %249 = vst.msk [vmem:[%s606_s4 + $0x28] sm:$0x3] %vm244_vm1, %v542_v0 }
  0x24   : > { %251 = vst.msk [vmem:[%s606_s4 + $0x38] sm:$0x3] %vm244_vm1, %v542_v0 }
  0x25   : > { %253 = vst.msk [vmem:[%s606_s4 + $0x48] sm:$0x3] %vm244_vm1, %v542_v0 }
  0x26   : > { %255 = vst.msk [vmem:[%s606_s4 + $0x58] sm:$0x3] %vm244_vm1, %v542_v0  ;;  %269 = sbr.rel (%p599_p11) target bundleno = 59 (0x3b), region = 36 }
  0x27   : > { %257 = vst.msk [vmem:[%s606_s4 + $0x68] sm:$0x3] %vm244_vm1, %v542_v0 }
  0x28   : > { %259 = vst.msk [vmem:[%s606_s4 + $0x78] sm:$0x3] %vm244_vm1, %v542_v0 }
  0x29   : > { %261 = vst.msk [vmem:[%s606_s4 + $0x88] sm:$0x3] %vm244_vm1, %v542_v0 }
  0x2a   : > { %263 = vst.msk [vmem:[%s606_s4 + $0x98] sm:$0x3] %vm244_vm1, %v542_v0 }
  0x2b   : > { %v270_v1 = vld [vmem:[%s613_s8] sm:$0xff]  ;;  %v271_v4 = vld [vmem:[%s613_s8 + $0x8] sm:$0xff]  ;;  %v272_v7 = vld [vmem:[%s613_s8 + $0x10] sm:$0xff] }
  0x2c   : > { %v500_v2 = vld [vmem:[%s691_s1] ss:$0 sm:$0xff]  ;;  %v273_v8 = vld [vmem:[%s613_s8 + $0x18] sm:$0xff]  ;;  %v275_v13 = vld [vmem:[%s613_s8 + $0x28] sm:$0xff] }
  0x2d   : > { %v501_v3 = vld [vmem:[%s692_s2] ss:$0 sm:$0xff]  ;;  %v282_v5 = vmul.f32 %v500_v2, %v270_v1  ;;  %v283_v6 = vmul.f32 %v500_v2, %v271_v4  ;;  %v284_v10 = vmul.f32 %v500_v2, %v272_v7  ;;  %v285_v11 = vmul.f32 %v500_v2, %v273_v8  ;;  %v276_v14 = vld [vmem:[%s613_s8 + $0x30] sm:$0xff]  ;;  %v277_v15 = vld [vmem:[%s613_s8 + $0x38] sm:$0xff] }
  0x2e   : > { %v274_v9 = vld [vmem:[%s613_s8 + $0x20] sm:$0xff]  ;;  %v287_v18 = vmul.f32 %v500_v2, %v275_v13  ;;  %v288_v19 = vmul.f32 %v500_v2, %v276_v14  ;;  %v289_v23 = vmul.f32 %v500_v2, %v277_v15 }
  0x2f   : > { %v286_v12 = vmul.f32 %v500_v2, %v274_v9  ;;  %v294_v16 = vadd.f32 %v501_v3, %v282_v5  ;;  %v295_v17 = vadd.f32 %v501_v3, %v283_v6  ;;  %v296_v20 = vadd.f32 %v501_v3, %v284_v10 }
  0x30   : > { %v297_v21 = vadd.f32 %v501_v3, %v285_v11  ;;  %v299_v26 = vadd.f32 %v501_v3, %v287_v18  ;;  %v300_v27 = vadd.f32 %v501_v3, %v288_v19  ;;  %v301_v30 = vadd.f32 %v501_v3, %v289_v23 }
  0x31   : > { %v298_v22 = vadd.f32 %v501_v3, %v286_v12  ;;  %v302_v24 = vmax.f32 %v294_v16, 0.0  ;;  %v303_v25 = vmax.f32 %v295_v17, 0.0  ;;  %v304_v28 = vmax.f32 %v296_v20, 0.0 }
  0x32   : > { %v305_v29 = vmax.f32 %v297_v21, 0.0  ;;  %v307_v32 = vmax.f32 %v299_v26, 0.0  ;;  %v308_v33 = vmax.f32 %v300_v27, 0.0  ;;  %v309_v34 = vmax.f32 %v301_v30, 0.0 }
  0x33   : > { %441 = vst.msk [vmem:[%s606_s4 + $0x11] sm:$0xff] %vm242_vm0, %v302_v24  ;;  %v306_v31 = vmax.f32 %v298_v22, 0.0 }
  0x34   : > { %442 = vst.msk [vmem:[%s606_s4 + $0x21] sm:$0xff] %vm242_vm0, %v303_v25 }
  0x35   : > { %443 = vst.msk [vmem:[%s606_s4 + $0x31] sm:$0xff] %vm242_vm0, %v304_v28 }
  0x36   : > { %444 = vst.msk [vmem:[%s606_s4 + $0x41] sm:$0xff] %vm242_vm0, %v305_v29 }
  0x37   : > { %445 = vst.msk [vmem:[%s606_s4 + $0x51] sm:$0xff] %vm242_vm0, %v306_v31 }
  0x38   : > { %446 = vst.msk [vmem:[%s606_s4 + $0x61] sm:$0xff] %vm242_vm0, %v307_v32 }
  0x39   : > { %447 = vst.msk [vmem:[%s606_s4 + $0x71] sm:$0xff] %vm242_vm0, %v308_v33 }
  0x3a   : > { %448 = vst.msk [vmem:[%s606_s4 + $0x81] sm:$0xff] %vm242_vm0, %v309_v34 }
  0x3b PF: > { %s13_s16 = sadd.s32 1, %s540_s16   ;;  %s695_s12 = smov %s532_s14 }
  0x3c   : > { %p10_p12 = scmp.ge.s32.totalorder %s13_s16, 22   ;;  %s696_s13 = smov %s536_s15 }
  0x3d   : > { %s697_s14 = smov %s700_s17  ;;  %s698_s15 = smov %s704_s18 }
  0x3e   :  { %12 = sbr.rel (!%p10_p12) target bundleno = 3 (0x3), region = 67 }

// kernel: conv_block_forward.7
= control target key start
LH: loop header
LB: loop body
LE: loop exit
PB: predicated region body
PF: predicated region fallthrough
CT: control target
= control target key end

     0   :  { %s466_s12 = smov 0   ;;  %s468_s13 = smov 0   ;;  %s531_s0 = inlined_call_operand.vmem [shape: f32[2,8,8,8,8], index: 0, kind: input, shape index: {}]   ;;  %s532_s1 = inlined_call_operand.vmem [shape: f32[1,8], index: 1, kind: input, shape index: {}]   ;;  %s533_s2 = inlined_call_operand.vmem [shape: f32[1,8], index: 2, kind: input, shape index: {}]   ;;  %s534_s3 = inlined_call_operand.vmem [shape: f32[2,8,8,8,8], index: 3, kind: output, shape index: {}]  }
   0x1   :  { %s470_s14 = smov 0   ;;  %s472_s15 = smov 0  }
   0x2   :  { %s474_s16 = smov 0  }
   0x3 LB: > { %s22_s17 = sadd.s32 1, %s436_s14  ;;  %s25_s18 = sadd.s32 1, %s440_s15  ;;  %s444_s16 = sphi %s474_s16, %s13_s16   ;;  %s440_s15 = sphi %s472_s15, %s538_s15   ;;  %s436_s14 = sphi %s470_s14, %s537_s14   ;;  %s432_s13 = sphi %s468_s13, %s536_s13   ;;  %s428_s12 = sphi %s466_s12, %s535_s12  }
   0x4   : > { %p23_p0 = scmp.ge.s32.totalorder %s22_s17, 8  ;;  %p355_p1 = scmp.ge.s32.totalorder %s444_s16, 1 }
   0x5   : > { %p157_p2 = scmp.lt.s32.totalorder %s444_s16, 17 }
   0x6   : > { %s540_s17 = smov (%p23_p0, %s22_s17), 0  ;;  %s542_s18 = smov (!%p23_p0, %s25_s18), %s440_s15 }
   0x7   : > { %p158_p3 = pnand %p355_p1, %p157_p2  ;;  %p27_p4 = scmp.ge.s32.totalorder %s542_s18, 2 }
   0x8   : > { %p189_p5 = scmp.lt.s32.totalorder (!%p158_p3), %s432_s13, 1  ;;  %p191_p6 = scmp.lt.s32.totalorder (!%p158_p3), %s428_s12, 7 }
   0x9   : > { %s544_s18 = smov (%p27_p4, %s542_s18), 0  ;;  %161 = sbr.rel (%p158_p3) target bundleno = 34 (0x22), region = 32 }
   0xe   : > { %s546_s13 = smov (!%p189_p5, %s432_s13), 1  ;;  %s548_s12 = smov (!%p191_p6, %s428_s12), 7  ;;  %v404_v0 = vld [vmem:[%s532_s1] ss:$0 sm:$0xff]  ;;  %vm247_vm0 = vcmask 64512  }
   0xf   : > { %s357_s19 = sshll.u32 %s546_s13, 6  ;;  %s356_s20 = sshll.u32 %s548_s12, 3  ;;  %v405_v1 = vld [vmem:[%s533_s2] ss:$0 sm:$0xff] }
  0x10   : > { %s195_s21 = sadd.s32 %s357_s19, %s356_s20 }
  0x11   : > { %s358_s24 = sshll.u32 %s195_s21, 3 }
  0x12   : > { %s197_s27 = scalar_lea.vmem %s531_s0, %s358_s24  ;;  %s206_s5 = scalar_lea.vmem %s534_s3, %s358_s24 }
  0x13   : > { %v207_v2 = vld [vmem:[%s197_s27] sm:$0xff]  ;;  %v208_v3 = vld [vmem:[%s197_s27 + $0x8] sm:$0xff]  ;;  %v209_v4 = vld [vmem:[%s197_s27 + $0x10] sm:$0xff] }
  0x14   : > { %v219_v5 = vmul.f32 %v404_v0, %v207_v2  ;;  %v220_v6 = vmul.f32 %v404_v0, %v208_v3  ;;  %v221_v7 = vmul.f32 %v404_v0, %v209_v4  ;;  %v210_v8 = vld [vmem:[%s197_s27 + $0x18] sm:$0xff]  ;;  %v211_v9 = vld [vmem:[%s197_s27 + $0x20] sm:$0xff]  ;;  %v212_v10 = vld [vmem:[%s197_s27 + $0x28] sm:$0xff] }
  0x15   : > { %v222_v11 = vmul.f32 %v404_v0, %v210_v8  ;;  %v223_v12 = vmul.f32 %v404_v0, %v211_v9  ;;  %v224_v13 = vmul.f32 %v404_v0, %v212_v10  ;;  %v213_v14 = vld [vmem:[%s197_s27 + $0x30] sm:$0xff]  ;;  %v214_v15 = vld [vmem:[%s197_s27 + $0x38] sm:$0xff] }
  0x16   : > { %v231_v16 = vadd.f32 %v405_v1, %v219_v5  ;;  %v232_v17 = vadd.f32 %v405_v1, %v220_v6  ;;  %v233_v18 = vadd.f32 %v405_v1, %v221_v7  ;;  %v225_v19 = vmul.f32 %v404_v0, %v213_v14 }
  0x17   : > { %v234_v20 = vadd.f32 %v405_v1, %v222_v11  ;;  %v235_v21 = vadd.f32 %v405_v1, %v223_v12  ;;  %v236_v22 = vadd.f32 %v405_v1, %v224_v13  ;;  %v226_v23 = vmul.f32 %v404_v0, %v214_v15 }
  0x18   : > { %v239_v24 = vmax.f32 %v231_v16, 0.0  ;;  %v240_v25 = vmax.f32 %v232_v17, 0.0  ;;  %v241_v26 = vmax.f32 %v233_v18, 0.0  ;;  %v237_v27 = vadd.f32 %v405_v1, %v225_v19 }
  0x19   : > { %v242_v28 = vmax.f32 %v234_v20, 0.0  ;;  %v238_v29 = vadd.f32 %v405_v1, %v226_v23  ;;  %v243_v30 = vmax.f32 %v235_v21, 0.0  ;;  %v244_v31 = vmax.f32 %v236_v22, 0.0 }
  0x1a   : > { %248 = vst.msk [vmem:[%s206_s5] sm:$0xff] %vm247_vm0, %v239_v24  ;;  %v245_v32 = vmax.f32 %v237_v27, 0.0 }
  0x1b   : > { %249 = vst.msk [vmem:[%s206_s5 + $0x8] sm:$0xff] %vm247_vm0, %v240_v25  ;;  %v246_v33 = vmax.f32 %v238_v29, 0.0 }
  0x1c   : > { %250 = vst.msk [vmem:[%s206_s5 + $0x10] sm:$0xff] %vm247_vm0, %v241_v26 }
  0x1d   : > { %251 = vst.msk [vmem:[%s206_s5 + $0x18] sm:$0xff] %vm247_vm0, %v242_v28 }
  0x1e   : > { %252 = vst.msk [vmem:[%s206_s5 + $0x20] sm:$0xff] %vm247_vm0, %v243_v30 }
  0x1f   : > { %253 = vst.msk [vmem:[%s206_s5 + $0x28] sm:$0xff] %vm247_vm0, %v244_v31 }
  0x20   : > { %254 = vst.msk [vmem:[%s206_s5 + $0x30] sm:$0xff] %vm247_vm0, %v245_v32 }
  0x21   : > { %255 = vst.msk [vmem:[%s206_s5 + $0x38] sm:$0xff] %vm247_vm0, %v246_v33 }
  0x22 PF: > { %s13_s16 = sadd.s32 1, %s444_s16   ;;  %s535_s12 = smov %s436_s14 }
  0x23   : > { %p10_p7 = scmp.ge.s32.totalorder %s13_s16, 18   ;;  %s536_s13 = smov %s440_s15 }
  0x24   : > { %s537_s14 = smov %s540_s17  ;;  %s538_s15 = smov %s544_s18 }
  0x25   :  { %12 = sbr.rel (!%p10_p7) target bundleno = 3 (0x3), region = 62 }

// kernel: conv_block_forward.4
= control target key start
LH: loop header
LB: loop body
LE: loop exit
PB: predicated region body
PF: predicated region fallthrough
CT: control target
= control target key end

     0   :  { %s2154_s18 = smov 0   ;;  %s2156_s19 = smov 0   ;;  %s2831_s0 = inlined_call_operand.vmem [shape: f32[2,10,10,10,4], index: 0, kind: input, shape index: {}, may-alias: {0,1,2}]   ;;  %s2832_s1 = inlined_call_operand.vmem [shape: f32[2,10,10,10,4], index: 1, kind: input, shape index: {}, may-alias: {0,1,2}]   ;;  %s2833_s2 = inlined_call_operand.vmem [shape: f32[2,10,10,10,4], index: 2, kind: input, shape index: {}, may-alias: {0,1,2}]   ;;  %s2834_s3 = inlined_call_operand.vmem [shape: bf16[3,3,12,8], index: 3, kind: input, shape index: {}]   ;;  %s2835_s4 = inlined_call_operand.vmem [shape: f32[2,8,8,8,8], index: 4, kind: output, shape index: {0}]   ;;  %s2836_s5 = inlined_call_operand.vmem [shape: f32[2,8,2,8], index: 5, kind: output, shape index: {1}]  }
   0x1   :  { %s2158_s20 = smov 0   ;;  %s2160_s21 = smov 0  }
   0x2   :  { %s2162_s22 = smov 0  }
   0x3 LB: > { %s25_s23 = sadd.s32 1, %s2111_s20  ;;  %s28_s24 = sadd.s32 1, %s2115_s21  ;;  %s2119_s22 = sphi %s2162_s22, %s16_s22   ;;  %s2115_s21 = sphi %s2160_s21, %s2844_s21   ;;  %s2111_s20 = sphi %s2158_s20, %s2843_s20   ;;  %s2107_s19 = sphi %s2156_s19, %s2842_s19   ;;  %s2103_s18 = sphi %s2154_s18, %s2841_s18  }
   0x4   : > { %p26_p0 = scmp.ge.s32.totalorder %s25_s23, 8  ;;  %p1833_p1 = scmp.ge.s32.totalorder %s2119_s22, 1 }
   0x5   : > { %p252_p2 = scmp.lt.s32.totalorder %s2119_s22, 17 }
   0x6   : > { %s2846_s23 = smov (%p26_p0, %s25_s23), 0  ;;  %s2848_s24 = smov (!%p26_p0, %s28_s24), %s2115_s21 }
   0x7   : > { %p253_p3 = pnand %p1833_p1, %p252_p2  ;;  %p30_p4 = scmp.ge.s32.totalorder %s2848_s24, 2 }
   0x8   : > { %p316_p5 = scmp.lt.s32.totalorder (!%p253_p3), %s2107_s19, 1  ;;  %s325_s25 = sadd.s32 (!%p253_p3), 1, %s2103_s18 }
   0x9   : > { %s2850_s24 = smov (%p30_p4, %s2848_s24), 0  ;;  %256 = sbr.rel (%p253_p3) target bundleno = 480 (0x1e0), region = 36 }
   0xa   : > { %p328_p6 = scmp.lt.s32.totalorder (!%p253_p3), %s325_s25, 9  ;;  %s336_s27 = sadd.s32 (!%p253_p3), 2, %s2103_s18 }
   0xb   : > { %p339_p7 = scmp.lt.s32.totalorder (!%p253_p3), %s336_s27, 9  ;;  %s2121_s15 = smov (!%p253_p3), 4  }
   0xc   : > { %s2122_s16 = smov (!%p253_p3), 8   ;;  %p318_p8 = scmp.lt.s32.totalorder (!%p253_p3), %s2103_s18, 9 }
   0xd   : > { %p349_p9 = scmp.lt.s32.totalorder (!%p253_p3), %s2103_s18, 7 }
   0xe   : > { %s2852_s19 = smov (!%p316_p5, %s2107_s19), 1  ;;  %s2854_s25 = smov (!%p328_p6, %s325_s25), 9  ;;  %v1844_v56 = vld [vmem:[%s2834_s3] sm:$0xf]  ;;  %v1942_v57 = vld [vmem:[%s2834_s3] sm:$0x30] }
   0xf   : > { %s2190_s26 = smul.u32 200, %s2852_s19  ;;  %s2856_s27 = smov (!%p339_p7, %s336_s27), 9  ;;  %vm703_vm0 = vcmask 1045504   ;;  %v1845_v58 = vor.u32 %v1942_v57, %v1844_v56  ;;  %vm585_vm1 = vcmask 31744   ;;  %vm606_vm2 = vcmask 64512  }
  0x10   : > { %s1956_s28 = smul.u32 20, %s2854_s25  ;;  %vm690_vm3 = vcmask 97280   ;;  %vm752_vm4 = vsmask.f32 3328  ;;  %vm753_vm5 = vsmask.f32 7440 }
  0x11   : > { %s1957_s6 = smul.u32 20, %s2856_s27  ;;  %v705_v59 = vsel %vm703_vm0, %v1845_v58, 0  ;;  %vm963_vm6 = vcmask 1042432   ;;  %vm964_vm7 = vcmask 1046532   ;;  %vm2427_vm9 = vmor %vm752_vm4, %vm753_vm5  ;;  %s1838_s8 = sshll.u32 %s2852_s19, 6  ;;  %vm1613_vm10 = vcmask 57344  }
  0x12   : > { %s332_s29 = sadd.s32 %s1956_s28, %s2190_s26  ;;  %714 = vmatpush.bf16.msra.mxu0 %v705_v59  ;;  %1951 = vmatpush.bf16.msra.mxu1 %v705_v59  ;;  %vm2419_vm8 = vmor %vm963_vm6, %vm964_vm7 }
  0x13   : > { %s1835_s30 = sshll.u32 %s332_s29, 3  ;;  %s343_s10 = sadd.s32 %s1957_s6, %s2190_s26  ;;  %1952 = vmatpush.bf16.msra.mxu2 %v705_v59  ;;  %1953 = vmatpush.bf16.msra.mxu3 %v705_v59 }
  0x14   : > { %s2197_s9 = scalar_lea.vmem %s2832_s1, %s1835_s30  ;;  %s1836_s11 = sshll.u32 %s343_s10, 3 }
  0x15   : > { %v393_v0 = vld [vmem:[%s2197_s9 + $0x40] sm:$0xff]  ;;  %v395_v1 = vld [vmem:[%s2197_s9 + $0x50] sm:$0xff]  ;;  %s2207_s14 = scalar_lea.vmem %s2833_s2, %s1836_s11  ;;  %v386_v20 = vld [vmem:[%s2197_s9 + $0x8] sm:$0x3] }
  0x16   : > { %v389_v2 = vld [vmem:[%s2197_s9 + $0x20] sm:$0xff]  ;;  %v2011_v3 = vpack.i.bf16 %v395_v1, %v393_v0  ;;  %v391_v4 = vld [vmem:[%s2197_s9 + $0x30] sm:$0xff]  ;;  %v406_v18 = vld [vmem:[%s2207_s14 + $0x8] sm:$0x3]  ;;  %s319_s17 = scalar_select %p318_p8, %s2103_s18, 9 }
  0x17   : > { %v2001_v5 = vpack.i.bf16 %v391_v4, %v389_v2  ;;  %v385_v6 = vld [vmem:[%s2197_s9] sm:$0xff]  ;;  %v387_v7 = vld [vmem:[%s2197_s9 + $0x10] sm:$0xff]  ;;  %v408_v19 = vld [vmem:[%s2207_s14 + $0x18] sm:$0x3]  ;;  %s2858_s18 = smov (!%p349_p9, %s2103_s18), 7 }
  0x18   : > { %2012 = vrot.lane.b32.xlu1 %v2011_v3, %s2121_s15  ;;  %v2021_v8 = vpack.i.bf16 %v387_v7, %v385_v6  ;;  %v413_v9 = vld [vmem:[%s2207_s14 + $0x40] sm:$0xff]  ;;  %v415_v10 = vld [vmem:[%s2207_s14 + $0x50] sm:$0xff]  ;;  %v388_v21 = vld [vmem:[%s2197_s9 + $0x18] sm:$0x3]  ;;  %v2036_v24 = vpack.i.bf16 %v408_v19, %v406_v18  ;;  %s1954_s25 = smul.u32 20, %s319_s17 }
  0x19   : > { %2002 = vrot.lane.b32.xlu0 %v2001_v5, %s2121_s15  ;;  %v409_v11 = vld [vmem:[%s2207_s14 + $0x20] sm:$0xff]  ;;  %v411_v12 = vld [vmem:[%s2207_s14 + $0x30] sm:$0xff]  ;;  %v2016_v15 = vpack.i.bf16 %v415_v10, %v413_v9  ;;  %v2031_v25 = vpack.i.bf16 %v388_v21, %v386_v20  ;;  %v390_v27 = vld [vmem:[%s2197_s9 + $0x28] sm:$0x3] }
  0x1a   : > { %2022 = vrot.lane.b32.xlu2 %v2021_v8, %s2121_s15  ;;  %v405_v13 = vld [vmem:[%s2207_s14] sm:$0xff]  ;;  %v407_v14 = vld [vmem:[%s2207_s14 + $0x10] sm:$0xff]  ;;  %v2006_v16 = vpack.i.bf16 %v411_v12, %v409_v11  ;;  %v392_v28 = vld [vmem:[%s2197_s9 + $0x38] sm:$0x3]  ;;  %s322_s6 = sadd.s32 %s2190_s26, %s1954_s25 }
  0x1b   : > { %v2026_v17 = vpack.i.bf16 %v407_v14, %v405_v13  ;;  %v397_v22 = vld [vmem:[%s2197_s9 + $0x60] sm:$0xff]  ;;  %v399_v23 = vld [vmem:[%s2197_s9 + $0x70] sm:$0xff]  ;;  %v410_v31 = vld [vmem:[%s2207_s14 + $0x28] sm:$0x3]  ;;  %v2051_v33 = vpack.i.bf16 %v392_v28, %v390_v27  ;;  %s1834_s7 = sshll.u32 %s322_s6, 3 }
  0x1c   : > { %v2041_v26 = vpack.i.bf16 %v399_v23, %v397_v22  ;;  %v417_v29 = vld [vmem:[%s2207_s14 + $0x60] sm:$0xff]  ;;  %v419_v30 = vld [vmem:[%s2207_s14 + $0x70] sm:$0xff]  ;;  %v412_v32 = vld [vmem:[%s2207_s14 + $0x38] sm:$0x3]  ;;  %s2282_s10 = scalar_lea.vmem %s2831_s0, %s1834_s7 }
  0x1d   : > { %v2046_v34 = vpack.i.bf16 %v419_v30, %v417_v29  ;;  %v2056_v35 = vpack.i.bf16 %v412_v32, %v410_v31  ;;  %v414_v36 = vld [vmem:[%s2207_s14 + $0x48] sm:$0x3]  ;;  %v416_v37 = vld [vmem:[%s2207_s14 + $0x58] sm:$0x3]  ;;  %v401_v47 = vld [vmem:[%s2197_s9 + $0x80] sm:$0xff] }
  0x1e   : > { %v394_v38 = vld [vmem:[%s2197_s9 + $0x48] sm:$0x3]  ;;  %v396_v39 = vld [vmem:[%s2197_s9 + $0x58] sm:$0x3]  ;;  %v2066_v42 = vpack.i.bf16 %v416_v37, %v414_v36  ;;  %v421_v49 = vld [vmem:[%s2207_s14 + $0x80] sm:$0xff] }
  0x1f   : > { %v398_v40 = vld [vmem:[%s2197_s9 + $0x68] sm:$0x3]  ;;  %v400_v41 = vld [vmem:[%s2197_s9 + $0x78] sm:$0x3]  ;;  %v2061_v43 = vpack.i.bf16 %v396_v39, %v394_v38  ;;  %v403_v52 = vld [vmem:[%s2197_s9 + $0x90] sm:$0xff] }
  0x20   : > { %2017 = vrot.lane.b32.xlu1 %v2016_v15, %s2122_s16  ;;  %v2071_v44 = vpack.i.bf16 %v400_v41, %v398_v40  ;;  %v418_v45 = vld [vmem:[%s2207_s14 + $0x68] sm:$0x3]  ;;  %v420_v46 = vld [vmem:[%s2207_s14 + $0x78] sm:$0x3]  ;;  %v423_v54 = vld [vmem:[%s2207_s14 + $0x90] sm:$0xff] }
  0x21   : > { %2007 = vrot.lane.b32.xlu0 %v2006_v16, %s2122_s16  ;;  %v2076_v48 = vpack.i.bf16 %v420_v46, %v418_v45  ;;  %v422_v50 = vld [vmem:[%s2207_s14 + $0x88] sm:$0x3]  ;;  %v404_v53 = vld [vmem:[%s2197_s9 + $0x98] sm:$0x3]  ;;  %v365_v63 = vld [vmem:[%s2282_s10] sm:$0xff] }
  0x22   : > { %2027 = vrot.lane.b32.xlu2 %v2026_v17, %s2122_s16  ;;  %v402_v51 = vld [vmem:[%s2197_s9 + $0x88] sm:$0x3]  ;;  %v424_v55 = vld [vmem:[%s2207_s14 + $0x98] sm:$0x3]  ;;  %v367_v0 = vld [vmem:[%s2282_s10 + $0x10] sm:$0xff]  ;;  %s1840_s14 = sshll.u32 %s2852_s19, 3 }
  0x23   : > { %v1854_v13 = vld [vmem:[%s2834_s3 + $0x8] sm:$0xf]  ;;  %v1943_v14 = vld [vmem:[%s2834_s3 + $0x8] sm:$0x30]  ;;  %v1872_v15 = vld [vmem:[%s2834_s3 + $0x10] sm:$0xf] }
  0x24   : > { %v1855_v16 = vor.u32 %v1943_v14, %v1854_v13  ;;  %v1944_v17 = vld [vmem:[%s2834_s3 + $0x10] sm:$0x30]  ;;  %v373_v29 = vld [vmem:[%s2282_s10 + $0x40] sm:$0xff]  ;;  %v1882_v41 = vld [vmem:[%s2834_s3 + $0x18] sm:$0xf] }
  0x25   : > { %v1873_v18 = vor.u32 %v1944_v17, %v1872_v15  ;;  %v375_v30 = vld [vmem:[%s2282_s10 + $0x50] sm:$0xff] }
  0x26   : > { %v908_v19 = vsel %vm703_vm0, %v1855_v16, 0 }
  0x27   : > { %917 = vmatpush.bf16.msrb.mxu1 %v908_v19  ;;  %v1039_v20 = vsel %vm703_vm0, %v1873_v18, 0  ;;  %v366_v18 = vld [vmem:[%s2282_s10 + $0x8] sm:$0x3]  ;;  %v368_v19 = vld [vmem:[%s2282_s10 + $0x18] sm:$0x3] }
  0x28   : > { %2037 = vrot.lane.b32.xlu1 %v2036_v24, %s2122_s16  ;;  %1048 = vmatpush.bf16.msrb.mxu2 %v1039_v20 }
  0x29   : > { %2032 = vrot.lane.b32.xlu0 %v2031_v25, %s2121_s15 }
  0x2a   : > { %2042 = vrot.lane.b32.xlu2 %v2041_v26, %s2121_s15 }
  0x30   : > { %2052 = vrot.lane.b32.xlu1 %v2051_v33, %s2121_s15  ;;  %v369_v33 = vld [vmem:[%s2282_s10 + $0x20] sm:$0xff] }
  0x31   : > { %2047 = vrot.lane.b32.xlu0 %v2046_v34, %s2122_s16  ;;  %v371_v34 = vld [vmem:[%s2282_s10 + $0x30] sm:$0xff] }
  0x32   : > { %2057 = vrot.lane.b32.xlu2 %v2056_v35, %s2122_s16 }
  0x38   : > { %2067 = vrot.lane.b32.xlu1 %v2066_v42, %s2122_s16 }
  0x39   : > { %2062 = vrot.lane.b32.xlu0 %v2061_v43, %s2121_s15 }
  0x3a   : > { %2072 = vrot.lane.b32.xlu2 %v2071_v44, %s2121_s15 }
  0x40   : > { %477 = vrot.lane.b32.xlu1 %v401_v47, %s2121_s15  ;;  %v1945_v47 = vld [vmem:[%s2834_s3 + $0x18] sm:$0x30] }
  0x41   : > { %2077 = vrot.lane.b32.xlu0 %v2076_v48, %s2122_s16 }
  0x42   : > { %557 = vrot.lane.b32.xlu2 %v421_v49, %s2122_s16 }
  0x48   : > { %559 = vrot.lane.b32.xlu1 %v422_v50, %s2122_s16 }
  0x49   : > { %479 = vrot.lane.b32.xlu0 %v402_v51, %s2121_s15  ;;  %v1883_v51 = vor.u32 %v1945_v47, %v1882_v41 }
  0x4a   : > { %481 = vrot.lane.b32.xlu2 %v403_v52, %s2121_s15  ;;  %v1903_v52 = vld [vmem:[%s2834_s3 + $0x28] sm:$0xf] }
  0x50   : > { %483 = vrot.lane.b32.xlu1 %v404_v53, %s2121_s15  ;;  %v1947_v53 = vld [vmem:[%s2834_s3 + $0x28] sm:$0x30]  ;;  %s361_s15 = sadd.s32 %s1840_s14, %s2858_s18 }
  0x51   : > { %561 = vrot.lane.b32.xlu0 %v423_v54, %s2122_s16 }
  0x52   : > { %563 = vrot.lane.b32.xlu2 %v424_v55, %s2122_s16  ;;  %s1841_s16 = sshll.u32 %s361_s15, 1 }
  0x53   : > { %s363_s27 = scalar_lea.vmem %s2836_s5, %s1841_s16 }
  0x74   : > { %v2023_v60 = vpop.permute.xlu2 %2022 }
  0x75   : > { %v2025_v61 = vunpack.i.h.bf16 %v2023_v60  ;;  %v2024_v62 = vunpack.i.l.bf16 %v2023_v60 }
  0x77   : > { %v586_v1 = vsel %vm585_vm1, %v365_v63, %v2024_v62  ;;  %v588_v2 = vsel %vm585_vm1, %v367_v0, %v2025_v61 }
  0x7c   : > { %v2028_v3 = vpop.permute.xlu2 %2027 }
  0x7d   : > { %v2030_v4 = vunpack.i.h.bf16 %v2028_v3  ;;  %v2029_v5 = vunpack.i.l.bf16 %v2028_v3  ;;  %v1892_v3 = vld [vmem:[%s2834_s3 + $0x20] sm:$0xf] }
  0x7f   : > { %v607_v6 = vsel %vm606_vm2, %v586_v1, %v2029_v5  ;;  %v609_v7 = vsel %vm606_vm2, %v588_v2, %v2030_v4  ;;  %v377_v1 = vld [vmem:[%s2282_s10 + $0x60] sm:$0xff]  ;;  %v1904_v2 = vor.u32 %v1947_v53, %v1903_v52  ;;  %v379_v5 = vld [vmem:[%s2282_s10 + $0x70] sm:$0xff] }
  0x80   : > { %v2290_v8 = vpack.c.bf16 %v607_v6, %v607_v6  ;;  %v2292_v9 = vpack.c.bf16 %v609_v7, %v609_v7  ;;  %v1946_v4 = vld [vmem:[%s2834_s3 + $0x20] sm:$0x30] }
  0x82   : > { %v673_v10 = vunpack.c.l.b16 %v2290_v8  ;;  %v674_v11 = vunpack.c.l.b16 %v2292_v9  ;;  %v756_v23 = vshrl.u32 %v2290_v8, 16  ;;  %v759_v24 = vshll.u32 %v2290_v8, 16 }
  0x83   : > { %v770_v25 = vshrl.u32 %v2292_v9, 16  ;;  %v773_v26 = vshll.u32 %v2292_v9, 16  ;;  %v1861_v16 = vrot.slane %v2292_v9, 9 }
  0x84   : > { %v681_v12 = vpack.c.b16 %v674_v11, %v673_v10  ;;  %v2321_v35 = vrot.slane %v756_v23, 4  ;;  %v2323_v36 = vrot.slane %v759_v24, 5  ;;  %v2043_v40 = vpop.permute.xlu2 %2042  ;;  %v1860_v10 = vrot.slane %v2290_v8, 9 }
  0x85   : > { %v2325_v37 = vrot.slane %v770_v25, 4  ;;  %v2327_v38 = vrot.slane %v773_v26, 5  ;;  %v2044_v46 = vunpack.i.l.bf16 %v2043_v40  ;;  %v2045_v0 = vunpack.i.h.bf16 %v2043_v40 }
  0x86   : > { %1846 = vmatmul.msk.bf16.vlgmr.msra.gmra.mxu0 %vm690_vm3, %v681_v12  ;;  %v1121_v12 = vsel %vm703_vm0, %v1883_v51, 0  ;;  %v762_v15 = vor.u32 %v2323_v36, %v2321_v35  ;;  %v1893_v23 = vor.u32 %v1946_v4, %v1892_v3 }
  0x87   : > { %1130 = vmatpush.bf16.msrb.mxu3 %v1121_v12  ;;  %v2377_v20 = vsel %vm585_vm1, %v377_v1, %v2044_v46 }
  0x88   : > { %v763_v46 = vrot.slane %v762_v15, 4 }
  0x8a   : > { %v2013_v21 = vpop.permute.xlu1 %2012 }
  0x8b   : > { %v2003_v22 = vpop.permute.xlu0 %2002  ;;  %v2014_v27 = vunpack.i.l.bf16 %v2013_v21  ;;  %v2015_v28 = vunpack.i.h.bf16 %v2013_v21 }
  0x8c   : > { %v2005_v31 = vunpack.i.h.bf16 %v2003_v22  ;;  %v2004_v32 = vunpack.i.l.bf16 %v2003_v22  ;;  %v776_v22 = vor.u32 %v2327_v38, %v2325_v37 }
  0x8d   : > { %v594_v42 = vsel %vm585_vm1, %v373_v29, %v2014_v27  ;;  %v596_v48 = vsel %vm585_vm1, %v375_v30, %v2015_v28  ;;  %v600_v27 = vsel %vm585_vm1, %v379_v5, %v2045_v0  ;;  %v1302_v28 = vsel %vm703_vm0, %v1904_v2, 0  ;;  %v1913_v29 = vld [vmem:[%s2834_s3 + $0x30] sm:$0xf]  ;;  %v1948_v30 = vld [vmem:[%s2834_s3 + $0x30] sm:$0x30] }
  0x8e   : > { %v590_v54 = vsel %vm585_vm1, %v369_v33, %v2004_v32  ;;  %v592_v55 = vsel %vm585_vm1, %v371_v34, %v2005_v31  ;;  %v1216_v34 = vsel %vm703_vm0, %v1893_v23, 0  ;;  %v1914_v35 = vor.u32 %v1948_v30, %v1913_v29 }
  0x8f   : > { %1225 = vmatpush.bf16.msrb.mxu0 %v1216_v34  ;;  %v777_v47 = vrot.slane %v776_v22, 4 }
  0x92   : > { %v2018_v39 = vpop.permute.xlu1 %2017 }
  0x93   : > { %v2020_v43 = vunpack.i.h.bf16 %v2018_v39  ;;  %v2019_v44 = vunpack.i.l.bf16 %v2018_v39  ;;  %v2008_v45 = vpop.permute.xlu0 %2007  ;;  %v2058_v39 = vpop.permute.xlu2 %2057 }
  0x94   : > { %v2010_v49 = vunpack.i.h.bf16 %v2008_v45  ;;  %v2009_v50 = vunpack.i.l.bf16 %v2008_v45 }
  0x95   : > { %v615_v56 = vsel %vm606_vm2, %v594_v42, %v2019_v44  ;;  %v617_v57 = vsel %vm606_vm2, %v596_v48, %v2020_v43  ;;  %v1372_v43 = vsel %vm703_vm0, %v1914_v35, 0  ;;  %v370_v48 = vld [vmem:[%s2282_s10 + $0x28] sm:$0x3] }
  0x96   : > { %v2347_v58 = vpack.c.bf16 %v615_v56, %v615_v56  ;;  %v2349_v59 = vpack.c.bf16 %v617_v57, %v617_v57  ;;  %v611_v60 = vsel %vm606_vm2, %v590_v54, %v2009_v50  ;;  %v613_v61 = vsel %vm606_vm2, %v592_v55, %v2010_v49 }
  0x97   : > { %v2353_v62 = vpack.c.bf16 %v611_v60, %v611_v60  ;;  %v2355_v63 = vpack.c.bf16 %v613_v61, %v613_v61  ;;  %v2060_v49 = vunpack.i.h.bf16 %v2058_v39  ;;  %v2059_v50 = vunpack.i.l.bf16 %v2058_v39  ;;  %v372_v60 = vld [vmem:[%s2282_s10 + $0x38] sm:$0x3] }
  0x98   : > { %v677_v6 = vunpack.c.l.b16 %v2347_v58  ;;  %v678_v7 = vunpack.c.l.b16 %v2349_v59 }
  0x99   : > { %v675_v13 = vunpack.c.l.b16 %v2353_v62  ;;  %v676_v14 = vunpack.c.l.b16 %v2355_v63  ;;  %v784_v36 = vshrl.u32 %v2353_v62, 16  ;;  %v787_v40 = vshll.u32 %v2353_v62, 16 }
  0x9a   : > { %v2038_v17 = vpop.permute.xlu1 %2037  ;;  %v2383_v21 = vpack.c.b16 %v678_v7, %v677_v6  ;;  %v798_v51 = vshrl.u32 %v2355_v63, 16  ;;  %v801_v52 = vshll.u32 %v2355_v63, 16 }
  0x9b   : > { %v2040_v24 = vunpack.i.h.bf16 %v2038_v17  ;;  %v2039_v25 = vunpack.i.l.bf16 %v2038_v17  ;;  %v2033_v26 = vpop.permute.xlu0 %2032  ;;  %v2399_v33 = vpack.c.b16 %v676_v14, %v675_v13  ;;  %v786_v0 = vrot.slane %v784_v36, 4 }
  0x9c   : > { %v2035_v31 = vunpack.i.h.bf16 %v2033_v26  ;;  %v2034_v32 = vunpack.i.l.bf16 %v2033_v26  ;;  %1848 = vmatmul.msk.bf16.vlgmr.msra.gmra.mxu2 %vm690_vm3, %v2383_v21  ;;  %v789_v1 = vrot.slane %v787_v40, 5 }
  0x9d   : > { %1847 = vmatmul.msk.bf16.vlgmr.msra.gmra.mxu1 %vm690_vm3, %v2399_v33  ;;  %1381 = vmatpush.bf16.msra.mxu2 %v1372_v43 }
  0x9e   : > { %v587_v37 = vsel %vm585_vm1, %v366_v18, %v2034_v32  ;;  %v589_v38 = vsel %vm585_vm1, %v368_v19, %v2035_v31  ;;  %1311 = vmatpush.bf16.msra.mxu1 %v1302_v28  ;;  %v790_v31 = vor.u32 %v789_v1, %v786_v0  ;;  %v800_v32 = vrot.slane %v798_v51, 4  ;;  %v1923_v1 = vld [vmem:[%s2834_s3 + $0x38] sm:$0xf] }
  0x9f   : > { %v608_v41 = vsel %vm606_vm2, %v587_v37, %v2039_v25  ;;  %v610_v42 = vsel %vm606_vm2, %v589_v38, %v2040_v24 }
  0xa0   : > { %v628_v44 = vpack.c.bf16 %v608_v41, %v608_v41  ;;  %v630_v45 = vpack.c.bf16 %v610_v42, %v610_v42 }
  0xa2   : > { %v765_v53 = vshll.u32 %v628_v44, 16  ;;  %v779_v54 = vshll.u32 %v630_v45, 16  ;;  %v968_v55 = vrot.slane %v628_v44, 5  ;;  %v972_v56 = vrot.slane %v630_v45, 5  ;;  %v2053_v57 = vpop.permute.xlu1 %2052 }
  0xa3   : > { %v2055_v2 = vunpack.i.h.bf16 %v2053_v57  ;;  %v2054_v3 = vunpack.i.l.bf16 %v2053_v57  ;;  %v2048_v4 = vpop.permute.xlu0 %2047  ;;  %v376_v57 = vld [vmem:[%s2282_s10 + $0x58] sm:$0x3] }
  0xa4   : > { %v767_v5 = vrot.slane %v765_v53, 5  ;;  %v781_v12 = vrot.slane %v779_v54, 5  ;;  %v2050_v15 = vunpack.i.h.bf16 %v2048_v4  ;;  %v2049_v17 = vunpack.i.l.bf16 %v2048_v4 }
  0xa5   : > { %v591_v18 = vsel %vm585_vm1, %v370_v48, %v2054_v3  ;;  %v593_v19 = vsel %vm585_vm1, %v372_v60, %v2055_v2  ;;  %v969_v23 = vsel %vm2419_vm8, %v1860_v10, %v968_v55  ;;  %v2439_v24 = vsel %vm2419_vm8, %v1861_v16, %v972_v56  ;;  %v1949_v2 = vld [vmem:[%s2834_s3 + $0x38] sm:$0x30] }
  0xa6   : > { %v619_v25 = vsel %vm606_vm2, %v2377_v20, %v2049_v17  ;;  %v621_v26 = vsel %vm606_vm2, %v600_v27, %v2050_v15  ;;  %v612_v28 = vsel %vm606_vm2, %v591_v18, %v2059_v50  ;;  %v614_v29 = vsel %vm606_vm2, %v593_v19, %v2060_v49 }
  0xa7   : > { %v2446_v30 = vpack.c.bf16 %v619_v25, %v619_v25  ;;  %v2448_v8 = vpack.c.bf16 %v621_v26, %v621_v26  ;;  %v2450_v10 = vpack.c.bf16 %v612_v28, %v612_v28  ;;  %v768_v16 = vsel %vm2427_vm9, %v763_v46, %v767_v5  ;;  %v374_v46 = vld [vmem:[%s2282_s10 + $0x48] sm:$0x3]  ;;  %v2073_v26 = vpop.permute.xlu2 %2072 }
  0xa8   : > { %v782_v20 = vsel %vm2427_vm9, %v777_v47, %v781_v12  ;;  %v803_v27 = vrot.slane %v801_v52, 5  ;;  %v2456_v34 = vpack.c.bf16 %v614_v29, %v614_v29  ;;  %v1009_v36 = vunpack.c.l.b16 %v969_v23 }
  0xa9   : > { %v793_v35 = vshll.u32 %v2450_v10, 16  ;;  %v1010_v37 = vunpack.c.l.b16 %v2439_v24  ;;  %v679_v39 = vunpack.c.l.b16 %v2446_v30  ;;  %v680_v40 = vunpack.c.l.b16 %v2448_v8 }
  0xaa   : > { %v2068_v38 = vpop.permute.xlu1 %2067  ;;  %v878_v41 = vunpack.c.l.b16 %v768_v16  ;;  %v879_v42 = vunpack.c.l.b16 %v782_v20  ;;  %v791_v47 = vrot.slane %v790_v31, 4  ;;  %v812_v48 = vshrl.u32 %v2347_v58, 16 }
  0xab   : > { %v795_v43 = vrot.slane %v793_v35, 5  ;;  %v2069_v44 = vunpack.i.l.bf16 %v2068_v38  ;;  %v2063_v45 = vpop.permute.xlu0 %2062  ;;  %v2468_v50 = vpack.c.b16 %v680_v40, %v679_v39  ;;  %v815_v52 = vshll.u32 %v2347_v58, 16 }
  0xac   : > { %v2064_v49 = vunpack.i.l.bf16 %v2063_v45  ;;  %v886_v51 = vpack.c.b16 %v879_v42, %v878_v41  ;;  %v807_v53 = vshll.u32 %v2456_v34, 16  ;;  %v2065_v54 = vunpack.i.h.bf16 %v2063_v45  ;;  %v378_v41 = vld [vmem:[%s2282_s10 + $0x68] sm:$0x3] }
  0xad   : > { %v1017_v55 = vpack.c.b16 %v1010_v37, %v1009_v36  ;;  %v796_v56 = vsel %vm2427_vm9, %v791_v47, %v795_v43  ;;  %1849 = vmatmul.msk.bf16.vlgmr.msra.gmra.mxu3 %vm690_vm3, %v2468_v50  ;;  %v976_v3 = vrot.slane %v2450_v10, 5  ;;  %v804_v5 = vor.u32 %v803_v27, %v800_v32 }
  0xae   : > { %v595_v60 = vsel %vm585_vm1, %v374_v46, %v2064_v49  ;;  %1856 = vmatmul.msk.bf16.vlgmr.msrb.gmra.mxu1 %vm690_vm3, %v886_v51  ;;  %v880_v0 = vunpack.c.l.b16 %v796_v56  ;;  %v814_v12 = vrot.slane %v812_v48, 4  ;;  %v980_v15 = vrot.slane %v2456_v34, 5 }
  0xaf   : > { %v616_v4 = vsel %vm606_vm2, %v595_v60, %v2069_v44  ;;  %1874 = vmatmul.msk.bf16.vlgmr.msrb.gmra.mxu2 %vm690_vm3, %v1017_v55  ;;  %v2070_v17 = vunpack.i.h.bf16 %v2068_v38  ;;  %v809_v23 = vrot.slane %v807_v53, 5  ;;  %v597_v25 = vsel %vm585_vm1, %v376_v57, %v2065_v54  ;;  %v380_v54 = vld [vmem:[%s2282_s10 + $0x78] sm:$0x3]  ;;  %v381_v60 = vld [vmem:[%s2282_s10 + $0x80] sm:$0xff] }
  0xb0   : > { %v2491_v18 = vpack.c.bf16 %v616_v4, %v616_v4  ;;  %v1194_v19 = vpack.c.b16 %v880_v0, %v879_v42  ;;  %v1924_v28 = vor.u32 %v1949_v2, %v1923_v1  ;;  %v817_v29 = vrot.slane %v815_v52, 5 }
  0xb1   : > { %v2074_v31 = vunpack.i.l.bf16 %v2073_v26  ;;  %v1862_v16 = vrot.slane %v2353_v62, 9  ;;  %v805_v27 = vrot.slane %v804_v5, 4  ;;  %v1863_v34 = vrot.slane %v2355_v63, 9 }
  0xb2   : > { %v821_v10 = vshll.u32 %v2491_v18, 16  ;;  %1894 = vmatmul.msk.bf16.vlgmr.msrb.gmra.mxu0 %vm690_vm3, %v1194_v19  ;;  %v478_v20 = vpop.permute.xlu1 %477  ;;  %v1455_v35 = vsel %vm703_vm0, %v1924_v28, 0  ;;  %v818_v36 = vor.u32 %v817_v29, %v814_v12  ;;  %v618_v38 = vsel %vm606_vm2, %v597_v25, %v2070_v17  ;;  %v382_v12 = vld [vmem:[%s2282_s10 + $0x88] sm:$0x3]  ;;  %v1950_v17 = vld [vmem:[%s2834_s3 + $0x40] sm:$0x30]  ;;  %v558_v29 = vpop.permute.xlu2 %557 }
  0xb3   : > { %v2078_v32 = vpop.permute.xlu0 %2077  ;;  %1464 = vmatpush.bf16.msra.mxu3 %v1455_v35  ;;  %v826_v42 = vshrl.u32 %v2349_v59, 16  ;;  %v829_v43 = vshll.u32 %v2349_v59, 16  ;;  %v810_v44 = vsel %vm2427_vm9, %v805_v27, %v809_v23  ;;  %v2507_v45 = vsel %vm2419_vm8, %v1862_v16, %v976_v3 }
  0xb4   : > { %v2511_v46 = vsel %vm2419_vm8, %v1863_v34, %v980_v15  ;;  %v823_v47 = vrot.slane %v821_v10, 5  ;;  %v2079_v48 = vunpack.i.l.bf16 %v2078_v32  ;;  %v2513_v49 = vpack.c.bf16 %v618_v38, %v618_v38  ;;  %v1934_v15 = vld [vmem:[%s2834_s3 + $0x40] sm:$0xf] }
  0xb5   : > { %v2075_v51 = vunpack.i.h.bf16 %v2073_v26  ;;  %v599_v52 = vsel %vm585_vm1, %v378_v41, %v2074_v31  ;;  %v819_v53 = vrot.slane %v818_v36, 4  ;;  %v881_v55 = vunpack.c.l.b16 %v810_v44 }
  0xb6   : > { %v1011_v56 = vunpack.c.l.b16 %v2507_v45  ;;  %v1012_v57 = vunpack.c.l.b16 %v2511_v46  ;;  %v828_v2 = vrot.slane %v826_v42, 4  ;;  %v831_v3 = vrot.slane %v829_v43, 5  ;;  %v384_v46 = vld [vmem:[%s2282_s10 + $0x98] sm:$0x3] }
  0xb7   : > { %v824_v1 = vsel %vm2427_vm9, %v819_v53, %v823_v47  ;;  %v2080_v4 = vunpack.i.h.bf16 %v2078_v32  ;;  %v620_v5 = vsel %vm606_vm2, %v599_v52, %v2079_v48  ;;  %v835_v19 = vshll.u32 %v2513_v49, 16 }
  0xb8   : > { %v601_v23 = vsel %vm585_vm1, %v380_v54, %v2075_v51  ;;  %v1099_v26 = vpack.c.b16 %v675_v13, %v674_v11  ;;  %v602_v28 = vsel %vm585_vm1, %v381_v60, %v478_v20  ;;  %v2537_v10 = vpack.c.b16 %v881_v55, %v880_v0 }
  0xb9   : > { %v2543_v31 = vpack.c.b16 %v1012_v57, %v1011_v56  ;;  %v882_v16 = vunpack.c.l.b16 %v824_v1  ;;  %v2545_v32 = vpack.c.bf16 %v620_v5, %v620_v5  ;;  %v832_v34 = vor.u32 %v831_v3, %v828_v2 }
  0xba   : > { %v560_v9 = vpop.permute.xlu1 %559  ;;  %v1935_v62 = vor.u32 %v1950_v17, %v1934_v15  ;;  %v622_v11 = vsel %vm606_vm2, %v601_v23, %v2080_v4  ;;  %v840_v13 = vshrl.u32 %v2446_v30, 16  ;;  %v843_v0 = vshll.u32 %v2446_v30, 16  ;;  %v482_v24 = vpop.permute.xlu2 %481 }
  0xbb   : > { %v480_v25 = vpop.permute.xlu0 %479  ;;  %v623_v20 = vsel %vm606_vm2, %v602_v28, %v558_v29  ;;  %v837_v35 = vrot.slane %v835_v19, 5  ;;  %v1195_v41 = vpack.c.b16 %v882_v16, %v881_v55  ;;  %v642_v44 = vpack.c.bf16 %v622_v11, %v622_v11 }
  0xbc   : > { %v603_v27 = vsel %vm585_vm1, %v382_v12, %v480_v25  ;;  %v1529_v36 = vsel %vm703_vm0, %v1935_v62, 0  ;;  %v842_v42 = vrot.slane %v840_v13, 4  ;;  %v845_v43 = vrot.slane %v843_v0, 5 }
  0xbd   : > { %1884 = vmatmul.msk.bf16.vlgmr.msrb.gmra.mxu3 %vm690_vm3, %v1099_v26  ;;  %v624_v38 = vsel %vm606_vm2, %v603_v27, %v560_v9  ;;  %1538 = vmatpush.bf16.msra.mxu0 %v1529_v36  ;;  %v849_v47 = vshll.u32 %v2545_v32, 16  ;;  %v833_v48 = vrot.slane %v832_v34, 4  ;;  %v984_v51 = vrot.slane %v2491_v18, 5 }
  0xbe   : > { %1857 = vmatmul.msk.bf16.gmra.mxu1 %vm690_vm3, %v2537_v10  ;;  %v988_v52 = vrot.slane %v2513_v49, 5  ;;  %v2563_v53 = vpack.c.bf16 %v623_v20, %v623_v20  ;;  %v644_v54 = vpack.c.bf16 %v624_v38, %v624_v38  ;;  %v846_v55 = vor.u32 %v845_v43, %v842_v42 }
  0xbf   : > { %1875 = vmatmul.msk.bf16.gmra.mxu2 %vm690_vm3, %v2543_v31  ;;  %v838_v60 = vsel %vm2427_vm9, %v833_v48, %v837_v35  ;;  %v1864_v1 = vrot.slane %v2347_v58, 9  ;;  %v1865_v2 = vrot.slane %v2349_v59, 9  ;;  %v851_v3 = vrot.slane %v849_v47, 5 }
  0xc0   : > { %v996_v4 = vrot.slane %v642_v44, 5  ;;  %v1898_v5 = vrot.slane %v2563_v53, 9  ;;  %v883_v12 = vunpack.c.l.b16 %v838_v60  ;;  %v854_v15 = vshrl.u32 %v2448_v8, 16 }
  0xc1   : > { %v2572_v18 = vsel %vm2419_vm8, %v1864_v1, %v984_v51  ;;  %v2576_v49 = vsel %vm2419_vm8, %v1865_v2, %v988_v52  ;;  %v1266_v17 = vrot.slane %v644_v54, 5  ;;  %v847_v19 = vrot.slane %v846_v55, 4 }
  0xc2   : > { %1895 = vmatmul.msk.bf16.gmra.mxu0 %vm690_vm3, %v1195_v41  ;;  %v857_v23 = vshll.u32 %v2448_v8, 16  ;;  %v1867_v25 = vrot.slane %v2448_v8, 9  ;;  %v1169_v26 = vshrl.u32 %v2563_v53, 16  ;;  %v1172_v28 = vshll.u32 %v2563_v53, 16  ;;  %v484_v45 = vpop.permute.xlu1 %483 }
  0xc3   : > { %v1013_v29 = vunpack.c.l.b16 %v2572_v18  ;;  %v1014_v27 = vunpack.c.l.b16 %v2576_v49  ;;  %v852_v9 = vsel %vm2427_vm9, %v847_v19, %v851_v3  ;;  %v2589_v62 = vpack.c.b16 %v883_v12, %v882_v16 }
  0xc4   : > { %v997_v34 = vsel %vm2419_vm8, %v1867_v25, %v996_v4  ;;  %v856_v11 = vrot.slane %v854_v15, 4  ;;  %v859_v13 = vrot.slane %v857_v23, 5  ;;  %v2593_v0 = vsel %vm2419_vm8, %v1898_v5, %v1266_v17 }
  0xc5   : > { %v1100_v20 = vpack.c.b16 %v677_v6, %v676_v14  ;;  %v884_v35 = vunpack.c.l.b16 %v852_v9  ;;  %v1016_v36 = vunpack.c.l.b16 %v997_v34  ;;  %v1279_v38 = vunpack.c.l.b16 %v2593_v0 }
  0xc6   : > { %v863_v41 = vshll.u32 %v642_v44, 16  ;;  %v1171_v42 = vrot.slane %v1169_v26, 4  ;;  %v1174_v43 = vrot.slane %v1172_v28, 5  ;;  %v1019_v16 = vpack.c.b16 %v1014_v27, %v1013_v29 }
  0xc7   : > { %v2607_v63 = vpack.c.b16 %v1279_v38, %v1016_v36  ;;  %v860_v58 = vor.u32 %v859_v13, %v856_v11  ;;  %v1196_v6 = vpack.c.b16 %v884_v35, %v883_v12  ;;  %v1178_v44 = vshll.u32 %v644_v54, 16 }
  0xc8   : > { %v865_v14 = vrot.slane %v863_v41, 5  ;;  %v1175_v47 = vor.u32 %v1174_v43, %v1171_v42  ;;  %v992_v48 = vrot.slane %v2545_v32, 5  ;;  %v1866_v52 = vrot.slane %v2446_v30, 9 }
  0xc9   : > { %v861_v51 = vrot.slane %v860_v58, 4  ;;  %v1180_v60 = vrot.slane %v1178_v44, 5  ;;  %v1101_v32 = vpack.c.b16 %v679_v39, %v678_v7  ;;  %v1098_v17 = vunpack.c.l.b16 %v2563_v53  ;;  %v564_v53 = vpop.permute.xlu2 %563 }
  0xca   : > { %v1176_v1 = vrot.slane %v1175_v47, 4  ;;  %v993_v2 = vsel %vm2419_vm8, %v1866_v52, %v992_v48  ;;  %v1280_v59 = vpack.c.b16 %v1011_v56, %v1010_v37  ;;  %v2123_v30 = vmov 0.0  }
  0xcb   : > { %v866_v55 = vsel %vm2427_vm9, %v861_v51, %v865_v14  ;;  %v1015_v4 = vunpack.c.l.b16 %v993_v2  ;;  %v1102_v7 = vpack.c.b16 %v1098_v17, %v680_v40  ;;  %647 = vst.msk [vmem:[#allocation2] sm:$0xff] %vm606_vm2, %v2123_v30  ;;  %v383_v40 = vld [vmem:[%s2282_s10 + $0x90] sm:$0xff]  ;;  %s1837_s10 = sshll.u32 %s2858_s18, 3 }
  0xcc   : > { %v885_v3 = vunpack.c.l.b16 %v866_v55  ;;  %v1181_v54 = vsel %vm2427_vm9, %v1176_v1, %v1180_v60  ;;  %648 = vst.msk [vmem:[#allocation2 + $0x8] sm:$0xff] %vm606_vm2, %v2123_v30  ;;  %s353_s9 = sadd.s32 %s1838_s8, %s1837_s10 }
  0xcd   : > { %1885 = vmatmul.msk.bf16.gmra.mxu3 %vm690_vm3, %v1100_v20  ;;  %v2625_v12 = vunpack.c.l.b16 %v1181_v54  ;;  %v1020_v18 = vpack.c.b16 %v1016_v36, %v1015_v4  ;;  %649 = vst.msk [vmem:[#allocation2 + $0x10] sm:$0xff] %vm606_vm2, %v2123_v30  ;;  %s1839_s26 = sshll.u32 %s353_s9, 3 }
  0xce   : > { %1858 = vmatmul.msk.bf16.gmra.mxu1 %vm690_vm3, %v2589_v62  ;;  %v2619_v5 = vpack.c.b16 %v885_v3, %v884_v35  ;;  %650 = vst.msk [vmem:[#allocation2 + $0x18] sm:$0xff] %vm606_vm2, %v2123_v30  ;;  %s2751_s13 = scalar_lea.vmem %s2835_s4, %s1839_s26 }
  0xcf   : > { %1876 = vmatmul.msk.bf16.gmra.mxu2 %vm690_vm3, %v1019_v16  ;;  %v1197_v15 = vpack.c.b16 %v2625_v12, %v885_v3  ;;  %651 = vst.msk [vmem:[#allocation2 + $0x20] sm:$0xff] %vm606_vm2, %v2123_v30 }
  0xd0   : > { %652 = vst.msk [vmem:[#allocation2 + $0x28] sm:$0xff] %vm606_vm2, %v2123_v30 }
  0xd1   : > { %653 = vst.msk [vmem:[#allocation2 + $0x30] sm:$0xff] %vm606_vm2, %v2123_v30 }
  0xd2   : > { %1896 = vmatmul.msk.bf16.gmra.mxu0 %vm690_vm3, %v1196_v6  ;;  %654 = vst.msk [vmem:[#allocation2 + $0x38] sm:$0xff] %vm606_vm2, %v2123_v30  ;;  %v655_v8 = vld [vmem:[#allocation2] sm:$0xff] }
  0xd3   : > { %v656_v56 = vld [vmem:[#allocation2 + $0x8] sm:$0xff] }
  0xd4   : > { %v657_v20 = vld [vmem:[#allocation2 + $0x10] sm:$0xff] }
  0xd5   : > { %v658_v47 = vld [vmem:[#allocation2 + $0x18] sm:$0xff] }
  0xd8   : > { %v661_v54 = vld [vmem:[#allocation2 + $0x30] sm:$0xff] }
  0xdd   : > { %1886 = vmatmul.msk.bf16.gmra.mxu3 %vm690_vm3, %v1101_v32 }
  0xde   : > { %1859 = vmatmul.msk.bf16.gmra.mxu1 %vm690_vm3, %v2619_v5 }
  0xdf   : > { %1877 = vmatmul.msk.bf16.gmra.mxu2 %vm690_vm3, %v1020_v18 }
  0xe2   : > { %1897 = vmatmul.msk.bf16.gmra.mxu0 %vm690_vm3, %v1197_v15 }
  0xed   : > { %1887 = vmatmul.msk.bf16.gmra.mxu3 %vm690_vm3, %v1102_v7 }
  0xee   : > { %1905 = vmatmul.msk.bf16.vlgmr.msra.gmra.mxu1 %vm690_vm3, %v1280_v59 }
  0xef   : > { %1915 = vmatmul.msk.bf16.vlgmr.msra.gmra.mxu2 %vm690_vm3, %v2399_v33  ;;  %v1281_v33 = vpack.c.b16 %v1013_v29, %v1012_v57  ;;  %v604_v57 = vsel %vm585_vm1, %v383_v40, %v482_v24 }
  0xf2   : > { %1936 = vmatmul.msk.bf16.vlgmr.msra.gmra.mxu0 %vm690_vm3, %v2543_v31  ;;  %v605_v31 = vsel %vm585_vm1, %v384_v46, %v484_v45 }
  0xf3   : > { %v626_v26 = vsel %vm606_vm2, %v605_v31, %v564_v53 }
  0xf4   : > { %v646_v29 = vpack.c.bf16 %v626_v26, %v626_v26 }
  0xf6   : > { %v1505_v34 = vrot.slane %v646_v29, 5  ;;  %v1429_v42 = vshll.u32 %v646_v29, 16 }
  0xf8   : > { %v1431_v44 = vrot.slane %v1429_v42, 5 }
  0xfd   : > { %1925 = vmatmul.msk.bf16.vlgmr.msra.gmra.mxu3 %vm690_vm3, %v2537_v10  ;;  %v562_v10 = vpop.permute.xlu0 %561 }
  0xfe   : > { %1906 = vmatmul.msk.bf16.gmra.mxu1 %vm690_vm3, %v1281_v33  ;;  %v625_v25 = vsel %vm606_vm2, %v604_v57, %v562_v10  ;;  %v662_v33 = vld [vmem:[#allocation2 + $0x38] sm:$0xff] }
  0xff   : > { %1916 = vmatmul.msk.bf16.gmra.mxu2 %vm690_vm3, %v2383_v21  ;;  %v1282_v21 = vpack.c.b16 %v1015_v4, %v1014_v27  ;;  %v645_v28 = vpack.c.bf16 %v625_v25, %v625_v25 }
 0x101   : > { %v1420_v49 = vshrl.u32 %v645_v28, 16  ;;  %v1423_v27 = vshll.u32 %v645_v28, 16  ;;  %v1929_v9 = vrot.slane %v645_v28, 9  ;;  %v1361_v35 = vunpack.c.l.b16 %v645_v28 }
 0x102   : > { %1937 = vmatmul.msk.bf16.gmra.mxu0 %vm690_vm3, %v1019_v16  ;;  %v659_v16 = vld [vmem:[#allocation2 + $0x20] sm:$0xff] }
 0x103   : > { %v716_v37 = vpop.f32.mrf.mxu0  ;;  %v1422_v11 = vrot.slane %v1420_v49, 4  ;;  %v1425_v13 = vrot.slane %v1423_v27, 5  ;;  %v1362_v43 = vpack.c.b16 %v1361_v35, %v1098_v17 }
 0x104   : > { %v736_v39 = vadd.f32 %v716_v37, %v655_v8 }
 0x105   : > { %v1426_v58 = vor.u32 %v1425_v13, %v1422_v11 }
 0x106   : > { %744 = vst.msk [vmem:[#allocation2] sm:$0xff] %vm606_vm2, %v736_v39 }
 0x107   : > { %v1427_v48 = vrot.slane %v1426_v58, 4 }
 0x109   : > { %v1432_v60 = vsel %vm2427_vm9, %v1427_v48, %v1431_v44 }
 0x10a   : > { %v1444_v2 = vunpack.c.l.b16 %v1432_v60 }
 0x10b   : > { %v718_v19 = vpop.f32.mrf.mxu0 }
 0x10c   : > { %v737_v23 = vadd.f32 %v718_v19, %v656_v56  ;;  %v1445_v4 = vpack.c.b16 %v1444_v2, %v2625_v12 }
 0x10d   : > { %1926 = vmatmul.msk.bf16.gmra.mxu3 %vm690_vm3, %v2589_v62  ;;  %v1506_v62 = vsel %vm2419_vm8, %v1929_v9, %v1505_v34  ;;  %v867_v0 = vld [vmem:[#allocation2] sm:$0xff] }
 0x10e   : > { %1907 = vmatmul.msk.bf16.gmra.mxu1 %vm690_vm3, %v1282_v21  ;;  %745 = vst.msk [vmem:[#allocation2 + $0x8] sm:$0xff] %vm606_vm2, %v737_v23 }
 0x10f   : > { %1917 = vmatmul.msk.bf16.gmra.mxu2 %vm690_vm3, %v2468_v50  ;;  %v1518_v50 = vunpack.c.l.b16 %v1506_v62 }
 0x111   : > { %v1519_v14 = vpack.c.b16 %v1518_v50, %v1279_v38 }
 0x112   : > { %1938 = vmatmul.msk.bf16.gmra.mxu0 %vm690_vm3, %v1020_v18 }
 0x115   : > { %v868_v15 = vld [vmem:[#allocation2 + $0x8] sm:$0xff] }
 0x11a   : > { %v721_v36 = vpop.f32.mrf.mxu1 }
 0x11b   : > { %v738_v41 = vadd.f32 %v721_v36, %v657_v20 }
 0x11d   : > { %746 = vst.msk [vmem:[#allocation2 + $0x10] sm:$0xff] %vm606_vm2, %v738_v41  ;;  %1927 = vmatmul.msk.bf16.gmra.mxu3 %vm690_vm3, %v2619_v5 }
 0x11e   : > { %1908 = vmatmul.msk.bf16.gmra.mxu1 %vm690_vm3, %v2607_v63  ;;  %v660_v63 = vld [vmem:[#allocation2 + $0x28] sm:$0xff] }
 0x11f   : > { %1918 = vmatmul.msk.bf16.gmra.mxu2 %vm690_vm3, %v1362_v43  ;;  %v726_v6 = vpop.f32.mrf.mxu2 }
 0x120   : > { %v740_v61 = vadd.f32 %v726_v6, %v659_v16 }
 0x122   : > { %748 = vst.msk [vmem:[#allocation2 + $0x20] sm:$0xff] %vm606_vm2, %v740_v61  ;;  %1939 = vmatmul.msk.bf16.gmra.mxu0 %vm690_vm3, %v1519_v14  ;;  %v723_v51 = vpop.f32.mrf.mxu1 }
 0x123   : > { %v739_v52 = vadd.f32 %v723_v51, %v658_v47 }
 0x124   : > { %v869_v39 = vld [vmem:[#allocation2 + $0x10] sm:$0xff] }
 0x125   : > { %747 = vst.msk [vmem:[#allocation2 + $0x18] sm:$0xff] %vm606_vm2, %v739_v52 }
 0x127   : > { %v728_v55 = vpop.f32.mrf.mxu2 }
 0x128   : > { %v741_v1 = vadd.f32 %v728_v55, %v660_v63 }
 0x129   : > { %v871_v11 = vld [vmem:[#allocation2 + $0x20] sm:$0xff] }
 0x12a   : > { %749 = vst.msk [vmem:[#allocation2 + $0x28] sm:$0xff] %vm606_vm2, %v741_v1 }
 0x12b   : > { %v919_v38 = vpop.f32.mrf.mxu1 }
 0x12c   : > { %v939_v3 = vadd.f32 %v919_v38, %v867_v0  ;;  %v870_v19 = vld [vmem:[#allocation2 + $0x18] sm:$0xff] }
 0x12d   : > { %1928 = vmatmul.msk.bf16.gmra.mxu3 %vm690_vm3, %v1445_v4 }
 0x12e   : > { %947 = vst.msk [vmem:[#allocation2] sm:$0xff] %vm606_vm2, %v939_v3 }
 0x12f   : > { %v1227_v5 = vpop.f32.mrf.mxu0 }
 0x130   : > { %v731_v22 = vpop.f32.mrf.mxu3 }
 0x131   : > { %v742_v32 = vadd.f32 %v731_v22, %v661_v54  ;;  %v872_v58 = vld [vmem:[#allocation2 + $0x28] sm:$0xff] }
 0x132   : > { %v1050_v18 = vpop.f32.mrf.mxu2 }
 0x133   : > { %v921_v17 = vpop.f32.mrf.mxu1  ;;  %750 = vst.msk [vmem:[#allocation2 + $0x30] sm:$0xff] %vm606_vm2, %v742_v32 }
 0x134   : > { %v940_v59 = vadd.f32 %v921_v17, %v868_v15 }
 0x135   : > { %v998_v7 = vld [vmem:[#allocation2] sm:$0xff] }
 0x136   : > { %v1070_v30 = vadd.f32 %v1050_v18, %v998_v7  ;;  %948 = vst.msk [vmem:[#allocation2 + $0x8] sm:$0xff] %vm606_vm2, %v940_v59 }
 0x137   : > { %v1229_v12 = vpop.f32.mrf.mxu0 }
 0x138   : > { %1078 = vst.msk [vmem:[#allocation2] sm:$0xff] %vm606_vm2, %v1070_v30  ;;  %v733_v24 = vpop.f32.mrf.mxu3 }
 0x139   : > { %v743_v8 = vadd.f32 %v733_v24, %v662_v33 }
 0x13a   : > { %v1052_v37 = vpop.f32.mrf.mxu2  ;;  %v873_v1 = vld [vmem:[#allocation2 + $0x30] sm:$0xff] }
 0x13b   : > { %v924_v40 = vpop.f32.mrf.mxu1  ;;  %751 = vst.msk [vmem:[#allocation2 + $0x38] sm:$0xff] %vm606_vm2, %v743_v8 }
 0x13c   : > { %v941_v45 = vadd.f32 %v924_v40, %v869_v39 }
 0x13d   : > { %v999_v46 = vld [vmem:[#allocation2 + $0x8] sm:$0xff] }
 0x13e   : > { %v1071_v56 = vadd.f32 %v1052_v37, %v999_v46  ;;  %949 = vst.msk [vmem:[#allocation2 + $0x10] sm:$0xff] %vm606_vm2, %v941_v45 }
 0x13f   : > { %v1232_v57 = vpop.f32.mrf.mxu0  ;;  %v1086_v31 = vld [vmem:[#allocation2] sm:$0xff] }
 0x140   : > { %1079 = vst.msk [vmem:[#allocation2 + $0x8] sm:$0xff] %vm606_vm2, %v1071_v56  ;;  %v1132_v10 = vpop.f32.mrf.mxu3 }
 0x141   : > { %v1152_v21 = vadd.f32 %v1132_v10, %v1086_v31 }
 0x142   : > { %v1055_v53 = vpop.f32.mrf.mxu2  ;;  %v874_v17 = vld [vmem:[#allocation2 + $0x38] sm:$0xff] }
 0x143   : > { %v926_v23 = vpop.f32.mrf.mxu1  ;;  %1160 = vst.msk [vmem:[#allocation2] sm:$0xff] %vm606_vm2, %v1152_v21 }
 0x144   : > { %v942_v25 = vadd.f32 %v926_v23, %v870_v19 }
 0x145   : > { %v1000_v26 = vld [vmem:[#allocation2 + $0x10] sm:$0xff] }
 0x146   : > { %v1072_v28 = vadd.f32 %v1055_v53, %v1000_v26  ;;  %950 = vst.msk [vmem:[#allocation2 + $0x18] sm:$0xff] %vm606_vm2, %v942_v25 }
 0x147   : > { %v1087_v29 = vld [vmem:[#allocation2 + $0x8] sm:$0xff]  ;;  %v1234_v34 = vpop.f32.mrf.mxu0 }
 0x148   : > { %1080 = vst.msk [vmem:[#allocation2 + $0x10] sm:$0xff] %vm606_vm2, %v1072_v28  ;;  %v1134_v49 = vpop.f32.mrf.mxu3 }
 0x149   : > { %v1153_v9 = vadd.f32 %v1134_v49, %v1087_v29 }
 0x14a   : > { %v1057_v27 = vpop.f32.mrf.mxu2  ;;  %v1182_v35 = vld [vmem:[#allocation2] sm:$0xff] }
 0x14b   : > { %v929_v13 = vpop.f32.mrf.mxu1  ;;  %1161 = vst.msk [vmem:[#allocation2 + $0x8] sm:$0xff] %vm606_vm2, %v1153_v9  ;;  %v1247_v36 = vadd.f32 %v1227_v5, %v1182_v35 }
 0x14c   : > { %v943_v20 = vadd.f32 %v929_v13, %v871_v11 }
 0x14d   : > { %v1001_v62 = vld [vmem:[#allocation2 + $0x18] sm:$0xff]  ;;  %1255 = vst.msk [vmem:[#allocation2] sm:$0xff] %vm606_vm2, %v1247_v36 }
 0x14e   : > { %v1073_v41 = vadd.f32 %v1057_v27, %v1001_v62  ;;  %951 = vst.msk [vmem:[#allocation2 + $0x20] sm:$0xff] %vm606_vm2, %v943_v20 }
 0x14f   : > { %v1088_v50 = vld [vmem:[#allocation2 + $0x10] sm:$0xff]  ;;  %v1237_v61 = vpop.f32.mrf.mxu0 }
 0x150   : > { %1081 = vst.msk [vmem:[#allocation2 + $0x18] sm:$0xff] %vm606_vm2, %v1073_v41  ;;  %v1137_v42 = vpop.f32.mrf.mxu3 }
 0x151   : > { %v1154_v16 = vadd.f32 %v1137_v42, %v1088_v50 }
 0x152   : > { %v1060_v43 = vpop.f32.mrf.mxu2  ;;  %v1183_v44 = vld [vmem:[#allocation2 + $0x8] sm:$0xff] }
 0x153   : > { %v931_v6 = vpop.f32.mrf.mxu1  ;;  %1162 = vst.msk [vmem:[#allocation2 + $0x10] sm:$0xff] %vm606_vm2, %v1154_v16  ;;  %v1248_v48 = vadd.f32 %v1229_v12, %v1183_v44 }
 0x154   : > { %v944_v14 = vadd.f32 %v931_v6, %v872_v58  ;;  %v1268_v46 = vld [vmem:[#allocation2] sm:$0xff] }
 0x155   : > { %v1002_v47 = vld [vmem:[#allocation2 + $0x20] sm:$0xff]  ;;  %1256 = vst.msk [vmem:[#allocation2 + $0x8] sm:$0xff] %vm606_vm2, %v1248_v48 }
 0x156   : > { %v1074_v51 = vadd.f32 %v1060_v43, %v1002_v47  ;;  %952 = vst.msk [vmem:[#allocation2 + $0x28] sm:$0xff] %vm606_vm2, %v944_v14 }
 0x157   : > { %v1089_v52 = vld [vmem:[#allocation2 + $0x18] sm:$0xff]  ;;  %v1239_v5 = vpop.f32.mrf.mxu0 }
 0x158   : > { %1082 = vst.msk [vmem:[#allocation2 + $0x20] sm:$0xff] %vm606_vm2, %v1074_v51  ;;  %v1139_v63 = vpop.f32.mrf.mxu3 }
 0x159   : > { %v1155_v55 = vadd.f32 %v1139_v63, %v1089_v52 }
 0x15a   : > { %v1062_v60 = vpop.f32.mrf.mxu2  ;;  %v1184_v38 = vld [vmem:[#allocation2 + $0x10] sm:$0xff] }
 0x15b   : > { %v934_v2 = vpop.f32.mrf.mxu1  ;;  %1163 = vst.msk [vmem:[#allocation2 + $0x18] sm:$0xff] %vm606_vm2, %v1155_v55  ;;  %v1249_v4 = vadd.f32 %v1232_v57, %v1184_v38 }
 0x15c   : > { %v945_v0 = vadd.f32 %v934_v2, %v873_v1  ;;  %v1269_v29 = vld [vmem:[#allocation2 + $0x8] sm:$0xff] }
 0x15d   : > { %v1003_v3 = vld [vmem:[#allocation2 + $0x28] sm:$0xff]  ;;  %1257 = vst.msk [vmem:[#allocation2 + $0x10] sm:$0xff] %vm606_vm2, %v1249_v4 }
 0x15e   : > { %v1075_v54 = vadd.f32 %v1062_v60, %v1003_v3  ;;  %953 = vst.msk [vmem:[#allocation2 + $0x30] sm:$0xff] %vm606_vm2, %v945_v0 }
 0x15f   : > { %v1090_v22 = vld [vmem:[#allocation2 + $0x20] sm:$0xff]  ;;  %v1242_v8 = vpop.f32.mrf.mxu0 }
 0x160   : > { %1083 = vst.msk [vmem:[#allocation2 + $0x28] sm:$0xff] %vm606_vm2, %v1075_v54  ;;  %v1142_v32 = vpop.f32.mrf.mxu3 }
 0x161   : > { %v1156_v15 = vadd.f32 %v1142_v32, %v1090_v22 }
 0x162   : > { %v1065_v18 = vpop.f32.mrf.mxu2  ;;  %v1185_v30 = vld [vmem:[#allocation2 + $0x18] sm:$0xff] }
 0x163   : > { %v936_v59 = vpop.f32.mrf.mxu1  ;;  %1164 = vst.msk [vmem:[#allocation2 + $0x20] sm:$0xff] %vm606_vm2, %v1156_v15  ;;  %v1250_v12 = vadd.f32 %v1234_v34, %v1185_v30 }
 0x164   : > { %v946_v7 = vadd.f32 %v936_v59, %v874_v17  ;;  %v1270_v41 = vld [vmem:[#allocation2 + $0x10] sm:$0xff] }
 0x165   : > { %v1004_v33 = vld [vmem:[#allocation2 + $0x30] sm:$0xff]  ;;  %1258 = vst.msk [vmem:[#allocation2 + $0x18] sm:$0xff] %vm606_vm2, %v1250_v12 }
 0x166   : > { %v1076_v24 = vadd.f32 %v1065_v18, %v1004_v33  ;;  %954 = vst.msk [vmem:[#allocation2 + $0x38] sm:$0xff] %vm606_vm2, %v946_v7 }
 0x167   : > { %v1091_v37 = vld [vmem:[#allocation2 + $0x28] sm:$0xff]  ;;  %v1244_v25 = vpop.f32.mrf.mxu0 }
 0x168   : > { %1084 = vst.msk [vmem:[#allocation2 + $0x30] sm:$0xff] %vm606_vm2, %v1076_v24  ;;  %v1144_v39 = vpop.f32.mrf.mxu3 }
 0x169   : > { %v1157_v45 = vadd.f32 %v1144_v39, %v1091_v37 }
 0x16a   : > { %v1067_v40 = vpop.f32.mrf.mxu2  ;;  %v1186_v31 = vld [vmem:[#allocation2 + $0x20] sm:$0xff] }
 0x16b   : > { %v1313_v56 = vpop.f32.mrf.mxu1  ;;  %1165 = vst.msk [vmem:[#allocation2 + $0x28] sm:$0xff] %vm606_vm2, %v1157_v45  ;;  %v1251_v53 = vadd.f32 %v1237_v61, %v1186_v31 }
 0x16c   : > { %v1333_v57 = vadd.f32 %v1313_v56, %v1268_v46  ;;  %v1271_v51 = vld [vmem:[#allocation2 + $0x18] sm:$0xff] }
 0x16d   : > { %v1005_v10 = vld [vmem:[#allocation2 + $0x38] sm:$0xff]  ;;  %1259 = vst.msk [vmem:[#allocation2 + $0x20] sm:$0xff] %vm606_vm2, %v1251_v53 }
 0x16e   : > { %v1077_v21 = vadd.f32 %v1067_v40, %v1005_v10  ;;  %1341 = vst.msk [vmem:[#allocation2] sm:$0xff] %vm606_vm2, %v1333_v57 }
 0x16f   : > { %v1092_v19 = vld [vmem:[#allocation2 + $0x30] sm:$0xff]  ;;  %v1540_v42 = vpop.f32.mrf.mxu0 }
 0x170   : > { %1085 = vst.msk [vmem:[#allocation2 + $0x38] sm:$0xff] %vm606_vm2, %v1077_v21  ;;  %v1147_v23 = vpop.f32.mrf.mxu3 }
 0x171   : > { %v1158_v26 = vadd.f32 %v1147_v23, %v1092_v19 }
 0x172   : > { %v1383_v28 = vpop.f32.mrf.mxu2  ;;  %v1187_v9 = vld [vmem:[#allocation2 + $0x28] sm:$0xff] }
 0x173   : > { %v1315_v49 = vpop.f32.mrf.mxu1  ;;  %1166 = vst.msk [vmem:[#allocation2 + $0x30] sm:$0xff] %vm606_vm2, %v1158_v26  ;;  %v1252_v11 = vadd.f32 %v1239_v5, %v1187_v9 }
 0x174   : > { %v1334_v27 = vadd.f32 %v1315_v49, %v1269_v29  ;;  %v1272_v22 = vld [vmem:[#allocation2 + $0x20] sm:$0xff] }
 0x175   : > { %v1349_v34 = vld [vmem:[#allocation2] sm:$0xff]  ;;  %1260 = vst.msk [vmem:[#allocation2 + $0x28] sm:$0xff] %vm606_vm2, %v1252_v11 }
 0x176   : > { %v1403_v13 = vadd.f32 %v1383_v28, %v1349_v34  ;;  %1342 = vst.msk [vmem:[#allocation2 + $0x8] sm:$0xff] %vm606_vm2, %v1334_v27 }
 0x177   : > { %v1093_v20 = vld [vmem:[#allocation2 + $0x38] sm:$0xff]  ;;  %v1542_v2 = vpop.f32.mrf.mxu0 }
 0x178   : > { %1411 = vst.msk [vmem:[#allocation2] sm:$0xff] %vm606_vm2, %v1403_v13  ;;  %v1149_v35 = vpop.f32.mrf.mxu3 }
 0x179   : > { %v1159_v62 = vadd.f32 %v1149_v35, %v1093_v20 }
 0x17a   : > { %v1385_v36 = vpop.f32.mrf.mxu2  ;;  %v1188_v16 = vld [vmem:[#allocation2 + $0x30] sm:$0xff] }
 0x17b   : > { %v1318_v50 = vpop.f32.mrf.mxu1  ;;  %1167 = vst.msk [vmem:[#allocation2 + $0x38] sm:$0xff] %vm606_vm2, %v1159_v62  ;;  %v1253_v6 = vadd.f32 %v1242_v8, %v1188_v16 }
 0x17c   : > { %v1335_v43 = vadd.f32 %v1318_v50, %v1270_v41  ;;  %v1273_v37 = vld [vmem:[#allocation2 + $0x28] sm:$0xff] }
 0x17d   : > { %v1350_v58 = vld [vmem:[#allocation2 + $0x8] sm:$0xff]  ;;  %1261 = vst.msk [vmem:[#allocation2 + $0x30] sm:$0xff] %vm606_vm2, %v1253_v6 }
 0x17e   : > { %v1404_v61 = vadd.f32 %v1385_v36, %v1350_v58  ;;  %1343 = vst.msk [vmem:[#allocation2 + $0x10] sm:$0xff] %vm606_vm2, %v1335_v43 }
 0x17f   : > { %v1433_v14 = vld [vmem:[#allocation2] sm:$0xff]  ;;  %v1545_v7 = vpop.f32.mrf.mxu0 }
 0x180   : > { %1412 = vst.msk [vmem:[#allocation2 + $0x8] sm:$0xff] %vm606_vm2, %v1404_v61  ;;  %v1466_v44 = vpop.f32.mrf.mxu3 }
 0x181   : > { %v1486_v48 = vadd.f32 %v1466_v44, %v1433_v14 }
 0x182   : > { %v1388_v47 = vpop.f32.mrf.mxu2  ;;  %v1189_v60 = vld [vmem:[#allocation2 + $0x38] sm:$0xff] }
 0x183   : > { %v1320_v52 = vpop.f32.mrf.mxu1  ;;  %1494 = vst.msk [vmem:[#allocation2] sm:$0xff] %vm606_vm2, %v1486_v48  ;;  %v1254_v1 = vadd.f32 %v1244_v25, %v1189_v60 }
 0x184   : > { %v1336_v63 = vadd.f32 %v1320_v52, %v1271_v51  ;;  %v1274_v25 = vld [vmem:[#allocation2 + $0x30] sm:$0xff] }
 0x185   : > { %v1351_v55 = vld [vmem:[#allocation2 + $0x10] sm:$0xff]  ;;  %1262 = vst.msk [vmem:[#allocation2 + $0x38] sm:$0xff] %vm606_vm2, %v1254_v1 }
 0x186   : > { %v1405_v0 = vadd.f32 %v1388_v47, %v1351_v55  ;;  %1344 = vst.msk [vmem:[#allocation2 + $0x18] sm:$0xff] %vm606_vm2, %v1336_v63 }
 0x187   : > { %v1434_v38 = vld [vmem:[#allocation2 + $0x8] sm:$0xff]  ;;  %v1547_v53 = vpop.f32.mrf.mxu0 }
 0x188   : > { %1413 = vst.msk [vmem:[#allocation2 + $0x10] sm:$0xff] %vm606_vm2, %v1405_v0  ;;  %v1468_v3 = vpop.f32.mrf.mxu3 }
 0x189   : > { %v1487_v54 = vadd.f32 %v1468_v3, %v1434_v38 }
 0x18a   : > { %v1390_v4 = vpop.f32.mrf.mxu2  ;;  %v1507_v5 = vld [vmem:[#allocation2] sm:$0xff] }
 0x18b   : > { %v1323_v32 = vpop.f32.mrf.mxu1  ;;  %v1560_v18 = vadd.f32 %v1540_v42, %v1507_v5  ;;  %1495 = vst.msk [vmem:[#allocation2 + $0x8] sm:$0xff] %vm606_vm2, %v1487_v54 }
 0x18c   : > { %v1337_v15 = vadd.f32 %v1323_v32, %v1272_v22  ;;  %v1275_v35 = vld [vmem:[#allocation2 + $0x38] sm:$0xff] }
 0x18d   : > { %v1352_v17 = vld [vmem:[#allocation2 + $0x18] sm:$0xff]  ;;  %1568 = vst.msk [vmem:[#allocation2] sm:$0xff] %vm606_vm2, %v1560_v18 }
 0x18e   : > { %v1406_v59 = vadd.f32 %v1390_v4, %v1352_v17  ;;  %1345 = vst.msk [vmem:[#allocation2 + $0x20] sm:$0xff] %vm606_vm2, %v1337_v15 }
 0x18f   : > { %v1435_v30 = vld [vmem:[#allocation2 + $0x10] sm:$0xff]  ;;  %v1550_v42 = vpop.f32.mrf.mxu0 }
 0x190   : > { %1414 = vst.msk [vmem:[#allocation2 + $0x18] sm:$0xff] %vm606_vm2, %v1406_v59  ;;  %v1471_v33 = vpop.f32.mrf.mxu3 }
 0x191   : > { %v1488_v24 = vadd.f32 %v1471_v33, %v1435_v30 }
 0x192   : > { %v1393_v12 = vpop.f32.mrf.mxu2  ;;  %v1508_v8 = vld [vmem:[#allocation2 + $0x8] sm:$0xff] }
 0x193   : > { %v1325_v39 = vpop.f32.mrf.mxu1  ;;  %v1561_v40 = vadd.f32 %v1542_v2, %v1508_v8  ;;  %1496 = vst.msk [vmem:[#allocation2 + $0x10] sm:$0xff] %vm606_vm2, %v1488_v24 }
 0x194   : > { %v1338_v45 = vadd.f32 %v1325_v39, %v1273_v37  ;;  %v2754_v46 = vld [vmem:[#allocation2] sm:$0xff] }
 0x195   : > { %1584 = vst.msk [vmem:[%s2751_s13] sm:$0xff] %vm606_vm2, %v2754_v46  ;;  %v1353_v56 = vld [vmem:[#allocation2 + $0x20] sm:$0xff]  ;;  %v1615_v59 = vmul.f32 %v2754_v46, %v2754_v46  ;;  %v1592_v33 = vsel %vm606_vm2, %v2754_v46, 0.0 }
 0x196   : > { %1569 = vst.msk [vmem:[#allocation2 + $0x8] sm:$0xff] %vm606_vm2, %v1561_v40  ;;  %v1407_v57 = vadd.f32 %v1393_v12, %v1353_v56 }
 0x197   : > { %1346 = vst.msk [vmem:[#allocation2 + $0x28] sm:$0xff] %vm606_vm2, %v1338_v45  ;;  %v1436_v31 = vld [vmem:[#allocation2 + $0x18] sm:$0xff]  ;;  %v1552_v51 = vpop.f32.mrf.mxu0  ;;  %v1623_v56 = vsel %vm606_vm2, %v1615_v59, 0.0 }
 0x198   : > { %1415 = vst.msk [vmem:[#allocation2 + $0x20] sm:$0xff] %vm606_vm2, %v1407_v57  ;;  %v1473_v10 = vpop.f32.mrf.mxu3 }
 0x199   : > { %v1489_v21 = vadd.f32 %v1473_v10, %v1436_v31 }
 0x19a   : > { %v1509_v19 = vld [vmem:[#allocation2 + $0x10] sm:$0xff]  ;;  %v1395_v23 = vpop.f32.mrf.mxu2 }
 0x19b   : > { %v1328_v26 = vpop.f32.mrf.mxu1  ;;  %v1562_v28 = vadd.f32 %v1545_v7, %v1509_v19  ;;  %1497 = vst.msk [vmem:[#allocation2 + $0x18] sm:$0xff] %vm606_vm2, %v1489_v21 }
 0x19c   : > { %v1339_v29 = vadd.f32 %v1328_v26, %v1274_v25 }
 0x19d   : > { %v1577_v49 = vld [vmem:[#allocation2 + $0x8] sm:$0xff]  ;;  %1570 = vst.msk [vmem:[#allocation2 + $0x10] sm:$0xff] %vm606_vm2, %v1562_v28 }
 0x19e   : > { %1585 = vst.msk [vmem:[%s2751_s13 + $0x8] sm:$0xff] %vm606_vm2, %v1577_v49  ;;  %v1354_v27 = vld [vmem:[#allocation2 + $0x28] sm:$0xff]  ;;  %v1616_v17 = vmul.f32 %v1577_v49, %v1577_v49  ;;  %v1593_v7 = vsel %vm606_vm2, %v1577_v49, 0.0 }
 0x19f   : > { %v1408_v9 = vadd.f32 %v1395_v23, %v1354_v27  ;;  %1347 = vst.msk [vmem:[#allocation2 + $0x30] sm:$0xff] %vm606_vm2, %v1339_v29  ;;  %v1437_v34 = vld [vmem:[#allocation2 + $0x20] sm:$0xff]  ;;  %v1555_v4 = vpop.f32.mrf.mxu0  ;;  %v1594_v40 = vadd.f32 %v1593_v7, %v1592_v33 }
 0x1a0   : > { %v1476_v11 = vpop.f32.mrf.mxu3  ;;  %v1624_v12 = vsel %vm606_vm2, %v1616_v17, 0.0 }
 0x1a1   : > { %1416 = vst.msk [vmem:[#allocation2 + $0x28] sm:$0xff] %vm606_vm2, %v1408_v9  ;;  %v1490_v13 = vadd.f32 %v1476_v11, %v1437_v34  ;;  %v1625_v21 = vadd.f32 %v1624_v12, %v1623_v56 }
 0x1a2   : > { %v1510_v20 = vld [vmem:[#allocation2 + $0x18] sm:$0xff]  ;;  %v1398_v43 = vpop.f32.mrf.mxu2 }
 0x1a3   : > { %v1330_v62 = vpop.f32.mrf.mxu1  ;;  %v1563_v36 = vadd.f32 %v1547_v53, %v1510_v20  ;;  %1498 = vst.msk [vmem:[#allocation2 + $0x20] sm:$0xff] %vm606_vm2, %v1490_v13 }
 0x1a4   : > { %v1340_v41 = vadd.f32 %v1330_v62, %v1275_v35  ;;  %v1578_v50 = vld [vmem:[#allocation2 + $0x10] sm:$0xff] }
 0x1a5   : > { %1586 = vst.msk [vmem:[%s2751_s13 + $0x10] sm:$0xff] %vm606_vm2, %v1578_v50  ;;  %v1617_v30 = vmul.f32 %v1578_v50, %v1578_v50  ;;  %v1595_v24 = vsel %vm606_vm2, %v1578_v50, 0.0 }
 0x1a6   : > { %1571 = vst.msk [vmem:[#allocation2 + $0x18] sm:$0xff] %vm606_vm2, %v1563_v36  ;;  %v1355_v16 = vld [vmem:[#allocation2 + $0x30] sm:$0xff]  ;;  %v1596_v19 = vadd.f32 %v1595_v24, %v1594_v40 }
 0x1a7   : > { %v1409_v58 = vadd.f32 %v1398_v43, %v1355_v16  ;;  %1348 = vst.msk [vmem:[#allocation2 + $0x38] sm:$0xff] %vm606_vm2, %v1340_v41  ;;  %v1557_v37 = vpop.f32.mrf.mxu0  ;;  %v1626_v57 = vsel %vm606_vm2, %v1617_v30, 0.0 }
 0x1a8   : > { %v1438_v6 = vld [vmem:[#allocation2 + $0x28] sm:$0xff]  ;;  %v1478_v61 = vpop.f32.mrf.mxu3  ;;  %v1627_v26 = vadd.f32 %v1626_v57, %v1625_v21 }
 0x1a9   : > { %1417 = vst.msk [vmem:[#allocation2 + $0x30] sm:$0xff] %vm606_vm2, %v1409_v58  ;;  %v1491_v14 = vadd.f32 %v1478_v61, %v1438_v6 }
 0x1aa   : > { %v1511_v44 = vld [vmem:[#allocation2 + $0x20] sm:$0xff]  ;;  %v1400_v63 = vpop.f32.mrf.mxu2 }
 0x1ab   : > { %v1564_v47 = vadd.f32 %v1550_v42, %v1511_v44  ;;  %1499 = vst.msk [vmem:[#allocation2 + $0x28] sm:$0xff] %vm606_vm2, %v1491_v14 }
 0x1ad   : > { %v1579_v48 = vld [vmem:[#allocation2 + $0x18] sm:$0xff]  ;;  %1572 = vst.msk [vmem:[#allocation2 + $0x20] sm:$0xff] %vm606_vm2, %v1564_v47 }
 0x1ae   : > { %1587 = vst.msk [vmem:[%s2751_s13 + $0x18] sm:$0xff] %vm606_vm2, %v1579_v48  ;;  %v1356_v52 = vld [vmem:[#allocation2 + $0x38] sm:$0xff]  ;;  %v1618_v8 = vmul.f32 %v1579_v48, %v1579_v48  ;;  %v1597_v31 = vsel %vm606_vm2, %v1579_v48, 0.0 }
 0x1af   : > { %v1410_v60 = vadd.f32 %v1400_v63, %v1356_v52  ;;  %v1598_v28 = vadd.f32 %v1597_v31, %v1596_v19 }
 0x1b0   : > { %v1439_v55 = vld [vmem:[#allocation2 + $0x30] sm:$0xff]  ;;  %v1481_v1 = vpop.f32.mrf.mxu3  ;;  %v1628_v46 = vsel %vm606_vm2, %v1618_v8, 0.0 }
 0x1b1   : > { %1418 = vst.msk [vmem:[#allocation2 + $0x38] sm:$0xff] %vm606_vm2, %v1410_v60  ;;  %v1492_v2 = vadd.f32 %v1481_v1, %v1439_v55  ;;  %v1629_v9 = vadd.f32 %v1628_v46, %v1627_v26 }
 0x1b2   : > { %v1512_v0 = vld [vmem:[#allocation2 + $0x28] sm:$0xff] }
 0x1b3   : > { %v1565_v38 = vadd.f32 %v1552_v51, %v1512_v0  ;;  %1500 = vst.msk [vmem:[#allocation2 + $0x30] sm:$0xff] %vm606_vm2, %v1492_v2 }
 0x1b4   : > { %v1580_v3 = vld [vmem:[#allocation2 + $0x20] sm:$0xff] }
 0x1b5   : > { %1588 = vst.msk [vmem:[%s2751_s13 + $0x20] sm:$0xff] %vm606_vm2, %v1580_v3  ;;  %v1619_v10 = vmul.f32 %v1580_v3, %v1580_v3  ;;  %v1599_v23 = vsel %vm606_vm2, %v1580_v3, 0.0 }
 0x1b6   : > { %1573 = vst.msk [vmem:[#allocation2 + $0x28] sm:$0xff] %vm606_vm2, %v1565_v38  ;;  %v1600_v34 = vadd.f32 %v1599_v23, %v1598_v28 }
 0x1b7   : > { %v1630_v29 = vsel %vm606_vm2, %v1619_v10, 0.0 }
 0x1b8   : > { %v1440_v54 = vld [vmem:[#allocation2 + $0x38] sm:$0xff]  ;;  %v1483_v5 = vpop.f32.mrf.mxu3  ;;  %v1631_v20 = vadd.f32 %v1630_v29, %v1629_v9 }
 0x1b9   : > { %v1493_v22 = vadd.f32 %v1483_v5, %v1440_v54 }
 0x1ba   : > { %v1513_v32 = vld [vmem:[#allocation2 + $0x30] sm:$0xff] }
 0x1bb   : > { %v1566_v18 = vadd.f32 %v1555_v4, %v1513_v32  ;;  %1501 = vst.msk [vmem:[#allocation2 + $0x38] sm:$0xff] %vm606_vm2, %v1493_v22 }
 0x1bd   : > { %v1581_v15 = vld [vmem:[#allocation2 + $0x28] sm:$0xff]  ;;  %1574 = vst.msk [vmem:[#allocation2 + $0x30] sm:$0xff] %vm606_vm2, %v1566_v18 }
 0x1be   : > { %1589 = vst.msk [vmem:[%s2751_s13 + $0x28] sm:$0xff] %vm606_vm2, %v1581_v15  ;;  %v1620_v25 = vmul.f32 %v1581_v15, %v1581_v15  ;;  %v1601_v49 = vsel %vm606_vm2, %v1581_v15, 0.0 }
 0x1bf   : > { %v1602_v35 = vadd.f32 %v1601_v49, %v1600_v34 }
 0x1c0   : > { %v1632_v11 = vsel %vm606_vm2, %v1620_v25, 0.0 }
 0x1c1   : > { %v1633_v36 = vadd.f32 %v1632_v11, %v1631_v20 }
 0x1c2   : > { %v1514_v39 = vld [vmem:[#allocation2 + $0x38] sm:$0xff] }
 0x1c3   : > { %v1567_v45 = vadd.f32 %v1557_v37, %v1514_v39 }
 0x1c4   : > { %v1582_v53 = vld [vmem:[#allocation2 + $0x30] sm:$0xff] }
 0x1c5   : > { %1590 = vst.msk [vmem:[%s2751_s13 + $0x30] sm:$0xff] %vm606_vm2, %v1582_v53  ;;  %v1621_v27 = vmul.f32 %v1582_v53, %v1582_v53  ;;  %v1603_v13 = vsel %vm606_vm2, %v1582_v53, 0.0 }
 0x1c6   : > { %1575 = vst.msk [vmem:[#allocation2 + $0x38] sm:$0xff] %vm606_vm2, %v1567_v45  ;;  %v1604_v41 = vadd.f32 %v1603_v13, %v1602_v35 }
 0x1c7   : > { %v1634_v62 = vsel %vm606_vm2, %v1621_v27, 0.0 }
 0x1c8   : > { %v1635_v16 = vadd.f32 %v1634_v62, %v1633_v36 }
 0x1cd   : > { %v1583_v50 = vld [vmem:[#allocation2 + $0x38] sm:$0xff] }
 0x1ce   : > { %1591 = vst.msk [vmem:[%s2751_s13 + $0x38] sm:$0xff] %vm606_vm2, %v1583_v50  ;;  %v1605_v42 = vsel %vm606_vm2, %v1583_v50, 0.0  ;;  %v1622_v43 = vmul.f32 %v1583_v50, %v1583_v50 }
 0x1cf   : > { %v1606_v58 = vadd.f32 %v1605_v42, %v1604_v41 }
 0x1d0   : > { %v1636_v6 = vsel %vm606_vm2, %v1622_v43, 0.0 }
 0x1d1   : > { %v1607_v61 = vrot.slane %v1606_v58, 4  ;;  %v1637_v14 = vadd.f32 %v1636_v6, %v1635_v16 }
 0x1d3   : > { %v1608_v44 = vadd.f32 %v1607_v61, %v1606_v58  ;;  %v1638_v47 = vrot.slane %v1637_v14, 4 }
 0x1d5   : > { %v1609_v48 = vrot.slane %v1608_v44, 2  ;;  %v1639_v51 = vadd.f32 %v1638_v47, %v1637_v14 }
 0x1d7   : > { %v1610_v52 = vadd.f32 %v1609_v48, %v1608_v44  ;;  %v1640_v63 = vrot.slane %v1639_v51, 2 }
 0x1d9   : > { %v1611_v60 = vrot.slane %v1610_v52, 1  ;;  %v1641_v55 = vadd.f32 %v1640_v63, %v1639_v51 }
 0x1db   : > { %v1612_v1 = vadd.f32 %v1611_v60, %v1610_v52  ;;  %v1642_v2 = vrot.slane %v1641_v55, 1 }
 0x1dd   : > { %1614 = vst.msk [vmem:[%s363_s27] sm:$0x1] %vm1613_vm10, %v1612_v1  ;;  %v1643_v0 = vadd.f32 %v1642_v2, %v1641_v55 }
 0x1df   : > { %1644 = vst.msk [vmem:[%s363_s27 + $0x1] sm:$0x1] %vm1613_vm10, %v1643_v0 }
 0x1e0 PF: > { %s16_s22 = sadd.s32 1, %s2119_s22   ;;  %s2841_s18 = smov %s2111_s20 }
 0x1e1   : > { %p13_p10 = scmp.ge.s32.totalorder %s16_s22, 18   ;;  %s2842_s19 = smov %s2115_s21 }
 0x1e2   : > { %s2843_s20 = smov %s2846_s23  ;;  %s2844_s21 = smov %s2850_s24 }
 0x1e3   :  { %15 = sbr.rel (!%p13_p10) target bundleno = 3 (0x3), region = 92 }

// kernel: conv_block_forward.6
= control target key start
LH: loop header
LB: loop body
LE: loop exit
PB: predicated region body
PF: predicated region fallthrough
CT: control target
= control target key end

     0   :  { %s2210_s18 = smov 0   ;;  %s2212_s19 = smov 0   ;;  %s2883_s0 = inlined_call_operand.vmem [shape: f32[2,10,10,10,8], index: 0, kind: input, shape index: {}, may-alias: {0,1,2}]   ;;  %s2884_s1 = inlined_call_operand.vmem [shape: f32[2,10,10,10,8], index: 1, kind: input, shape index: {}, may-alias: {0,1,2}]   ;;  %s2885_s2 = inlined_call_operand.vmem [shape: f32[2,10,10,10,8], index: 2, kind: input, shape index: {}, may-alias: {0,1,2}]   ;;  %s2886_s3 = inlined_call_operand.vmem [shape: bf16[3,3,24,8], index: 3, kind: input, shape index: {}]   ;;  %s2887_s4 = inlined_call_operand.vmem [shape: f32[2,8,8,8,8], index: 4, kind: output, shape index: {0}]   ;;  %s2888_s5 = inlined_call_operand.vmem [shape: f32[2,8,2,8], index: 5, kind: output, shape index: {1}]  }
   0x1   :  { %s2214_s20 = smov 0   ;;  %s2216_s21 = smov 0  }
   0x2   :  { %s2218_s22 = smov 0  }
   0x3 LB: > { %s25_s23 = sadd.s32 1, %s2167_s20  ;;  %s28_s24 = sadd.s32 1, %s2171_s21  ;;  %s2175_s22 = sphi %s2218_s22, %s16_s22   ;;  %s2171_s21 = sphi %s2216_s21, %s2896_s21   ;;  %s2167_s20 = sphi %s2214_s20, %s2895_s20   ;;  %s2163_s19 = sphi %s2212_s19, %s2894_s19   ;;  %s2159_s18 = sphi %s2210_s18, %s2893_s18  }
   0x4   : > { %p26_p0 = scmp.ge.s32.totalorder %s25_s23, 8  ;;  %p1878_p1 = scmp.ge.s32.totalorder %s2175_s22, 1 }
   0x5   : > { %p252_p2 = scmp.lt.s32.totalorder %s2175_s22, 17 }
   0x6   : > { %s2898_s23 = smov (%p26_p0, %s25_s23), 0  ;;  %s2900_s24 = smov (!%p26_p0, %s28_s24), %s2171_s21 }
   0x7   : > { %p253_p3 = pnand %p1878_p1, %p252_p2  ;;  %p30_p4 = scmp.ge.s32.totalorder %s2900_s24, 2 }
   0x8   : > { %p316_p5 = scmp.lt.s32.totalorder (!%p253_p3), %s2163_s19, 1  ;;  %s325_s25 = sadd.s32 (!%p253_p3), 1, %s2159_s18 }
   0x9   : > { %s2902_s24 = smov (%p30_p4, %s2900_s24), 0  ;;  %256 = sbr.rel (%p253_p3) target bundleno = 480 (0x1e0), region = 36 }
   0xa   : > { %p328_p6 = scmp.lt.s32.totalorder (!%p253_p3), %s325_s25, 9  ;;  %s336_s27 = sadd.s32 (!%p253_p3), 2, %s2159_s18 }
   0xb   : > { %p339_p7 = scmp.lt.s32.totalorder (!%p253_p3), %s336_s27, 9  ;;  %s2177_s15 = smov (!%p253_p3), 8  }
   0xc   : > { %s2178_s16 = smov (!%p253_p3), 16   ;;  %p318_p8 = scmp.lt.s32.totalorder (!%p253_p3), %s2159_s18, 9 }
   0xd   : > { %p349_p9 = scmp.lt.s32.totalorder (!%p253_p3), %s2159_s18, 7 }
   0xe   : > { %s2904_s19 = smov (!%p316_p5, %s2163_s19), 1  ;;  %s2906_s25 = smov (!%p328_p6, %s325_s25), 9  ;;  %v665_v55 = vld [vmem:[%s2886_s3 + $0x8] sm:$0xf]  ;;  %vm708_vm0 = vcmask 1043456   ;;  %v1995_v60 = vld [vmem:[%s2886_s3] sm:$0xff] }
   0xf   : > { %s2246_s26 = smul.u32 200, %s2904_s19  ;;  %s2908_s27 = smov (!%p339_p7, %s336_s27), 9  ;;  %v691_v56 = vunpack.c.l.b16 %v665_v55  ;;  %vm585_vm1 = vcmask 64512   ;;  %vm606_vm2 = vcmask 130048   ;;  %vm695_vm3 = vcmask 195584  }
  0x10   : > { %s2012_s28 = smul.u32 20, %s2906_s25  ;;  %vm757_vm4 = vsmask.f32 3328  ;;  %vm758_vm5 = vsmask.f32 7440  ;;  %vm973_vm6 = vcmask 1042432  }
  0x11   : > { %s2013_s6 = smul.u32 20, %s2908_s27  ;;  %v693_v58 = vpack.c.b16 %v691_v56, %v691_v56  ;;  %vm974_vm7 = vcmask 1046532   ;;  %vm2476_vm9 = vmor %vm757_vm4, %vm758_vm5  ;;  %s1883_s8 = sshll.u32 %s2904_s19, 6  ;;  %vm1658_vm10 = vcmask 57344  }
  0x12   : > { %s332_s29 = sadd.s32 %s2012_s28, %s2246_s26  ;;  %vm2467_vm8 = vmor %vm973_vm6, %vm974_vm7 }
  0x13   : > { %s1880_s30 = sshll.u32 %s332_s29, 3  ;;  %s343_s10 = sadd.s32 %s2013_s6, %s2246_s26  ;;  %v710_v59 = vsel %vm708_vm0, %v693_v58, 0 }
  0x14   : > { %s2253_s9 = scalar_lea.vmem %s2884_s1, %s1880_s30  ;;  %s1881_s11 = sshll.u32 %s343_s10, 3  ;;  %718 = vmatpush.bf16.msra.mxu0 %v710_v59  ;;  %2004 = vmatpush.bf16.msra.mxu1 %v710_v59 }
  0x15   : > { %v393_v0 = vld [vmem:[%s2253_s9 + $0x40] sm:$0xff]  ;;  %v395_v1 = vld [vmem:[%s2253_s9 + $0x50] sm:$0xff]  ;;  %s2263_s14 = scalar_lea.vmem %s2885_s2, %s1881_s11  ;;  %v386_v20 = vld [vmem:[%s2253_s9 + $0x8] sm:$0x3]  ;;  %2005 = vmatpush.bf16.msra.mxu2 %v710_v59  ;;  %2006 = vmatpush.bf16.msra.mxu3 %v710_v59 }
  0x16   : > { %v389_v2 = vld [vmem:[%s2253_s9 + $0x20] sm:$0xff]  ;;  %v2067_v3 = vpack.i.bf16 %v395_v1, %v393_v0  ;;  %v391_v4 = vld [vmem:[%s2253_s9 + $0x30] sm:$0xff]  ;;  %v406_v18 = vld [vmem:[%s2263_s14 + $0x8] sm:$0x3]  ;;  %s319_s17 = scalar_select %p318_p8, %s2159_s18, 9 }
  0x17   : > { %v2057_v5 = vpack.i.bf16 %v391_v4, %v389_v2  ;;  %v385_v6 = vld [vmem:[%s2253_s9] sm:$0xff]  ;;  %v387_v7 = vld [vmem:[%s2253_s9 + $0x10] sm:$0xff]  ;;  %v408_v19 = vld [vmem:[%s2263_s14 + $0x18] sm:$0x3]  ;;  %s2910_s18 = smov (!%p349_p9, %s2159_s18), 7 }
  0x18   : > { %2068 = vrot.lane.b32.xlu1 %v2067_v3, %s2177_s15  ;;  %v2077_v8 = vpack.i.bf16 %v387_v7, %v385_v6  ;;  %v413_v9 = vld [vmem:[%s2263_s14 + $0x40] sm:$0xff]  ;;  %v415_v10 = vld [vmem:[%s2263_s14 + $0x50] sm:$0xff]  ;;  %v388_v21 = vld [vmem:[%s2253_s9 + $0x18] sm:$0x3]  ;;  %v2092_v24 = vpack.i.bf16 %v408_v19, %v406_v18  ;;  %s2010_s28 = smul.u32 20, %s319_s17  ;;  %719 = vmatpush.bf16.msra.mxu0 %v1995_v60 }
  0x19   : > { %2058 = vrot.lane.b32.xlu0 %v2057_v5, %s2177_s15  ;;  %v409_v11 = vld [vmem:[%s2263_s14 + $0x20] sm:$0xff]  ;;  %v411_v12 = vld [vmem:[%s2263_s14 + $0x30] sm:$0xff]  ;;  %v2072_v15 = vpack.i.bf16 %v415_v10, %v413_v9  ;;  %v2087_v25 = vpack.i.bf16 %v388_v21, %v386_v20  ;;  %v390_v27 = vld [vmem:[%s2253_s9 + $0x28] sm:$0x3]  ;;  %2007 = vmatpush.bf16.msra.mxu1 %v1995_v60 }
  0x1a   : > { %2078 = vrot.lane.b32.xlu2 %v2077_v8, %s2177_s15  ;;  %v405_v13 = vld [vmem:[%s2263_s14] sm:$0xff]  ;;  %v407_v14 = vld [vmem:[%s2263_s14 + $0x10] sm:$0xff]  ;;  %v2062_v16 = vpack.i.bf16 %v411_v12, %v409_v11  ;;  %v392_v28 = vld [vmem:[%s2253_s9 + $0x38] sm:$0x3]  ;;  %s322_s6 = sadd.s32 %s2246_s26, %s2010_s28  ;;  %2008 = vmatpush.bf16.msra.mxu2 %v1995_v60 }
  0x1b   : > { %v2082_v17 = vpack.i.bf16 %v407_v14, %v405_v13  ;;  %v397_v22 = vld [vmem:[%s2253_s9 + $0x60] sm:$0xff]  ;;  %v399_v23 = vld [vmem:[%s2253_s9 + $0x70] sm:$0xff]  ;;  %v410_v31 = vld [vmem:[%s2263_s14 + $0x28] sm:$0x3]  ;;  %v2107_v33 = vpack.i.bf16 %v392_v28, %v390_v27  ;;  %s1879_s7 = sshll.u32 %s322_s6, 3  ;;  %2009 = vmatpush.bf16.msra.mxu3 %v1995_v60 }
  0x1c   : > { %v2097_v26 = vpack.i.bf16 %v399_v23, %v397_v22  ;;  %v417_v29 = vld [vmem:[%s2263_s14 + $0x60] sm:$0xff]  ;;  %v419_v30 = vld [vmem:[%s2263_s14 + $0x70] sm:$0xff]  ;;  %v412_v32 = vld [vmem:[%s2263_s14 + $0x38] sm:$0x3]  ;;  %s2338_s10 = scalar_lea.vmem %s2883_s0, %s1879_s7 }
  0x1d   : > { %v2102_v34 = vpack.i.bf16 %v419_v30, %v417_v29  ;;  %v2112_v35 = vpack.i.bf16 %v412_v32, %v410_v31  ;;  %v414_v36 = vld [vmem:[%s2263_s14 + $0x48] sm:$0x3]  ;;  %v416_v37 = vld [vmem:[%s2263_s14 + $0x58] sm:$0x3]  ;;  %v401_v47 = vld [vmem:[%s2253_s9 + $0x80] sm:$0xff] }
  0x1e   : > { %v394_v38 = vld [vmem:[%s2253_s9 + $0x48] sm:$0x3]  ;;  %v396_v39 = vld [vmem:[%s2253_s9 + $0x58] sm:$0x3]  ;;  %v2122_v42 = vpack.i.bf16 %v416_v37, %v414_v36  ;;  %v421_v49 = vld [vmem:[%s2263_s14 + $0x80] sm:$0xff] }
  0x1f   : > { %v398_v40 = vld [vmem:[%s2253_s9 + $0x68] sm:$0x3]  ;;  %v400_v41 = vld [vmem:[%s2253_s9 + $0x78] sm:$0x3]  ;;  %v2117_v43 = vpack.i.bf16 %v396_v39, %v394_v38  ;;  %v403_v52 = vld [vmem:[%s2253_s9 + $0x90] sm:$0xff] }
  0x20   : > { %2073 = vrot.lane.b32.xlu1 %v2072_v15, %s2178_s16  ;;  %v2127_v44 = vpack.i.bf16 %v400_v41, %v398_v40  ;;  %v418_v45 = vld [vmem:[%s2263_s14 + $0x68] sm:$0x3]  ;;  %v420_v46 = vld [vmem:[%s2263_s14 + $0x78] sm:$0x3]  ;;  %v423_v54 = vld [vmem:[%s2263_s14 + $0x90] sm:$0xff] }
  0x21   : > { %2063 = vrot.lane.b32.xlu0 %v2062_v16, %s2178_s16  ;;  %v2132_v48 = vpack.i.bf16 %v420_v46, %v418_v45  ;;  %v422_v50 = vld [vmem:[%s2263_s14 + $0x88] sm:$0x3]  ;;  %v404_v53 = vld [vmem:[%s2253_s9 + $0x98] sm:$0x3]  ;;  %v365_v0 = vld [vmem:[%s2338_s10] sm:$0xff] }
  0x22   : > { %2083 = vrot.lane.b32.xlu2 %v2082_v17, %s2178_s16  ;;  %v402_v51 = vld [vmem:[%s2253_s9 + $0x88] sm:$0x3]  ;;  %v424_v57 = vld [vmem:[%s2263_s14 + $0x98] sm:$0x3]  ;;  %v367_v1 = vld [vmem:[%s2338_s10 + $0x10] sm:$0xff]  ;;  %s1885_s14 = sshll.u32 %s2904_s19, 3 }
  0x23   : > { %v1897_v11 = vld [vmem:[%s2886_s3 + $0x14] sm:$0xf]  ;;  %v1916_v12 = vld [vmem:[%s2886_s3 + $0x20] sm:$0xf]  ;;  %v1938_v21 = vld [vmem:[%s2886_s3 + $0x38] sm:$0xf] }
  0x24   : > { %v901_v15 = vunpack.c.l.b16 %v1897_v11  ;;  %v1037_v16 = vunpack.c.l.b16 %v1916_v12  ;;  %v1224_v23 = vunpack.c.l.b16 %v1938_v21  ;;  %v373_v36 = vld [vmem:[%s2338_s10 + $0x40] sm:$0xff]  ;;  %v375_v37 = vld [vmem:[%s2338_s10 + $0x50] sm:$0xff]  ;;  %v368_v21 = vld [vmem:[%s2338_s10 + $0x18] sm:$0x3] }
  0x25   : > { %v369_v40 = vld [vmem:[%s2338_s10 + $0x20] sm:$0xff]  ;;  %v371_v41 = vld [vmem:[%s2338_s10 + $0x30] sm:$0xff] }
  0x26   : > { %v903_v18 = vpack.c.b16 %v901_v15, %v901_v15  ;;  %v1039_v19 = vpack.c.b16 %v1037_v16, %v1037_v16  ;;  %v1226_v27 = vpack.c.b16 %v1224_v23, %v1224_v23  ;;  %v379_v23 = vld [vmem:[%s2338_s10 + $0x70] sm:$0xff] }
  0x28   : > { %2093 = vrot.lane.b32.xlu1 %v2092_v24, %s2178_s16  ;;  %v918_v20 = vsel %vm708_vm0, %v903_v18, 0  ;;  %v1054_v22 = vsel %vm708_vm0, %v1039_v19, 0  ;;  %v1996_v24 = vld [vmem:[%s2886_s3 + $0xc] sm:$0xff]  ;;  %v1241_v29 = vsel %vm708_vm0, %v1226_v27, 0 }
  0x29   : > { %2088 = vrot.lane.b32.xlu0 %v2087_v25, %s2177_s15  ;;  %926 = vmatpush.bf16.msrb.mxu1 %v918_v20  ;;  %v1997_v25 = vld [vmem:[%s2886_s3 + $0x18] sm:$0xff] }
  0x2a   : > { %2098 = vrot.lane.b32.xlu2 %v2097_v26, %s2177_s15  ;;  %1062 = vmatpush.bf16.msrb.mxu2 %v1054_v22  ;;  %v377_v22 = vld [vmem:[%s2338_s10 + $0x60] sm:$0xff] }
  0x2b   : > { %1249 = vmatpush.bf16.msrb.mxu0 %v1241_v29 }
  0x2d   : > { %927 = vmatpush.bf16.msrb.mxu1 %v1996_v24 }
  0x2e   : > { %1063 = vmatpush.bf16.msrb.mxu2 %v1997_v25 }
  0x30   : > { %2108 = vrot.lane.b32.xlu1 %v2107_v33, %s2177_s15 }
  0x31   : > { %2103 = vrot.lane.b32.xlu0 %v2102_v34, %s2178_s16 }
  0x32   : > { %2113 = vrot.lane.b32.xlu2 %v2112_v35, %s2178_s16 }
  0x38   : > { %2123 = vrot.lane.b32.xlu1 %v2122_v42, %s2178_s16 }
  0x39   : > { %2118 = vrot.lane.b32.xlu0 %v2117_v43, %s2177_s15 }
  0x3a   : > { %2128 = vrot.lane.b32.xlu2 %v2127_v44, %s2177_s15 }
  0x40   : > { %477 = vrot.lane.b32.xlu1 %v401_v47, %s2177_s15  ;;  %v1927_v47 = vld [vmem:[%s2886_s3 + $0x2c] sm:$0xf] }
  0x41   : > { %2133 = vrot.lane.b32.xlu0 %v2132_v48, %s2178_s16  ;;  %v1124_v58 = vunpack.c.l.b16 %v1927_v47 }
  0x42   : > { %557 = vrot.lane.b32.xlu2 %v421_v49, %s2178_s16 }
  0x43   : > { %v1126_v11 = vpack.c.b16 %v1124_v58, %v1124_v58 }
  0x48   : > { %559 = vrot.lane.b32.xlu1 %v422_v50, %s2178_s16 }
  0x49   : > { %479 = vrot.lane.b32.xlu0 %v402_v51, %s2177_s15 }
  0x4a   : > { %481 = vrot.lane.b32.xlu2 %v403_v52, %s2177_s15 }
  0x50   : > { %483 = vrot.lane.b32.xlu1 %v404_v53, %s2177_s15  ;;  %v1950_v53 = vld [vmem:[%s2886_s3 + $0x44] sm:$0xf]  ;;  %s361_s15 = sadd.s32 %s1885_s14, %s2910_s18 }
  0x51   : > { %561 = vrot.lane.b32.xlu0 %v423_v54, %s2178_s16  ;;  %v1999_v54 = vld [vmem:[%s2886_s3 + $0x30] sm:$0xff]  ;;  %v1315_v59 = vunpack.c.l.b16 %v1950_v53  ;;  %v370_v53 = vld [vmem:[%s2338_s10 + $0x28] sm:$0x3] }
  0x52   : > { %563 = vrot.lane.b32.xlu2 %v424_v57, %s2178_s16  ;;  %1250 = vmatpush.bf16.msrb.mxu0 %v1999_v54  ;;  %s1886_s16 = sshll.u32 %s361_s15, 1 }
  0x53   : > { %v1317_v12 = vpack.c.b16 %v1315_v59, %v1315_v59  ;;  %s363_s27 = scalar_lea.vmem %s2888_s5, %s1886_s16 }
  0x74   : > { %v2079_v61 = vpop.permute.xlu2 %2078 }
  0x75   : > { %v2081_v62 = vunpack.i.h.bf16 %v2079_v61  ;;  %v2080_v63 = vunpack.i.l.bf16 %v2079_v61 }
  0x77   : > { %v586_v2 = vsel %vm585_vm1, %v365_v0, %v2080_v63  ;;  %v588_v3 = vsel %vm585_vm1, %v367_v1, %v2081_v62 }
  0x7c   : > { %v2084_v4 = vpop.permute.xlu2 %2083 }
  0x7d   : > { %v2086_v5 = vunpack.i.h.bf16 %v2084_v4  ;;  %v2085_v6 = vunpack.i.l.bf16 %v2084_v4 }
  0x7f   : > { %v607_v7 = vsel %vm606_vm2, %v586_v2, %v2085_v6  ;;  %v609_v8 = vsel %vm606_vm2, %v588_v3, %v2086_v5 }
  0x80   : > { %v2346_v9 = vpack.c.bf16 %v607_v7, %v607_v7  ;;  %v2348_v10 = vpack.c.bf16 %v609_v8, %v609_v8 }
  0x82   : > { %v674_v13 = vunpack.c.l.b16 %v2346_v9  ;;  %v675_v14 = vunpack.c.l.b16 %v2348_v10  ;;  %v761_v30 = vshrl.u32 %v2346_v9, 16  ;;  %v764_v31 = vshll.u32 %v2346_v9, 16 }
  0x83   : > { %v775_v32 = vshrl.u32 %v2348_v10, 16  ;;  %v778_v33 = vshll.u32 %v2348_v10, 16 }
  0x84   : > { %v682_v17 = vpack.c.b16 %v675_v14, %v674_v13  ;;  %v2381_v42 = vrot.slane %v761_v30, 4  ;;  %v2383_v43 = vrot.slane %v764_v31, 5  ;;  %v2099_v57 = vpop.permute.xlu2 %2098  ;;  %v366_v13 = vld [vmem:[%s2338_s10 + $0x8] sm:$0x3]  ;;  %v1332_v31 = vsel %vm708_vm0, %v1317_v12, 0 }
  0x85   : > { %v2385_v44 = vrot.slane %v775_v32, 4  ;;  %v2387_v45 = vrot.slane %v778_v33, 5  ;;  %v2101_v6 = vunpack.i.h.bf16 %v2099_v57  ;;  %v2100_v15 = vunpack.i.l.bf16 %v2099_v57  ;;  %v1961_v32 = vld [vmem:[%s2886_s3 + $0x50] sm:$0xf]  ;;  %v1998_v33 = vld [vmem:[%s2886_s3 + $0x24] sm:$0xff] }
  0x86   : > { %1891 = vmatmul.msk.bf16.vlgmr.msra.gmra.mxu0 %vm695_vm3, %v682_v17  ;;  %v767_v18 = vor.u32 %v2383_v43, %v2381_v42  ;;  %v1907_v57 = vrot.slane %v2348_v10, 9 }
  0x87   : > { %v781_v25 = vor.u32 %v2387_v45, %v2385_v44 }
  0x8a   : > { %v2069_v26 = vpop.permute.xlu1 %2068 }
  0x8b   : > { %v2059_v28 = vpop.permute.xlu0 %2058  ;;  %v2071_v34 = vunpack.i.h.bf16 %v2069_v26  ;;  %v2070_v35 = vunpack.i.l.bf16 %v2069_v26  ;;  %v1141_v26 = vsel %vm708_vm0, %v1126_v11, 0 }
  0x8c   : > { %v2061_v38 = vunpack.i.h.bf16 %v2059_v28  ;;  %v2060_v39 = vunpack.i.l.bf16 %v2059_v28  ;;  %1149 = vmatpush.bf16.msrb.mxu3 %v1141_v26  ;;  %v2114_v43 = vpop.permute.xlu2 %2113 }
  0x8d   : > { %v594_v48 = vsel %vm585_vm1, %v373_v36, %v2070_v35  ;;  %v596_v49 = vsel %vm585_vm1, %v375_v37, %v2071_v34  ;;  %v1399_v37 = vunpack.c.l.b16 %v1961_v32  ;;  %v2116_v54 = vunpack.i.h.bf16 %v2114_v43 }
  0x8e   : > { %v590_v60 = vsel %vm585_vm1, %v369_v40, %v2060_v39  ;;  %v592_v61 = vsel %vm585_vm1, %v371_v41, %v2061_v38  ;;  %v598_v38 = vsel %vm585_vm1, %v377_v22, %v2100_v15  ;;  %v600_v39 = vsel %vm585_vm1, %v379_v23, %v2101_v6 }
  0x8f   : > { %v2452_v40 = vrot.slane %v767_v18, 4  ;;  %v1401_v44 = vpack.c.b16 %v1399_v37, %v1399_v37 }
  0x90   : > { %1150 = vmatpush.bf16.msrb.mxu3 %v1998_v33 }
  0x92   : > { %v2074_v46 = vpop.permute.xlu1 %2073 }
  0x93   : > { %v2076_v50 = vunpack.i.h.bf16 %v2074_v46  ;;  %v2075_v51 = vunpack.i.l.bf16 %v2074_v46  ;;  %v2064_v52 = vpop.permute.xlu0 %2063 }
  0x94   : > { %v2066_v55 = vunpack.i.h.bf16 %v2064_v52  ;;  %v2065_v56 = vunpack.i.l.bf16 %v2064_v52  ;;  %v1407_v52 = vsel %vm708_vm0, %v1401_v44, 0 }
  0x95   : > { %v615_v62 = vsel %vm606_vm2, %v594_v48, %v2075_v51  ;;  %v617_v63 = vsel %vm606_vm2, %v596_v49, %v2076_v50  ;;  %v782_v51 = vrot.slane %v781_v25, 4 }
  0x96   : > { %v2404_v0 = vpack.c.bf16 %v615_v62, %v615_v62  ;;  %v2406_v1 = vpack.c.bf16 %v617_v63, %v617_v63  ;;  %v611_v2 = vsel %vm606_vm2, %v590_v60, %v2065_v56  ;;  %v613_v3 = vsel %vm606_vm2, %v592_v61, %v2066_v55  ;;  %v372_v63 = vld [vmem:[%s2338_s10 + $0x38] sm:$0x3] }
  0x97   : > { %v2410_v4 = vpack.c.bf16 %v611_v2, %v611_v2  ;;  %v2412_v5 = vpack.c.bf16 %v613_v3, %v613_v3  ;;  %v2115_v55 = vunpack.i.l.bf16 %v2114_v43  ;;  %v1906_v56 = vrot.slane %v2346_v9, 9 }
  0x98   : > { %v678_v7 = vunpack.c.l.b16 %v2404_v0  ;;  %v679_v8 = vunpack.c.l.b16 %v2406_v1 }
  0x99   : > { %v676_v16 = vunpack.c.l.b16 %v2410_v4  ;;  %v677_v17 = vunpack.c.l.b16 %v2412_v5  ;;  %v789_v19 = vshrl.u32 %v2410_v4, 16  ;;  %v792_v27 = vshll.u32 %v2410_v4, 16 }
  0x9a   : > { %v2094_v20 = vpop.permute.xlu1 %2093  ;;  %v2429_v24 = vpack.c.b16 %v679_v8, %v678_v7  ;;  %v803_v9 = vshrl.u32 %v2412_v5, 16  ;;  %v806_v33 = vshll.u32 %v2412_v5, 16 }
  0x9b   : > { %v2096_v28 = vunpack.i.h.bf16 %v2094_v20  ;;  %v2095_v29 = vunpack.i.l.bf16 %v2094_v20  ;;  %v2089_v30 = vpop.permute.xlu0 %2088  ;;  %v2446_v36 = vpack.c.b16 %v677_v17, %v676_v16  ;;  %v791_v45 = vrot.slane %v789_v19, 4 }
  0x9c   : > { %v2091_v34 = vunpack.i.h.bf16 %v2089_v30  ;;  %v2090_v35 = vunpack.i.l.bf16 %v2089_v30  ;;  %1893 = vmatmul.msk.bf16.vlgmr.msra.gmra.mxu2 %vm695_vm3, %v2429_v24  ;;  %v794_v46 = vrot.slane %v792_v27, 5  ;;  %v805_v37 = vrot.slane %v803_v9, 4  ;;  %v2000_v9 = vld [vmem:[%s2886_s3 + $0x3c] sm:$0xff] }
  0x9d   : > { %1892 = vmatmul.msk.bf16.vlgmr.msra.gmra.mxu1 %vm695_vm3, %v2446_v36  ;;  %1415 = vmatpush.bf16.msra.mxu2 %v1407_v52 }
  0x9e   : > { %v587_v41 = vsel %vm585_vm1, %v366_v13, %v2090_v35  ;;  %v589_v42 = vsel %vm585_vm1, %v368_v21, %v2091_v34  ;;  %1340 = vmatpush.bf16.msra.mxu1 %v1332_v31  ;;  %v795_v12 = vor.u32 %v794_v46, %v791_v45 }
  0x9f   : > { %v608_v47 = vsel %vm606_vm2, %v587_v41, %v2095_v29  ;;  %v610_v48 = vsel %vm606_vm2, %v589_v42, %v2096_v28 }
  0xa0   : > { %v628_v49 = vpack.c.bf16 %v608_v47, %v608_v47  ;;  %v630_v50 = vpack.c.bf16 %v610_v48, %v610_v48  ;;  %v796_v52 = vrot.slane %v795_v12, 4 }
  0xa2   : > { %v770_v58 = vshll.u32 %v628_v49, 16  ;;  %v784_v59 = vshll.u32 %v630_v50, 16  ;;  %v978_v60 = vrot.slane %v628_v49, 5  ;;  %v982_v61 = vrot.slane %v630_v50, 5  ;;  %v2109_v62 = vpop.permute.xlu1 %2108  ;;  %1341 = vmatpush.bf16.msra.mxu1 %v2000_v9 }
  0xa3   : > { %v2111_v3 = vunpack.i.h.bf16 %v2109_v62  ;;  %v2110_v6 = vunpack.i.l.bf16 %v2109_v62  ;;  %v2104_v11 = vpop.permute.xlu0 %2103 }
  0xa4   : > { %v772_v13 = vrot.slane %v770_v58, 5  ;;  %v786_v15 = vrot.slane %v784_v59, 5  ;;  %v2106_v18 = vunpack.i.h.bf16 %v2104_v11  ;;  %v2105_v19 = vunpack.i.l.bf16 %v2104_v11 }
  0xa5   : > { %v591_v20 = vsel %vm585_vm1, %v370_v53, %v2110_v6  ;;  %v593_v21 = vsel %vm585_vm1, %v372_v63, %v2111_v3  ;;  %v979_v23 = vsel %vm2467_vm8, %v1906_v56, %v978_v60  ;;  %v2484_v25 = vsel %vm2467_vm8, %v1907_v57, %v982_v61 }
  0xa6   : > { %v619_v26 = vsel %vm606_vm2, %v598_v38, %v2105_v19  ;;  %v621_v27 = vsel %vm606_vm2, %v600_v39, %v2106_v18  ;;  %v612_v28 = vsel %vm606_vm2, %v591_v20, %v2115_v55  ;;  %v614_v29 = vsel %vm606_vm2, %v593_v21, %v2116_v54 }
  0xa7   : > { %v2490_v30 = vpack.c.bf16 %v619_v26, %v619_v26  ;;  %v2492_v31 = vpack.c.bf16 %v621_v27, %v621_v27  ;;  %v2494_v32 = vpack.c.bf16 %v612_v28, %v612_v28  ;;  %v773_v34 = vsel %vm2476_vm9, %v2452_v40, %v772_v13  ;;  %v1972_v40 = vld [vmem:[%s2886_s3 + $0x5c] sm:$0xf]  ;;  %v376_v13 = vld [vmem:[%s2338_s10 + $0x58] sm:$0x3] }
  0xa8   : > { %v787_v35 = vsel %vm2476_vm9, %v782_v51, %v786_v15  ;;  %v2502_v38 = vpack.c.bf16 %v614_v29, %v614_v29  ;;  %v1020_v41 = vunpack.c.l.b16 %v979_v23  ;;  %v1021_v42 = vunpack.c.l.b16 %v2484_v25  ;;  %v374_v51 = vld [vmem:[%s2338_s10 + $0x48] sm:$0x3]  ;;  %v2129_v29 = vpop.permute.xlu2 %2128 }
  0xa9   : > { %v798_v39 = vshll.u32 %v2494_v32, 16  ;;  %v680_v44 = vunpack.c.l.b16 %v2490_v30  ;;  %v681_v45 = vunpack.c.l.b16 %v2492_v31  ;;  %v884_v46 = vunpack.c.l.b16 %v773_v34  ;;  %v2001_v34 = vld [vmem:[%s2886_s3 + $0x48] sm:$0xff] }
  0xaa   : > { %v2124_v43 = vpop.permute.xlu1 %2123  ;;  %v885_v47 = vunpack.c.l.b16 %v787_v35  ;;  %v808_v53 = vrot.slane %v806_v33, 5  ;;  %v817_v57 = vshrl.u32 %v2404_v0, 16  ;;  %v812_v58 = vshll.u32 %v2502_v38, 16  ;;  %1416 = vmatpush.bf16.msra.mxu2 %v2001_v34 }
  0xab   : > { %v800_v48 = vrot.slane %v798_v39, 5  ;;  %v2125_v49 = vunpack.i.l.bf16 %v2124_v43  ;;  %v2119_v50 = vpop.permute.xlu0 %2118  ;;  %v2516_v55 = vpack.c.b16 %v681_v45, %v680_v44  ;;  %v1028_v59 = vpack.c.b16 %v1021_v42, %v1020_v41 }
  0xac   : > { %v2120_v54 = vunpack.i.l.bf16 %v2119_v50  ;;  %v892_v56 = vpack.c.b16 %v885_v47, %v884_v46  ;;  %v1487_v61 = vunpack.c.l.b16 %v1972_v40  ;;  %v820_v3 = vshll.u32 %v2404_v0, 16  ;;  %v378_v46 = vld [vmem:[%s2338_s10 + $0x68] sm:$0x3] }
  0xad   : > { %v801_v60 = vsel %vm2476_vm9, %v796_v52, %v800_v48  ;;  %1894 = vmatmul.msk.bf16.vlgmr.msra.gmra.mxu3 %vm695_vm3, %v2516_v55  ;;  %v2121_v6 = vunpack.i.h.bf16 %v2119_v50  ;;  %1921 = vmatmul.msk.bf16.vlgmr.msrb.gmra.mxu2 %vm695_vm3, %v1028_v59  ;;  %v809_v12 = vor.u32 %v808_v53, %v805_v37  ;;  %v814_v19 = vrot.slane %v812_v58, 5 }
  0xae   : > { %v595_v62 = vsel %vm585_vm1, %v374_v51, %v2120_v54  ;;  %1902 = vmatmul.msk.bf16.vlgmr.msrb.gmra.mxu1 %vm695_vm3, %v892_v56  ;;  %v886_v63 = vunpack.c.l.b16 %v801_v60  ;;  %v986_v20 = vrot.slane %v2494_v32, 5  ;;  %v1489_v21 = vpack.c.b16 %v1487_v61, %v1487_v61 }
  0xaf   : > { %v616_v11 = vsel %vm606_vm2, %v595_v62, %v2125_v49  ;;  %v819_v23 = vrot.slane %v817_v57, 4  ;;  %v990_v26 = vrot.slane %v2502_v38, 5  ;;  %v2126_v27 = vunpack.i.h.bf16 %v2124_v43  ;;  %v381_v62 = vld [vmem:[%s2338_s10 + $0x80] sm:$0xff] }
  0xb0   : > { %v2535_v15 = vpack.c.bf16 %v616_v11, %v616_v11  ;;  %v1215_v18 = vpack.c.b16 %v886_v63, %v885_v47  ;;  %v822_v33 = vrot.slane %v820_v3, 5  ;;  %v597_v35 = vsel %vm585_vm1, %v376_v13, %v2121_v6 }
  0xb1   : > { %v2130_v32 = vunpack.i.l.bf16 %v2129_v29  ;;  %v810_v39 = vrot.slane %v809_v12, 4  ;;  %v1495_v41 = vsel %vm708_vm0, %v1489_v21, 0  ;;  %v1908_v38 = vrot.slane %v2410_v4, 9  ;;  %v380_v12 = vld [vmem:[%s2338_s10 + $0x78] sm:$0x3] }
  0xb2   : > { %v826_v28 = vshll.u32 %v2535_v15, 16  ;;  %1943 = vmatmul.msk.bf16.vlgmr.msrb.gmra.mxu0 %vm695_vm3, %v1215_v18  ;;  %v1909_v43 = vrot.slane %v2412_v5, 9  ;;  %1503 = vmatpush.bf16.msra.mxu3 %v1495_v41  ;;  %v823_v47 = vor.u32 %v822_v33, %v819_v23  ;;  %v478_v40 = vpop.permute.xlu1 %477  ;;  %v618_v50 = vsel %vm606_vm2, %v597_v35, %v2126_v27 }
  0xb3   : > { %v2134_v37 = vpop.permute.xlu0 %2133  ;;  %v815_v48 = vsel %vm2476_vm9, %v810_v39, %v814_v19  ;;  %v2554_v52 = vsel %vm2467_vm8, %v1908_v38, %v986_v20  ;;  %v599_v54 = vsel %vm585_vm1, %v378_v46, %v2130_v32  ;;  %v831_v57 = vshrl.u32 %v2406_v1, 16  ;;  %v1984_v20 = vld [vmem:[%s2886_s3 + $0x68] sm:$0xf]  ;;  %v2002_v46 = vld [vmem:[%s2886_s3 + $0x54] sm:$0xff] }
  0xb4   : > { %v828_v49 = vrot.slane %v826_v28, 5  ;;  %v2135_v51 = vunpack.i.l.bf16 %v2134_v37  ;;  %v2558_v53 = vsel %vm2467_vm8, %v1909_v43, %v990_v26  ;;  %v824_v56 = vrot.slane %v823_v47, 4  ;;  %v558_v26 = vpop.permute.xlu2 %557  ;;  %v382_v28 = vld [vmem:[%s2338_s10 + $0x88] sm:$0x3] }
  0xb5   : > { %v834_v58 = vshll.u32 %v2406_v1, 16  ;;  %v2131_v59 = vunpack.i.h.bf16 %v2129_v29  ;;  %v887_v60 = vunpack.c.l.b16 %v815_v48  ;;  %v638_v61 = vpack.c.bf16 %v618_v50, %v618_v50 }
  0xb6   : > { %v1022_v3 = vunpack.c.l.b16 %v2554_v52  ;;  %v1023_v6 = vunpack.c.l.b16 %v2558_v53  ;;  %v829_v11 = vsel %vm2476_vm9, %v824_v56, %v828_v49  ;;  %v620_v9 = vsel %vm606_vm2, %v599_v54, %v2135_v51  ;;  %1504 = vmatpush.bf16.msra.mxu3 %v2002_v46  ;;  %v384_v53 = vld [vmem:[%s2338_s10 + $0x98] sm:$0x3] }
  0xb7   : > { %v1115_v13 = vpack.c.b16 %v676_v16, %v675_v14  ;;  %v833_v18 = vrot.slane %v831_v57, 4  ;;  %v836_v19 = vrot.slane %v834_v58, 5  ;;  %v602_v21 = vsel %vm585_vm1, %v381_v62, %v478_v40 }
  0xb8   : > { %v2136_v23 = vunpack.i.h.bf16 %v2134_v37  ;;  %v2579_v29 = vpack.c.b16 %v887_v60, %v886_v63  ;;  %v888_v33 = vunpack.c.l.b16 %v829_v11  ;;  %v840_v34 = vshll.u32 %v638_v61, 16 }
  0xb9   : > { %v601_v10 = vsel %vm585_vm1, %v380_v12, %v2131_v59  ;;  %v2582_v4 = vpack.c.bf16 %v620_v9, %v620_v9  ;;  %v2588_v14 = vpack.c.b16 %v1023_v6, %v1022_v3  ;;  %v1566_v16 = vunpack.c.l.b16 %v1984_v20 }
  0xba   : > { %v845_v63 = vshrl.u32 %v2490_v30, 16  ;;  %v623_v35 = vsel %vm606_vm2, %v602_v21, %v558_v26  ;;  %v560_v37 = vpop.permute.xlu1 %559  ;;  %v837_v39 = vor.u32 %v836_v19, %v833_v18  ;;  %v848_v41 = vshll.u32 %v2490_v30, 16 }
  0xbb   : > { %v480_v27 = vpop.permute.xlu0 %479  ;;  %v622_v38 = vsel %vm606_vm2, %v601_v10, %v2136_v23  ;;  %v1216_v43 = vpack.c.b16 %v888_v33, %v887_v60  ;;  %v1568_v47 = vpack.c.b16 %v1566_v16, %v1566_v16  ;;  %v854_v48 = vshll.u32 %v2582_v4, 16 }
  0xbc   : > { %v603_v32 = vsel %vm585_vm1, %v382_v28, %v480_v27  ;;  %v847_v40 = vrot.slane %v845_v63, 4  ;;  %v842_v49 = vrot.slane %v840_v34, 5  ;;  %v994_v50 = vrot.slane %v2535_v15, 5  ;;  %v482_v25 = vpop.permute.xlu2 %481 }
  0xbd   : > { %1932 = vmatmul.msk.bf16.vlgmr.msrb.gmra.mxu3 %vm695_vm3, %v1115_v13  ;;  %1922 = vmatmul.msk.bf16.gmra.mxu2 %vm695_vm3, %v2588_v14  ;;  %v850_v51 = vrot.slane %v848_v41, 5  ;;  %v624_v54 = vsel %vm606_vm2, %v603_v32, %v560_v37  ;;  %v998_v56 = vrot.slane %v638_v61, 5  ;;  %v1574_v57 = vsel %vm708_vm0, %v1568_v47, 0 }
  0xbe   : > { %1903 = vmatmul.msk.bf16.gmra.mxu1 %vm695_vm3, %v2579_v29  ;;  %v642_v58 = vpack.c.bf16 %v622_v38, %v622_v38  ;;  %v838_v59 = vrot.slane %v837_v39, 4  ;;  %v1910_v60 = vrot.slane %v2404_v0, 9  ;;  %1582 = vmatpush.bf16.msra.mxu0 %v1574_v57  ;;  %v2609_v11 = vpack.c.bf16 %v623_v35, %v623_v35 }
  0xbf   : > { %v851_v62 = vor.u32 %v850_v51, %v847_v40  ;;  %v1911_v12 = vrot.slane %v2406_v1, 9  ;;  %v856_v15 = vrot.slane %v854_v48, 5  ;;  %v644_v9 = vpack.c.bf16 %v624_v54, %v624_v54 }
  0xc0   : > { %v843_v13 = vsel %vm2476_vm9, %v838_v59, %v842_v49  ;;  %v2616_v61 = vsel %vm2467_vm8, %v1910_v60, %v994_v50  ;;  %v1189_v18 = vshrl.u32 %v2609_v11, 16  ;;  %v1006_v20 = vrot.slane %v642_v58, 5 }
  0xc1   : > { %v2621_v19 = vsel %vm2467_vm8, %v1911_v12, %v998_v56  ;;  %v852_v21 = vrot.slane %v851_v62, 4  ;;  %v859_v23 = vshrl.u32 %v2492_v31, 16  ;;  %v862_v26 = vshll.u32 %v2492_v31, 16 }
  0xc2   : > { %1944 = vmatmul.msk.bf16.gmra.mxu0 %vm695_vm3, %v1216_v43  ;;  %v1192_v27 = vshll.u32 %v2609_v11, 16  ;;  %v1947_v28 = vrot.slane %v2609_v11, 9  ;;  %v889_v34 = vunpack.c.l.b16 %v843_v13  ;;  %v1024_v10 = vunpack.c.l.b16 %v2616_v61  ;;  %v484_v52 = vpop.permute.xlu1 %483 }
  0xc3   : > { %v1291_v16 = vrot.slane %v644_v9, 5  ;;  %v1025_v63 = vunpack.c.l.b16 %v2621_v19  ;;  %v857_v35 = vsel %vm2476_vm9, %v852_v21, %v856_v15  ;;  %v1913_v32 = vrot.slane %v2492_v31, 9 }
  0xc4   : > { %v861_v37 = vrot.slane %v859_v23, 4  ;;  %v864_v39 = vrot.slane %v862_v26, 5  ;;  %v868_v46 = vshll.u32 %v642_v58, 16  ;;  %v2634_v38 = vpack.c.b16 %v889_v34, %v888_v33 }
  0xc5   : > { %v1007_v41 = vsel %vm2467_vm8, %v1913_v32, %v1006_v20  ;;  %v1116_v43 = vpack.c.b16 %v678_v7, %v677_v17  ;;  %v890_v47 = vunpack.c.l.b16 %v857_v35  ;;  %v1191_v40 = vrot.slane %v1189_v18, 4  ;;  %v2003_v17 = vld [vmem:[%s2886_s3 + $0x60] sm:$0xff] }
  0xc6   : > { %v1194_v48 = vrot.slane %v1192_v27, 5  ;;  %v1030_v49 = vpack.c.b16 %v1025_v63, %v1024_v10  ;;  %v2646_v50 = vsel %vm2467_vm8, %v1947_v28, %v1291_v16  ;;  %v1027_v5 = vunpack.c.l.b16 %v1007_v41  ;;  %1583 = vmatpush.bf16.msra.mxu0 %v2003_v17 }
  0xc7   : > { %v1305_v0 = vunpack.c.l.b16 %v2646_v50  ;;  %v865_v7 = vor.u32 %v864_v39, %v861_v37  ;;  %v1217_v33 = vpack.c.b16 %v890_v47, %v889_v34  ;;  %v870_v54 = vrot.slane %v868_v46, 5 }
  0xc8   : > { %v1198_v56 = vshll.u32 %v644_v9, 16  ;;  %v1195_v57 = vor.u32 %v1194_v48, %v1191_v40  ;;  %v1002_v58 = vrot.slane %v2582_v4, 5  ;;  %v1912_v60 = vrot.slane %v2490_v30, 9 }
  0xc9   : > { %v2658_v51 = vpack.c.b16 %v1305_v0, %v1027_v5  ;;  %v866_v59 = vrot.slane %v865_v7, 4  ;;  %v1117_v4 = vpack.c.b16 %v680_v44, %v679_v8  ;;  %v1114_v28 = vunpack.c.l.b16 %v2609_v11  ;;  %v564_v11 = vpop.permute.xlu2 %563 }
  0xca   : > { %v1200_v62 = vrot.slane %v1198_v56, 5  ;;  %v1196_v15 = vrot.slane %v1195_v57, 4  ;;  %v1003_v13 = vsel %vm2467_vm8, %v1912_v60, %v1002_v58  ;;  %v1306_v1 = vpack.c.b16 %v1022_v3, %v1021_v42 }
  0xcb   : > { %v871_v12 = vsel %vm2476_vm9, %v866_v59, %v870_v54  ;;  %v1026_v20 = vunpack.c.l.b16 %v1003_v13  ;;  %v1118_v8 = vpack.c.b16 %v1114_v28, %v681_v45  ;;  %v2179_v30 = vmov 0.0   ;;  %v383_v45 = vld [vmem:[%s2338_s10 + $0x90] sm:$0xff]  ;;  %s1882_s10 = sshll.u32 %s2910_s18, 3 }
  0xcc   : > { %v891_v18 = vunpack.c.l.b16 %v871_v12  ;;  %v1201_v9 = vsel %vm2476_vm9, %v1196_v15, %v1200_v62  ;;  %647 = vst.msk [vmem:[#allocation2] sm:$0xff] %vm585_vm1, %v2179_v30  ;;  %s353_s9 = sadd.s32 %s1883_s8, %s1882_s10 }
  0xcd   : > { %1933 = vmatmul.msk.bf16.gmra.mxu3 %vm695_vm3, %v1116_v43  ;;  %1923 = vmatmul.msk.bf16.gmra.mxu2 %vm695_vm3, %v1030_v49  ;;  %v2675_v23 = vunpack.c.l.b16 %v1201_v9  ;;  %v1031_v26 = vpack.c.b16 %v1027_v5, %v1026_v20  ;;  %648 = vst.msk [vmem:[#allocation2 + $0x8] sm:$0xff] %vm585_vm1, %v2179_v30  ;;  %s1884_s26 = sshll.u32 %s353_s9, 3 }
  0xce   : > { %1904 = vmatmul.msk.bf16.gmra.mxu1 %vm695_vm3, %v2634_v38  ;;  %v2669_v21 = vpack.c.b16 %v891_v18, %v890_v47  ;;  %649 = vst.msk [vmem:[#allocation2 + $0x10] sm:$0xff] %vm585_vm1, %v2179_v30  ;;  %s2803_s13 = scalar_lea.vmem %s2887_s4, %s1884_s26 }
  0xcf   : > { %v1218_v27 = vpack.c.b16 %v2675_v23, %v891_v18  ;;  %650 = vst.msk [vmem:[#allocation2 + $0x18] sm:$0xff] %vm585_vm1, %v2179_v30 }
  0xd0   : > { %651 = vst.msk [vmem:[#allocation2 + $0x20] sm:$0xff] %vm585_vm1, %v2179_v30 }
  0xd1   : > { %652 = vst.msk [vmem:[#allocation2 + $0x28] sm:$0xff] %vm585_vm1, %v2179_v30 }
  0xd2   : > { %1945 = vmatmul.msk.bf16.gmra.mxu0 %vm695_vm3, %v1217_v33  ;;  %653 = vst.msk [vmem:[#allocation2 + $0x30] sm:$0xff] %vm585_vm1, %v2179_v30 }
  0xd3   : > { %654 = vst.msk [vmem:[#allocation2 + $0x38] sm:$0xff] %vm585_vm1, %v2179_v30  ;;  %v655_v31 = vld [vmem:[#allocation2] sm:$0xff] }
  0xd4   : > { %v656_v3 = vld [vmem:[#allocation2 + $0x8] sm:$0xff] }
  0xd5   : > { %v657_v43 = vld [vmem:[#allocation2 + $0x10] sm:$0xff] }
  0xd6   : > { %v658_v57 = vld [vmem:[#allocation2 + $0x18] sm:$0xff] }
  0xd7   : > { %v659_v7 = vld [vmem:[#allocation2 + $0x20] sm:$0xff] }
  0xd9   : > { %v661_v9 = vld [vmem:[#allocation2 + $0x30] sm:$0xff] }
  0xdd   : > { %1934 = vmatmul.msk.bf16.gmra.mxu3 %vm695_vm3, %v1117_v4  ;;  %1924 = vmatmul.msk.bf16.gmra.mxu2 %vm695_vm3, %v1031_v26 }
  0xde   : > { %1905 = vmatmul.msk.bf16.gmra.mxu1 %vm695_vm3, %v2669_v21 }
  0xe2   : > { %1946 = vmatmul.msk.bf16.gmra.mxu0 %vm695_vm3, %v1218_v27 }
  0xed   : > { %1935 = vmatmul.msk.bf16.gmra.mxu3 %vm695_vm3, %v1118_v8  ;;  %1966 = vmatmul.msk.bf16.vlgmr.msra.gmra.mxu2 %vm695_vm3, %v2446_v36  ;;  %v1307_v36 = vpack.c.b16 %v1024_v10, %v1023_v6  ;;  %v604_v6 = vsel %vm585_vm1, %v383_v45, %v482_v25 }
  0xee   : > { %1955 = vmatmul.msk.bf16.vlgmr.msra.gmra.mxu1 %vm695_vm3, %v1306_v1 }
  0xf2   : > { %1989 = vmatmul.msk.bf16.vlgmr.msra.gmra.mxu0 %vm695_vm3, %v2588_v14  ;;  %v605_v14 = vsel %vm585_vm1, %v384_v53, %v484_v52 }
  0xf3   : > { %v626_v16 = vsel %vm606_vm2, %v605_v14, %v564_v11 }
  0xf4   : > { %v646_v32 = vpack.c.bf16 %v626_v16, %v626_v16 }
  0xf6   : > { %v1545_v39 = vrot.slane %v646_v32, 5 }
  0xfd   : > { %1977 = vmatmul.msk.bf16.vlgmr.msra.gmra.mxu3 %vm695_vm3, %v2579_v29  ;;  %1967 = vmatmul.msk.bf16.gmra.mxu2 %vm695_vm3, %v2429_v24  ;;  %v562_v29 = vpop.permute.xlu0 %561  ;;  %v1308_v24 = vpack.c.b16 %v1026_v20, %v1025_v63 }
  0xfe   : > { %1956 = vmatmul.msk.bf16.gmra.mxu1 %vm695_vm3, %v1307_v36  ;;  %v625_v10 = vsel %vm606_vm2, %v604_v6, %v562_v29  ;;  %v662_v36 = vld [vmem:[#allocation2 + $0x38] sm:$0xff] }
  0xff   : > { %v645_v35 = vpack.c.bf16 %v625_v10, %v625_v10 }
 0x101   : > { %v1455_v19 = vshrl.u32 %v645_v35, 16  ;;  %v1458_v63 = vshll.u32 %v645_v35, 16  ;;  %v1981_v37 = vrot.slane %v645_v35, 9  ;;  %v1392_v47 = vunpack.c.l.b16 %v645_v35 }
 0x102   : > { %1990 = vmatmul.msk.bf16.gmra.mxu0 %vm695_vm3, %v1030_v49  ;;  %v1464_v49 = vshll.u32 %v646_v32, 16 }
 0x103   : > { %v721_v42 = vpop.f32.mrf.mxu0  ;;  %v1457_v41 = vrot.slane %v1455_v19, 4  ;;  %v1460_v46 = vrot.slane %v1458_v63, 5  ;;  %v1393_v5 = vpack.c.b16 %v1392_v47, %v1114_v28 }
 0x104   : > { %v741_v44 = vadd.f32 %v721_v42, %v655_v31  ;;  %v1466_v56 = vrot.slane %v1464_v49, 5 }
 0x105   : > { %v1461_v17 = vor.u32 %v1460_v46, %v1457_v41 }
 0x106   : > { %749 = vst.msk [vmem:[#allocation2] sm:$0xff] %vm585_vm1, %v741_v44 }
 0x107   : > { %v1462_v58 = vrot.slane %v1461_v17, 4 }
 0x109   : > { %v1467_v62 = vsel %vm2476_vm9, %v1462_v58, %v1466_v56 }
 0x10a   : > { %v1480_v13 = vunpack.c.l.b16 %v1467_v62 }
 0x10b   : > { %v723_v61 = vpop.f32.mrf.mxu0 }
 0x10c   : > { %v742_v34 = vadd.f32 %v723_v61, %v656_v3  ;;  %v1481_v20 = vpack.c.b16 %v1480_v13, %v2675_v23 }
 0x10d   : > { %1978 = vmatmul.msk.bf16.gmra.mxu3 %vm695_vm3, %v2634_v38  ;;  %1968 = vmatmul.msk.bf16.gmra.mxu2 %vm695_vm3, %v2516_v55  ;;  %v1546_v38 = vsel %vm2467_vm8, %v1981_v37, %v1545_v39  ;;  %v872_v50 = vld [vmem:[#allocation2] sm:$0xff] }
 0x10e   : > { %1957 = vmatmul.msk.bf16.gmra.mxu1 %vm695_vm3, %v1308_v24  ;;  %750 = vst.msk [vmem:[#allocation2 + $0x8] sm:$0xff] %vm585_vm1, %v742_v34  ;;  %v1559_v55 = vunpack.c.l.b16 %v1546_v38 }
 0x110   : > { %v1560_v54 = vpack.c.b16 %v1559_v55, %v1305_v0 }
 0x112   : > { %1991 = vmatmul.msk.bf16.gmra.mxu0 %vm695_vm3, %v1031_v26 }
 0x115   : > { %v873_v27 = vld [vmem:[#allocation2 + $0x8] sm:$0xff] }
 0x11a   : > { %v726_v40 = vpop.f32.mrf.mxu1 }
 0x11b   : > { %v743_v48 = vadd.f32 %v726_v40, %v657_v43 }
 0x11d   : > { %751 = vst.msk [vmem:[#allocation2 + $0x10] sm:$0xff] %vm585_vm1, %v743_v48  ;;  %1979 = vmatmul.msk.bf16.gmra.mxu3 %vm695_vm3, %v2669_v21  ;;  %1969 = vmatmul.msk.bf16.gmra.mxu2 %vm695_vm3, %v1393_v5 }
 0x11e   : > { %1958 = vmatmul.msk.bf16.gmra.mxu1 %vm695_vm3, %v2658_v51  ;;  %v660_v51 = vld [vmem:[#allocation2 + $0x28] sm:$0xff] }
 0x11f   : > { %v731_v33 = vpop.f32.mrf.mxu2 }
 0x120   : > { %v745_v2 = vadd.f32 %v731_v33, %v659_v7 }
 0x122   : > { %753 = vst.msk [vmem:[#allocation2 + $0x20] sm:$0xff] %vm585_vm1, %v745_v2  ;;  %1992 = vmatmul.msk.bf16.gmra.mxu0 %vm695_vm3, %v1560_v54  ;;  %v728_v59 = vpop.f32.mrf.mxu1 }
 0x123   : > { %v744_v60 = vadd.f32 %v728_v59, %v658_v57 }
 0x124   : > { %v874_v44 = vld [vmem:[#allocation2 + $0x10] sm:$0xff] }
 0x125   : > { %752 = vst.msk [vmem:[#allocation2 + $0x18] sm:$0xff] %vm585_vm1, %v744_v60 }
 0x127   : > { %v733_v12 = vpop.f32.mrf.mxu2 }
 0x128   : > { %v746_v15 = vadd.f32 %v733_v12, %v660_v51 }
 0x129   : > { %v876_v41 = vld [vmem:[#allocation2 + $0x20] sm:$0xff] }
 0x12a   : > { %754 = vst.msk [vmem:[#allocation2 + $0x28] sm:$0xff] %vm585_vm1, %v746_v15 }
 0x12b   : > { %v929_v0 = vpop.f32.mrf.mxu1 }
 0x12c   : > { %v949_v18 = vadd.f32 %v929_v0, %v872_v50  ;;  %v875_v61 = vld [vmem:[#allocation2 + $0x18] sm:$0xff] }
 0x12d   : > { %1980 = vmatmul.msk.bf16.gmra.mxu3 %vm695_vm3, %v1481_v20 }
 0x12e   : > { %957 = vst.msk [vmem:[#allocation2] sm:$0xff] %vm585_vm1, %v949_v18 }
 0x12f   : > { %v1252_v21 = vpop.f32.mrf.mxu0 }
 0x130   : > { %v736_v22 = vpop.f32.mrf.mxu3  ;;  %v1065_v26 = vpop.f32.mrf.mxu2 }
 0x131   : > { %v747_v4 = vadd.f32 %v736_v22, %v661_v9  ;;  %v877_v17 = vld [vmem:[#allocation2 + $0x28] sm:$0xff] }
 0x133   : > { %v931_v28 = vpop.f32.mrf.mxu1  ;;  %755 = vst.msk [vmem:[#allocation2 + $0x30] sm:$0xff] %vm585_vm1, %v747_v4 }
 0x134   : > { %v950_v1 = vadd.f32 %v931_v28, %v873_v27 }
 0x135   : > { %v1008_v8 = vld [vmem:[#allocation2] sm:$0xff] }
 0x136   : > { %v1085_v30 = vadd.f32 %v1065_v26, %v1008_v8  ;;  %958 = vst.msk [vmem:[#allocation2 + $0x8] sm:$0xff] %vm585_vm1, %v950_v1 }
 0x137   : > { %v1254_v23 = vpop.f32.mrf.mxu0 }
 0x138   : > { %1093 = vst.msk [vmem:[#allocation2] sm:$0xff] %vm585_vm1, %v1085_v30  ;;  %v738_v25 = vpop.f32.mrf.mxu3  ;;  %v1067_v42 = vpop.f32.mrf.mxu2 }
 0x139   : > { %v748_v31 = vadd.f32 %v738_v25, %v662_v36 }
 0x13a   : > { %v878_v15 = vld [vmem:[#allocation2 + $0x30] sm:$0xff] }
 0x13b   : > { %v934_v45 = vpop.f32.mrf.mxu1  ;;  %756 = vst.msk [vmem:[#allocation2 + $0x38] sm:$0xff] %vm585_vm1, %v748_v31 }
 0x13c   : > { %v951_v52 = vadd.f32 %v934_v45, %v874_v44 }
 0x13d   : > { %v1009_v53 = vld [vmem:[#allocation2 + $0x8] sm:$0xff] }
 0x13e   : > { %v1086_v3 = vadd.f32 %v1067_v42, %v1009_v53  ;;  %959 = vst.msk [vmem:[#allocation2 + $0x10] sm:$0xff] %vm585_vm1, %v951_v52 }
 0x13f   : > { %v1257_v6 = vpop.f32.mrf.mxu0  ;;  %v1101_v14 = vld [vmem:[#allocation2] sm:$0xff] }
 0x140   : > { %1094 = vst.msk [vmem:[#allocation2 + $0x8] sm:$0xff] %vm585_vm1, %v1086_v3  ;;  %v1152_v29 = vpop.f32.mrf.mxu3  ;;  %v1070_v11 = vpop.f32.mrf.mxu2 }
 0x141   : > { %v1172_v24 = vadd.f32 %v1152_v29, %v1101_v14 }
 0x142   : > { %v879_v28 = vld [vmem:[#allocation2 + $0x38] sm:$0xff] }
 0x143   : > { %v936_v34 = vpop.f32.mrf.mxu1  ;;  %1180 = vst.msk [vmem:[#allocation2] sm:$0xff] %vm585_vm1, %v1172_v24 }
 0x144   : > { %v952_v10 = vadd.f32 %v936_v34, %v875_v61 }
 0x145   : > { %v1010_v16 = vld [vmem:[#allocation2 + $0x10] sm:$0xff] }
 0x146   : > { %v1087_v35 = vadd.f32 %v1070_v11, %v1010_v16  ;;  %960 = vst.msk [vmem:[#allocation2 + $0x18] sm:$0xff] %vm585_vm1, %v952_v10 }
 0x147   : > { %v1102_v32 = vld [vmem:[#allocation2 + $0x8] sm:$0xff]  ;;  %v1259_v39 = vpop.f32.mrf.mxu0 }
 0x148   : > { %1095 = vst.msk [vmem:[#allocation2 + $0x10] sm:$0xff] %vm585_vm1, %v1087_v35  ;;  %v1154_v19 = vpop.f32.mrf.mxu3  ;;  %v1072_v63 = vpop.f32.mrf.mxu2 }
 0x149   : > { %v1173_v37 = vadd.f32 %v1154_v19, %v1102_v32 }
 0x14a   : > { %v1202_v47 = vld [vmem:[#allocation2] sm:$0xff] }
 0x14b   : > { %v939_v46 = vpop.f32.mrf.mxu1  ;;  %1181 = vst.msk [vmem:[#allocation2 + $0x8] sm:$0xff] %vm585_vm1, %v1173_v37  ;;  %v1272_v40 = vadd.f32 %v1252_v21, %v1202_v47 }
 0x14c   : > { %v953_v43 = vadd.f32 %v939_v46, %v876_v41 }
 0x14d   : > { %v1011_v38 = vld [vmem:[#allocation2 + $0x18] sm:$0xff]  ;;  %1280 = vst.msk [vmem:[#allocation2] sm:$0xff] %vm585_vm1, %v1272_v40 }
 0x14e   : > { %v1088_v48 = vadd.f32 %v1072_v63, %v1011_v38  ;;  %961 = vst.msk [vmem:[#allocation2 + $0x20] sm:$0xff] %vm585_vm1, %v953_v43 }
 0x14f   : > { %v1103_v55 = vld [vmem:[#allocation2 + $0x10] sm:$0xff]  ;;  %v1262_v2 = vpop.f32.mrf.mxu0 }
 0x150   : > { %1096 = vst.msk [vmem:[#allocation2 + $0x18] sm:$0xff] %vm585_vm1, %v1088_v48  ;;  %v1157_v49 = vpop.f32.mrf.mxu3  ;;  %v1075_v5 = vpop.f32.mrf.mxu2 }
 0x151   : > { %v1174_v7 = vadd.f32 %v1157_v49, %v1103_v55 }
 0x152   : > { %v1203_v56 = vld [vmem:[#allocation2 + $0x8] sm:$0xff] }
 0x153   : > { %v941_v33 = vpop.f32.mrf.mxu1  ;;  %1182 = vst.msk [vmem:[#allocation2 + $0x10] sm:$0xff] %vm585_vm1, %v1174_v7  ;;  %v1273_v58 = vadd.f32 %v1254_v23, %v1203_v56 }
 0x154   : > { %v954_v54 = vadd.f32 %v941_v33, %v877_v17  ;;  %v1293_v53 = vld [vmem:[#allocation2] sm:$0xff] }
 0x155   : > { %v1012_v57 = vld [vmem:[#allocation2 + $0x20] sm:$0xff]  ;;  %1281 = vst.msk [vmem:[#allocation2 + $0x8] sm:$0xff] %vm585_vm1, %v1273_v58 }
 0x156   : > { %v1089_v59 = vadd.f32 %v1075_v5, %v1012_v57  ;;  %962 = vst.msk [vmem:[#allocation2 + $0x28] sm:$0xff] %vm585_vm1, %v954_v54 }
 0x157   : > { %v1104_v60 = vld [vmem:[#allocation2 + $0x18] sm:$0xff]  ;;  %v1264_v21 = vpop.f32.mrf.mxu0 }
 0x158   : > { %1097 = vst.msk [vmem:[#allocation2 + $0x20] sm:$0xff] %vm585_vm1, %v1089_v59  ;;  %v1159_v51 = vpop.f32.mrf.mxu3  ;;  %v1077_v62 = vpop.f32.mrf.mxu2 }
 0x159   : > { %v1175_v12 = vadd.f32 %v1159_v51, %v1104_v60 }
 0x15a   : > { %v1204_v0 = vld [vmem:[#allocation2 + $0x10] sm:$0xff] }
 0x15b   : > { %v944_v13 = vpop.f32.mrf.mxu1  ;;  %1183 = vst.msk [vmem:[#allocation2 + $0x18] sm:$0xff] %vm585_vm1, %v1175_v12  ;;  %v1274_v20 = vadd.f32 %v1257_v6, %v1204_v0 }
 0x15c   : > { %v955_v50 = vadd.f32 %v944_v13, %v878_v15  ;;  %v1294_v32 = vld [vmem:[#allocation2 + $0x8] sm:$0xff] }
 0x15d   : > { %v1013_v18 = vld [vmem:[#allocation2 + $0x28] sm:$0xff]  ;;  %1282 = vst.msk [vmem:[#allocation2 + $0x10] sm:$0xff] %vm585_vm1, %v1274_v20 }
 0x15e   : > { %v1090_v9 = vadd.f32 %v1077_v62, %v1013_v18  ;;  %963 = vst.msk [vmem:[#allocation2 + $0x30] sm:$0xff] %vm585_vm1, %v955_v50 }
 0x15f   : > { %v1105_v22 = vld [vmem:[#allocation2 + $0x20] sm:$0xff]  ;;  %v1267_v31 = vpop.f32.mrf.mxu0 }
 0x160   : > { %1098 = vst.msk [vmem:[#allocation2 + $0x28] sm:$0xff] %vm585_vm1, %v1090_v9  ;;  %v1162_v4 = vpop.f32.mrf.mxu3  ;;  %v1080_v26 = vpop.f32.mrf.mxu2 }
 0x161   : > { %v1176_v27 = vadd.f32 %v1162_v4, %v1105_v22 }
 0x162   : > { %v1205_v30 = vld [vmem:[#allocation2 + $0x18] sm:$0xff] }
 0x163   : > { %v946_v1 = vpop.f32.mrf.mxu1  ;;  %1184 = vst.msk [vmem:[#allocation2 + $0x20] sm:$0xff] %vm585_vm1, %v1176_v27  ;;  %v1275_v23 = vadd.f32 %v1259_v39, %v1205_v30 }
 0x164   : > { %v956_v8 = vadd.f32 %v946_v1, %v879_v28  ;;  %v1295_v48 = vld [vmem:[#allocation2 + $0x10] sm:$0xff] }
 0x165   : > { %v1014_v36 = vld [vmem:[#allocation2 + $0x30] sm:$0xff]  ;;  %1283 = vst.msk [vmem:[#allocation2 + $0x18] sm:$0xff] %vm585_vm1, %v1275_v23 }
 0x166   : > { %v1091_v25 = vadd.f32 %v1080_v26, %v1014_v36  ;;  %964 = vst.msk [vmem:[#allocation2 + $0x38] sm:$0xff] %vm585_vm1, %v956_v8 }
 0x167   : > { %v1106_v42 = vld [vmem:[#allocation2 + $0x28] sm:$0xff]  ;;  %v1269_v10 = vpop.f32.mrf.mxu0 }
 0x168   : > { %1099 = vst.msk [vmem:[#allocation2 + $0x30] sm:$0xff] %vm585_vm1, %v1091_v25  ;;  %v1164_v44 = vpop.f32.mrf.mxu3  ;;  %v1082_v45 = vpop.f32.mrf.mxu2 }
 0x169   : > { %v1177_v52 = vadd.f32 %v1164_v44, %v1106_v42 }
 0x16a   : > { %v1206_v14 = vld [vmem:[#allocation2 + $0x20] sm:$0xff] }
 0x16b   : > { %v1343_v3 = vpop.f32.mrf.mxu1  ;;  %1185 = vst.msk [vmem:[#allocation2 + $0x28] sm:$0xff] %vm585_vm1, %v1177_v52  ;;  %v1276_v11 = vadd.f32 %v1262_v2, %v1206_v14 }
 0x16c   : > { %v1363_v6 = vadd.f32 %v1343_v3, %v1293_v53  ;;  %v1296_v59 = vld [vmem:[#allocation2 + $0x18] sm:$0xff] }
 0x16d   : > { %v1015_v29 = vld [vmem:[#allocation2 + $0x38] sm:$0xff]  ;;  %1284 = vst.msk [vmem:[#allocation2 + $0x20] sm:$0xff] %vm585_vm1, %v1276_v11 }
 0x16e   : > { %v1092_v24 = vadd.f32 %v1082_v45, %v1015_v29  ;;  %1371 = vst.msk [vmem:[#allocation2] sm:$0xff] %vm585_vm1, %v1363_v6 }
 0x16f   : > { %v1107_v61 = vld [vmem:[#allocation2 + $0x30] sm:$0xff]  ;;  %v1585_v49 = vpop.f32.mrf.mxu0 }
 0x170   : > { %1100 = vst.msk [vmem:[#allocation2 + $0x38] sm:$0xff] %vm585_vm1, %v1092_v24  ;;  %v1167_v34 = vpop.f32.mrf.mxu3  ;;  %v1418_v35 = vpop.f32.mrf.mxu2 }
 0x171   : > { %v1178_v16 = vadd.f32 %v1167_v34, %v1107_v61 }
 0x172   : > { %v1207_v37 = vld [vmem:[#allocation2 + $0x28] sm:$0xff] }
 0x173   : > { %v1345_v19 = vpop.f32.mrf.mxu1  ;;  %1186 = vst.msk [vmem:[#allocation2 + $0x30] sm:$0xff] %vm585_vm1, %v1178_v16  ;;  %v1277_v41 = vadd.f32 %v1264_v21, %v1207_v37 }
 0x174   : > { %v1364_v63 = vadd.f32 %v1345_v19, %v1294_v32  ;;  %v1297_v22 = vld [vmem:[#allocation2 + $0x20] sm:$0xff] }
 0x175   : > { %v1379_v39 = vld [vmem:[#allocation2] sm:$0xff]  ;;  %1285 = vst.msk [vmem:[#allocation2 + $0x28] sm:$0xff] %vm585_vm1, %v1277_v41 }
 0x176   : > { %v1438_v46 = vadd.f32 %v1418_v35, %v1379_v39  ;;  %1372 = vst.msk [vmem:[#allocation2 + $0x8] sm:$0xff] %vm585_vm1, %v1364_v63 }
 0x177   : > { %v1108_v43 = vld [vmem:[#allocation2 + $0x38] sm:$0xff]  ;;  %v1587_v13 = vpop.f32.mrf.mxu0 }
 0x178   : > { %1446 = vst.msk [vmem:[#allocation2] sm:$0xff] %vm585_vm1, %v1438_v46  ;;  %v1169_v47 = vpop.f32.mrf.mxu3  ;;  %v1420_v40 = vpop.f32.mrf.mxu2 }
 0x179   : > { %v1179_v38 = vadd.f32 %v1169_v47, %v1108_v43 }
 0x17a   : > { %v1208_v7 = vld [vmem:[#allocation2 + $0x30] sm:$0xff] }
 0x17b   : > { %v1348_v55 = vpop.f32.mrf.mxu1  ;;  %1187 = vst.msk [vmem:[#allocation2 + $0x38] sm:$0xff] %vm585_vm1, %v1179_v38  ;;  %v1278_v33 = vadd.f32 %v1267_v31, %v1208_v7 }
 0x17c   : > { %v1365_v5 = vadd.f32 %v1348_v55, %v1295_v48  ;;  %v1298_v42 = vld [vmem:[#allocation2 + $0x28] sm:$0xff] }
 0x17d   : > { %v1380_v17 = vld [vmem:[#allocation2 + $0x8] sm:$0xff]  ;;  %1286 = vst.msk [vmem:[#allocation2 + $0x30] sm:$0xff] %vm585_vm1, %v1278_v33 }
 0x17e   : > { %v1439_v2 = vadd.f32 %v1420_v40, %v1380_v17  ;;  %1373 = vst.msk [vmem:[#allocation2 + $0x10] sm:$0xff] %vm585_vm1, %v1365_v5 }
 0x17f   : > { %v1468_v54 = vld [vmem:[#allocation2] sm:$0xff]  ;;  %v1590_v8 = vpop.f32.mrf.mxu0 }
 0x180   : > { %1447 = vst.msk [vmem:[#allocation2 + $0x8] sm:$0xff] %vm585_vm1, %v1439_v2  ;;  %v1506_v56 = vpop.f32.mrf.mxu3  ;;  %v1423_v57 = vpop.f32.mrf.mxu2 }
 0x181   : > { %v1526_v58 = vadd.f32 %v1506_v56, %v1468_v54 }
 0x182   : > { %v1209_v62 = vld [vmem:[#allocation2 + $0x38] sm:$0xff] }
 0x183   : > { %v1350_v60 = vpop.f32.mrf.mxu1  ;;  %1534 = vst.msk [vmem:[#allocation2] sm:$0xff] %vm585_vm1, %v1526_v58  ;;  %v1279_v15 = vadd.f32 %v1269_v10, %v1209_v62 }
 0x184   : > { %v1366_v51 = vadd.f32 %v1350_v60, %v1296_v59  ;;  %v1299_v10 = vld [vmem:[#allocation2 + $0x30] sm:$0xff] }
 0x185   : > { %v1381_v12 = vld [vmem:[#allocation2 + $0x10] sm:$0xff]  ;;  %1287 = vst.msk [vmem:[#allocation2 + $0x38] sm:$0xff] %vm585_vm1, %v1279_v15 }
 0x186   : > { %v1440_v50 = vadd.f32 %v1423_v57, %v1381_v12  ;;  %1374 = vst.msk [vmem:[#allocation2 + $0x18] sm:$0xff] %vm585_vm1, %v1366_v51 }
 0x187   : > { %v1469_v0 = vld [vmem:[#allocation2 + $0x8] sm:$0xff]  ;;  %v1592_v11 = vpop.f32.mrf.mxu0 }
 0x188   : > { %1448 = vst.msk [vmem:[#allocation2 + $0x10] sm:$0xff] %vm585_vm1, %v1440_v50  ;;  %v1508_v18 = vpop.f32.mrf.mxu3  ;;  %v1425_v20 = vpop.f32.mrf.mxu2 }
 0x189   : > { %v1527_v9 = vadd.f32 %v1508_v18, %v1469_v0 }
 0x18a   : > { %v1547_v21 = vld [vmem:[#allocation2] sm:$0xff] }
 0x18b   : > { %v1353_v4 = vpop.f32.mrf.mxu1  ;;  %v1605_v26 = vadd.f32 %v1585_v49, %v1547_v21  ;;  %1535 = vst.msk [vmem:[#allocation2 + $0x8] sm:$0xff] %vm585_vm1, %v1527_v9 }
 0x18c   : > { %v1367_v27 = vadd.f32 %v1353_v4, %v1297_v22  ;;  %v1300_v47 = vld [vmem:[#allocation2 + $0x38] sm:$0xff] }
 0x18d   : > { %v1382_v28 = vld [vmem:[#allocation2 + $0x18] sm:$0xff]  ;;  %1613 = vst.msk [vmem:[#allocation2] sm:$0xff] %vm585_vm1, %v1605_v26 }
 0x18e   : > { %v1441_v1 = vadd.f32 %v1425_v20, %v1382_v28  ;;  %1375 = vst.msk [vmem:[#allocation2 + $0x20] sm:$0xff] %vm585_vm1, %v1367_v27 }
 0x18f   : > { %v1470_v30 = vld [vmem:[#allocation2 + $0x10] sm:$0xff]  ;;  %v1595_v49 = vpop.f32.mrf.mxu0 }
 0x190   : > { %1449 = vst.msk [vmem:[#allocation2 + $0x18] sm:$0xff] %vm585_vm1, %v1441_v1  ;;  %v1511_v36 = vpop.f32.mrf.mxu3  ;;  %v1428_v23 = vpop.f32.mrf.mxu2 }
 0x191   : > { %v1528_v25 = vadd.f32 %v1511_v36, %v1470_v30 }
 0x192   : > { %v1548_v31 = vld [vmem:[#allocation2 + $0x8] sm:$0xff] }
 0x193   : > { %v1355_v44 = vpop.f32.mrf.mxu1  ;;  %v1606_v45 = vadd.f32 %v1587_v13, %v1548_v31  ;;  %1536 = vst.msk [vmem:[#allocation2 + $0x10] sm:$0xff] %vm585_vm1, %v1528_v25 }
 0x194   : > { %v1368_v52 = vadd.f32 %v1355_v44, %v1298_v42  ;;  %v2806_v53 = vld [vmem:[#allocation2] sm:$0xff] }
 0x195   : > { %1629 = vst.msk [vmem:[%s2803_s13] sm:$0xff] %vm585_vm1, %v2806_v53  ;;  %v1383_v3 = vld [vmem:[#allocation2 + $0x20] sm:$0xff]  ;;  %v1660_v1 = vmul.f32 %v2806_v53, %v2806_v53  ;;  %v1637_v36 = vsel %vm585_vm1, %v2806_v53, 0.0 }
 0x196   : > { %1614 = vst.msk [vmem:[#allocation2 + $0x8] sm:$0xff] %vm585_vm1, %v1606_v45  ;;  %v1442_v6 = vadd.f32 %v1428_v23, %v1383_v3 }
 0x197   : > { %1376 = vst.msk [vmem:[#allocation2 + $0x28] sm:$0xff] %vm585_vm1, %v1368_v52  ;;  %v1471_v14 = vld [vmem:[#allocation2 + $0x18] sm:$0xff]  ;;  %v1597_v59 = vpop.f32.mrf.mxu0  ;;  %v1668_v3 = vsel %vm585_vm1, %v1660_v1, 0.0 }
 0x198   : > { %1450 = vst.msk [vmem:[#allocation2 + $0x20] sm:$0xff] %vm585_vm1, %v1442_v6  ;;  %v1513_v29 = vpop.f32.mrf.mxu3  ;;  %v1430_v34 = vpop.f32.mrf.mxu2 }
 0x199   : > { %v1529_v24 = vadd.f32 %v1513_v29, %v1471_v14 }
 0x19a   : > { %v1549_v61 = vld [vmem:[#allocation2 + $0x10] sm:$0xff] }
 0x19b   : > { %v1358_v16 = vpop.f32.mrf.mxu1  ;;  %v1607_v35 = vadd.f32 %v1590_v8, %v1549_v61  ;;  %1537 = vst.msk [vmem:[#allocation2 + $0x18] sm:$0xff] %vm585_vm1, %v1529_v24 }
 0x19c   : > { %v1369_v32 = vadd.f32 %v1358_v16, %v1299_v10 }
 0x19d   : > { %v1622_v19 = vld [vmem:[#allocation2 + $0x8] sm:$0xff]  ;;  %1615 = vst.msk [vmem:[#allocation2 + $0x10] sm:$0xff] %vm585_vm1, %v1607_v35 }
 0x19e   : > { %1630 = vst.msk [vmem:[%s2803_s13 + $0x8] sm:$0xff] %vm585_vm1, %v1622_v19  ;;  %v1384_v63 = vld [vmem:[#allocation2 + $0x28] sm:$0xff]  ;;  %v1661_v28 = vmul.f32 %v1622_v19, %v1622_v19  ;;  %v1638_v8 = vsel %vm585_vm1, %v1622_v19, 0.0 }
 0x19f   : > { %v1443_v37 = vadd.f32 %v1430_v34, %v1384_v63  ;;  %1377 = vst.msk [vmem:[#allocation2 + $0x30] sm:$0xff] %vm585_vm1, %v1369_v32  ;;  %v1472_v39 = vld [vmem:[#allocation2 + $0x20] sm:$0xff]  ;;  %v1600_v20 = vpop.f32.mrf.mxu0  ;;  %v1639_v45 = vadd.f32 %v1638_v8, %v1637_v36 }
 0x1a0   : > { %v1516_v41 = vpop.f32.mrf.mxu3  ;;  %v1433_v5 = vpop.f32.mrf.mxu2  ;;  %v1669_v23 = vsel %vm585_vm1, %v1661_v28, 0.0 }
 0x1a1   : > { %1451 = vst.msk [vmem:[#allocation2 + $0x28] sm:$0xff] %vm585_vm1, %v1443_v37  ;;  %v1530_v46 = vadd.f32 %v1516_v41, %v1472_v39  ;;  %v1670_v24 = vadd.f32 %v1669_v23, %v1668_v3 }
 0x1a2   : > { %v1550_v43 = vld [vmem:[#allocation2 + $0x18] sm:$0xff] }
 0x1a3   : > { %v1360_v38 = vpop.f32.mrf.mxu1  ;;  %v1608_v40 = vadd.f32 %v1592_v11, %v1550_v43  ;;  %1538 = vst.msk [vmem:[#allocation2 + $0x20] sm:$0xff] %vm585_vm1, %v1530_v46 }
 0x1a4   : > { %v1370_v48 = vadd.f32 %v1360_v38, %v1300_v47  ;;  %v1623_v55 = vld [vmem:[#allocation2 + $0x10] sm:$0xff] }
 0x1a5   : > { %1631 = vst.msk [vmem:[%s2803_s13 + $0x10] sm:$0xff] %vm585_vm1, %v1623_v55  ;;  %v1662_v30 = vmul.f32 %v1623_v55, %v1623_v55  ;;  %v1640_v25 = vsel %vm585_vm1, %v1623_v55, 0.0 }
 0x1a6   : > { %1616 = vst.msk [vmem:[#allocation2 + $0x18] sm:$0xff] %vm585_vm1, %v1608_v40  ;;  %v1385_v7 = vld [vmem:[#allocation2 + $0x30] sm:$0xff]  ;;  %v1641_v61 = vadd.f32 %v1640_v25, %v1639_v45 }
 0x1a7   : > { %v1444_v17 = vadd.f32 %v1433_v5, %v1385_v7  ;;  %1378 = vst.msk [vmem:[#allocation2 + $0x38] sm:$0xff] %vm585_vm1, %v1370_v48  ;;  %v1602_v42 = vpop.f32.mrf.mxu0  ;;  %v1671_v6 = vsel %vm585_vm1, %v1662_v30, 0.0 }
 0x1a8   : > { %v1473_v33 = vld [vmem:[#allocation2 + $0x28] sm:$0xff]  ;;  %v1518_v2 = vpop.f32.mrf.mxu3  ;;  %v1435_v51 = vpop.f32.mrf.mxu2  ;;  %v1672_v16 = vadd.f32 %v1671_v6, %v1670_v24 }
 0x1a9   : > { %1452 = vst.msk [vmem:[#allocation2 + $0x30] sm:$0xff] %vm585_vm1, %v1444_v17  ;;  %v1531_v54 = vadd.f32 %v1518_v2, %v1473_v33 }
 0x1aa   : > { %v1551_v56 = vld [vmem:[#allocation2 + $0x20] sm:$0xff] }
 0x1ab   : > { %v1609_v57 = vadd.f32 %v1595_v49, %v1551_v56  ;;  %1539 = vst.msk [vmem:[#allocation2 + $0x28] sm:$0xff] %vm585_vm1, %v1531_v54 }
 0x1ad   : > { %v1624_v58 = vld [vmem:[#allocation2 + $0x18] sm:$0xff]  ;;  %1617 = vst.msk [vmem:[#allocation2 + $0x20] sm:$0xff] %vm585_vm1, %v1609_v57 }
 0x1ae   : > { %1632 = vst.msk [vmem:[%s2803_s13 + $0x18] sm:$0xff] %vm585_vm1, %v1624_v58  ;;  %v1386_v60 = vld [vmem:[#allocation2 + $0x38] sm:$0xff]  ;;  %v1663_v31 = vmul.f32 %v1624_v58, %v1624_v58  ;;  %v1642_v14 = vsel %vm585_vm1, %v1624_v58, 0.0 }
 0x1af   : > { %v1445_v62 = vadd.f32 %v1435_v51, %v1386_v60  ;;  %v1643_v35 = vadd.f32 %v1642_v14, %v1641_v61 }
 0x1b0   : > { %v1474_v12 = vld [vmem:[#allocation2 + $0x30] sm:$0xff]  ;;  %v1521_v15 = vpop.f32.mrf.mxu3  ;;  %v1673_v53 = vsel %vm585_vm1, %v1663_v31, 0.0 }
 0x1b1   : > { %1453 = vst.msk [vmem:[#allocation2 + $0x38] sm:$0xff] %vm585_vm1, %v1445_v62  ;;  %v1532_v13 = vadd.f32 %v1521_v15, %v1474_v12  ;;  %v1674_v37 = vadd.f32 %v1673_v53, %v1672_v16 }
 0x1b2   : > { %v1552_v50 = vld [vmem:[#allocation2 + $0x28] sm:$0xff] }
 0x1b3   : > { %v1610_v0 = vadd.f32 %v1597_v59, %v1552_v50  ;;  %1540 = vst.msk [vmem:[#allocation2 + $0x30] sm:$0xff] %vm585_vm1, %v1532_v13 }
 0x1b4   : > { %v1625_v18 = vld [vmem:[#allocation2 + $0x20] sm:$0xff] }
 0x1b5   : > { %1633 = vst.msk [vmem:[%s2803_s13 + $0x20] sm:$0xff] %vm585_vm1, %v1625_v18  ;;  %v1664_v29 = vmul.f32 %v1625_v18, %v1625_v18  ;;  %v1644_v34 = vsel %vm585_vm1, %v1625_v18, 0.0 }
 0x1b6   : > { %1618 = vst.msk [vmem:[#allocation2 + $0x28] sm:$0xff] %vm585_vm1, %v1610_v0  ;;  %v1645_v39 = vadd.f32 %v1644_v34, %v1643_v35 }
 0x1b7   : > { %v1675_v32 = vsel %vm585_vm1, %v1664_v29, 0.0 }
 0x1b8   : > { %v1475_v9 = vld [vmem:[#allocation2 + $0x38] sm:$0xff]  ;;  %v1523_v21 = vpop.f32.mrf.mxu3  ;;  %v1676_v43 = vadd.f32 %v1675_v32, %v1674_v37 }
 0x1b9   : > { %v1533_v22 = vadd.f32 %v1523_v21, %v1475_v9 }
 0x1ba   : > { %v1553_v4 = vld [vmem:[#allocation2 + $0x30] sm:$0xff] }
 0x1bb   : > { %v1611_v26 = vadd.f32 %v1600_v20, %v1553_v4  ;;  %1541 = vst.msk [vmem:[#allocation2 + $0x38] sm:$0xff] %vm585_vm1, %v1533_v22 }
 0x1bd   : > { %v1626_v27 = vld [vmem:[#allocation2 + $0x28] sm:$0xff]  ;;  %1619 = vst.msk [vmem:[#allocation2 + $0x30] sm:$0xff] %vm585_vm1, %v1611_v26 }
 0x1be   : > { %1634 = vst.msk [vmem:[%s2803_s13 + $0x28] sm:$0xff] %vm585_vm1, %v1626_v27  ;;  %v1665_v10 = vmul.f32 %v1626_v27, %v1626_v27  ;;  %v1646_v19 = vsel %vm585_vm1, %v1626_v27, 0.0 }
 0x1bf   : > { %v1647_v47 = vadd.f32 %v1646_v19, %v1645_v39 }
 0x1c0   : > { %v1677_v41 = vsel %vm585_vm1, %v1665_v10, 0.0 }
 0x1c1   : > { %v1678_v40 = vadd.f32 %v1677_v41, %v1676_v43 }
 0x1c2   : > { %v1554_v44 = vld [vmem:[#allocation2 + $0x38] sm:$0xff] }
 0x1c3   : > { %v1612_v52 = vadd.f32 %v1602_v42, %v1554_v44 }
 0x1c4   : > { %v1627_v11 = vld [vmem:[#allocation2 + $0x30] sm:$0xff] }
 0x1c5   : > { %1635 = vst.msk [vmem:[%s2803_s13 + $0x30] sm:$0xff] %vm585_vm1, %v1627_v11  ;;  %v1666_v63 = vmul.f32 %v1627_v11, %v1627_v11  ;;  %v1648_v46 = vsel %vm585_vm1, %v1627_v11, 0.0 }
 0x1c6   : > { %1620 = vst.msk [vmem:[#allocation2 + $0x38] sm:$0xff] %vm585_vm1, %v1612_v52  ;;  %v1649_v48 = vadd.f32 %v1648_v46, %v1647_v47 }
 0x1c7   : > { %v1679_v38 = vsel %vm585_vm1, %v1666_v63, 0.0 }
 0x1c8   : > { %v1680_v7 = vadd.f32 %v1679_v38, %v1678_v40 }
 0x1cd   : > { %v1628_v55 = vld [vmem:[#allocation2 + $0x38] sm:$0xff] }
 0x1ce   : > { %1636 = vst.msk [vmem:[%s2803_s13 + $0x38] sm:$0xff] %vm585_vm1, %v1628_v55  ;;  %v1650_v49 = vsel %vm585_vm1, %v1628_v55, 0.0  ;;  %v1667_v5 = vmul.f32 %v1628_v55, %v1628_v55 }
 0x1cf   : > { %v1651_v17 = vadd.f32 %v1650_v49, %v1649_v48 }
 0x1d0   : > { %v1681_v33 = vsel %vm585_vm1, %v1667_v5, 0.0 }
 0x1d1   : > { %v1652_v2 = vrot.slane %v1651_v17, 4  ;;  %v1682_v54 = vadd.f32 %v1681_v33, %v1680_v7 }
 0x1d3   : > { %v1653_v56 = vadd.f32 %v1652_v2, %v1651_v17  ;;  %v1683_v57 = vrot.slane %v1682_v54, 4 }
 0x1d5   : > { %v1654_v58 = vrot.slane %v1653_v56, 2  ;;  %v1684_v59 = vadd.f32 %v1683_v57, %v1682_v54 }
 0x1d7   : > { %v1655_v60 = vadd.f32 %v1654_v58, %v1653_v56  ;;  %v1685_v51 = vrot.slane %v1684_v59, 2 }
 0x1d9   : > { %v1656_v62 = vrot.slane %v1655_v60, 1  ;;  %v1686_v12 = vadd.f32 %v1685_v51, %v1684_v59 }
 0x1db   : > { %v1657_v15 = vadd.f32 %v1656_v62, %v1655_v60  ;;  %v1687_v13 = vrot.slane %v1686_v12, 1 }
 0x1dd   : > { %1659 = vst.msk [vmem:[%s363_s27] sm:$0x1] %vm1658_vm10, %v1657_v15  ;;  %v1688_v50 = vadd.f32 %v1687_v13, %v1686_v12 }
 0x1df   : > { %1689 = vst.msk [vmem:[%s363_s27 + $0x1] sm:$0x1] %vm1658_vm10, %v1688_v50 }
 0x1e0 PF: > { %s16_s22 = sadd.s32 1, %s2175_s22   ;;  %s2893_s18 = smov %s2167_s20 }
 0x1e1   : > { %p13_p10 = scmp.ge.s32.totalorder %s16_s22, 18   ;;  %s2894_s19 = smov %s2171_s21 }
 0x1e2   : > { %s2895_s20 = smov %s2898_s23  ;;  %s2896_s21 = smov %s2902_s24 }
 0x1e3   :  { %15 = sbr.rel (!%p13_p10) target bundleno = 3 (0x3), region = 92 }

</bundles_post_ra>
